<compile_context>
chip_gen: v7x
topology: tpu7x:2x2x1
jax: 0.10.0
libtpu: 0.0.40
codegen_flags: <defaults>
</compile_context>

<pallas_src>
import functools

import jax
import jax.numpy as jnp
from jax.experimental import pallas as pl
from jax.experimental.pallas import tpu as pltpu

KSIZE = 5
STRIDE = 2
BN_EPS = 1e-5

_VMEM = pl.BlockSpec(memory_space=pltpu.MemorySpace.VMEM)


def conv2d_size_out(size, kernel_size=KSIZE, stride=STRIDE):
    return (size - (kernel_size - 1) - 1) // stride + 1


# ------------------------------ fused Pallas kernel --------------------------------


def pgconvnet_kernel(a0_ref,
                     g1_ref, m1_ref, kp1_ref, kt1_ref, ga1_ref, be1_ref,
                     g2_ref, m2_ref, kp2_ref, kt2_ref, ga2_ref, be2_ref,
                     g3_ref, m3_ref, kp3_ref, kt3_ref, ga3_ref, be3_ref,
                     gfc_ref, wfc_ref, bfc_ref,
                     out_ref, *, softmax_axis):
    """Entire PGConvNet forward.  Activations are (B*H, W*C) bf16 slabs living in VMEM."""

    def conv_bn_relu(a, g_ref, m_ref, kp_ref, kt_ref, gamma_ref, beta_ref):
        k = g_ref.shape[0]                     # 5 kernel rows
        rows = g_ref.shape[1]                  # B * OH
        ncols = m_ref.shape[2]                 # OW * Cout
        cout = kp_ref.shape[1]
        ow = ncols // cout

        # conv (no bias: cancels under training-mode BN) as 5x(row-select, banded-weight) matmuls
        y = jnp.zeros((rows, ncols), jnp.float32)
        for kh in range(k):
            sel = jnp.dot(g_ref[kh], a,
                          preferred_element_type=jnp.float32).astype(jnp.bfloat16)
            y = y + jnp.dot(sel, m_ref[kh], preferred_element_type=jnp.float32)

        # BatchNorm2d, training-mode batch statistics over (B, OH, OW), folded into scale/shift.
        n_samples = float(rows * ow)
        colsum = jnp.sum(y, axis=0, keepdims=True)            # (1, OW*Cout)
        sqsum = jnp.sum(y * y, axis=0, keepdims=True)
        mean = jnp.dot(colsum, kp_ref[...],
                       preferred_element_type=jnp.float32) / n_samples        # (1, Cout)
        ex2 = jnp.dot(sqsum, kp_ref[...],
                      preferred_element_type=jnp.float32) / n_samples
        var = ex2 - mean * mean                                # biased variance (torch fwd)
        scale = gamma_ref[...] * jax.lax.rsqrt(var + BN_EPS)   # (1, Cout)
        shift = beta_ref[...] - mean * scale
        scale_f = jnp.dot(scale, kt_ref[...], preferred_element_type=jnp.float32)
        shift_f = jnp.dot(shift, kt_ref[...], preferred_element_type=jnp.float32)

        y = jnp.maximum(y * scale_f + shift_f, 0.0)            # ReLU
        return y.astype(jnp.bfloat16)                          # next layer's matmul operand

    a1 = conv_bn_relu(a0_ref[...], g1_ref, m1_ref, kp1_ref, kt1_ref, ga1_ref, be1_ref)
    a2 = conv_bn_relu(a1, g2_ref, m2_ref, kp2_ref, kt2_ref, ga2_ref, be2_ref)
    a3 = conv_bn_relu(a2, g3_ref, m3_ref, kp3_ref, kt3_ref, ga3_ref, be3_ref)

    # fc (weight permuted on host to keep torch's NCHW x.view(B,-1) semantics)
    logits = jnp.zeros(out_ref.shape, jnp.float32) + bfc_ref[...]
    for h in range(gfc_ref.shape[0]):
        sel = jnp.dot(gfc_ref[h], a3,
                      preferred_element_type=jnp.float32).astype(jnp.bfloat16)
        logits = logits + jnp.dot(sel, wfc_ref[h], preferred_element_type=jnp.float32)

    # torch: F.softmax(x.squeeze(0), dim=0)
    m = jnp.max(logits, axis=softmax_axis, keepdims=True)
    e = jnp.exp(logits - m)
    denom = jnp.sum(e, axis=softmax_axis, keepdims=True)
    out_ref[...] = e * pl.reciprocal(denom, approx=True)


# ------------------------- host-side one-time operand packing ----------------------


def _row_select(batch, hin, oh):
    """(5, B*OH, B*Hin) 0/1: picks input rows h = 2*oh + kh of the same batch element."""
    rows = jnp.arange(batch * oh)
    rb_, ro = rows // oh, rows % oh
    src = jnp.arange(batch * hin)
    sb, sh = src // hin, src % hin
    kh = jnp.arange(KSIZE)
    g = (rb_[None, :, None] == sb[None, None, :]) & \
        (sh[None, None, :] == STRIDE * ro[None, :, None] + kh[:, None, None])
    return g.astype(jnp.bfloat16)


def _band_weight(wt, win, ow):
    """Banded weight (5, Win*Cin, OW*Cout): M[kh, (w,c), (ow,co)] = W[co,c,kh,w-2*ow]."""
    cout, cin, k, _ = wt.shape
    kw = jnp.arange(win)[:, None] - STRIDE * jnp.arange(ow)[None, :]       # (win, ow)
    valid = (kw >= 0) & (kw < k)
    kw_c = jnp.clip(kw, 0, k - 1)
    wt_p = jnp.transpose(wt, (2, 3, 1, 0))                                 # (K, K, Cin, Cout)
    m = wt_p[:, kw_c]                                                      # (K, win, ow, Cin, Cout)
    m = jnp.where(valid[None, :, :, None, None], m, 0.0)
    m = jnp.transpose(m, (0, 1, 3, 2, 4)).reshape(k, win * cin, ow * cout)
    return m.astype(jnp.bfloat16)


def _chan_pool(ow, cout):
    """(OW*Cout, Cout) 0/1: sums the OW lane-groups per channel (BN statistics pooling)."""
    co = jnp.arange(ow * cout) % cout
    return (co[:, None] == jnp.arange(cout)[None, :]).astype(jnp.float32)


def _chan_bcast(ow, cout):
    """(Cout, OW*Cout) 0/1: broadcasts a per-channel row back over the OW lane-groups."""
    co = jnp.arange(ow * cout) % cout
    return (jnp.arange(cout)[:, None] == co[None, :]).astype(jnp.float32)


def _fc_row_select(batch, oh):
    """(OH3, B, B*OH3) 0/1: picks row (b, h) of the final conv slab for each fixed h."""
    rows = jnp.arange(batch)
    src = jnp.arange(batch * oh)
    sb, sh = src // oh, src % oh
    hh = jnp.arange(oh)
    g = (rows[None, :, None] == sb[None, None, :]) & (sh[None, None, :] == hh[:, None, None])
    return g.astype(jnp.bfloat16)


def _fc_weight(wfc, c_in, oh, ow):
    """Permute torch fc weight (outputs, C*OH*OW) -> (OH, OW*C, outputs) matching (w, c) lanes."""
    outputs = wfc.shape[0]
    w = wfc.reshape(outputs, c_in, oh, ow)
    w = jnp.transpose(w, (2, 3, 1, 0)).reshape(oh, ow * c_in, outputs)
    return w.astype(jnp.bfloat16)


def prepare_operands(params, batch, h, w):
    """Pack weights/selection matrices once (weight-side prep, off the activation path)."""
    layer_params = [
        (params["w1"], params["g1"], params["be1"]),
        (params["w2"], params["g2"], params["be2"]),
        (params["w3"], params["g3"], params["be3"]),
    ]
    ops = []
    hin, win = h, w
    for wt, gamma, beta in layer_params:
        cout = wt.shape[0]
        oh, ow = conv2d_size_out(hin), conv2d_size_out(win)
        ops += [
            _row_select(batch, hin, oh),
            _band_weight(wt, win, ow),
            _chan_pool(ow, cout),
            _chan_bcast(ow, cout),
            gamma.reshape(1, cout).astype(jnp.float32),
            beta.reshape(1, cout).astype(jnp.float32),
        ]
        hin, win = oh, ow
    c_last = layer_params[-1][0].shape[0]
    ops += [
        _fc_row_select(batch, hin),
        _fc_weight(params["wfc"], c_last, hin, win),
        params["bfc"].reshape(1, -1).astype(jnp.float32),
    ]
    return tuple(ops)


# ------------------------------------ forward --------------------------------------


def pgconvnet_forward(operands, x_nchw):
    b, c, h, w = x_nchw.shape
    # One-time boundary layout op: NCHW -> channels-last rows (B*H, W*C), bf16 MXU operands.
    a0 = jnp.transpose(x_nchw, (0, 2, 3, 1)).reshape(b * h, w * c).astype(jnp.bfloat16)
    outputs = operands[-1].shape[-1]
    # torch: F.softmax(x.squeeze(0), dim=0) -> actions if B==1, else over the batch axis.
    softmax_axis = 1 if b == 1 else 0
    out = pl.pallas_call(
        functools.partial(pgconvnet_kernel, softmax_axis=softmax_axis),
        out_shape=jax.ShapeDtypeStruct((b, outputs), jnp.float32),
        in_specs=[_VMEM] * (1 + len(operands)),
        out_specs=_VMEM,
    )(a0, *operands)
    return out.reshape(outputs) if b == 1 else out


# --------------------------- plain-JAX reference (spec check) ----------------------


def reference_forward(params, x):
    def rb(a):  # mirror the kernel's bf16 matmul-operand rounding
        return a.astype(jnp.bfloat16).astype(jnp.float32)

    def block(h, wt, bias, gamma, beta):
        y = jax.lax.conv_general_dilated(
            rb(h), rb(wt), window_strides=(STRIDE, STRIDE), padding="VALID",
            dimension_numbers=("NCHW", "OIHW", "NCHW"))
        y = y + bias[None, :, None, None]          # kept here; cancels under training-mode BN
        mean = jnp.mean(y, axis=(0, 2, 3), keepdims=True)
        var = jnp.mean((y - mean) ** 2, axis=(0, 2, 3), keepdims=True)
        y = (y - mean) * jax.lax.rsqrt(var + BN_EPS)
        return jnp.maximum(y * gamma[None, :, None, None] + beta[None, :, None, None], 0.0)

    h = block(x, params["w1"], params["b1"], params["g1"], params["be1"])
    h = block(h, params["w2"], params["b2"], params["g2"], params["be2"])
    h = block(h, params["w3"], params["b3"], params["g3"], params["be3"])
    b = x.shape[0]
    flat = h.reshape(b, -1)
    logits = rb(flat) @ rb(params["wfc"]).T + params["bfc"][None, :]
    ax = 1 if b == 1 else 0
    e = jnp.exp(logits - jnp.max(logits, axis=ax, keepdims=True))
    p = e / jnp.sum(e, axis=ax, keepdims=True)
    return p[0] if b == 1 else p


# --------------------------- parameter initialization ------------------------------


def init_params(key, h, w, outputs):
    def conv_init(k, cout, cin, ks):
        kw_, kb_ = jax.random.split(k)
        bound = 1.0 / float(cin * ks * ks) ** 0.5
        wt = jax.random.uniform(kw_, (cout, cin, ks, ks), jnp.float32, -bound, bound)
        bs = jax.random.uniform(kb_, (cout,), jnp.float32, -bound, bound)
        return wt, bs

    k1, k2, k3, k4 = jax.random.split(key, 4)
    w1, b1 = conv_init(k1, 16, 3, KSIZE)
    w2, b2 = conv_init(k2, 32, 16, KSIZE)
    w3, b3 = conv_init(k3, 32, 32, KSIZE)

    convw = conv2d_size_out(conv2d_size_out(conv2d_size_out(w)))
    convh = conv2d_size_out(conv2d_size_out(conv2d_size_out(h)))
    lin_in = convw * convh * 32
    kfw, kfb = jax.random.split(k4)
    bound = 1.0 / float(lin_in) ** 0.5
    wfc = jax.random.uniform(kfw, (outputs, lin_in), jnp.float32, -bound, bound)
    bfc = jax.random.uniform(kfb, (outputs,), jnp.float32, -bound, bound)

    return {
        "w1": w1, "b1": b1, "g1": jnp.ones((16,), jnp.float32), "be1": jnp.zeros((16,), jnp.float32),
        "w2": w2, "b2": b2, "g2": jnp.ones((32,), jnp.float32), "be2": jnp.zeros((32,), jnp.float32),
        "w3": w3, "b3": b3, "g3": jnp.ones((32,), jnp.float32), "be3": jnp.zeros((32,), jnp.float32),
        "wfc": wfc, "bfc": bfc,
    }


if __name__ == "__main__":
    # CartPole screen-style input: batch=2, 3 channels, 40x40, 2 actions.
    # Conv chain: 40 -> 18 -> 7 -> 2, so fc input = 2*2*32 = 128.
    B, H, W, OUTPUTS = 2, 40, 40, 2

    key = jax.random.PRNGKey(0)
    kx, kp = jax.random.split(key)
    x = jax.random.normal(kx, (B, 3, H, W), jnp.float32)
    params = init_params(kp, H, W, OUTPUTS)
    operands = prepare_operands(params, B, H, W)     # one-time weight packing

    fwd = jax.jit(pgconvnet_forward)
    probs = jax.block_until_ready(fwd(operands, x))

    ref = reference_forward(params, x)

    assert probs.shape == (B, OUTPUTS)
    assert bool(jnp.all(jnp.isfinite(probs)))
    # softmax ran over axis 0 (batch) for B>1, exactly like the torch code.
    assert bool(jnp.allclose(jnp.sum(probs, axis=0), 1.0, atol=1e-2))
    # bf16 matmul operands + approx reciprocal -> generous tolerance vs f32 reference.
    assert float(jnp.max(jnp.abs(probs - ref))) < 5e-2
    print("KERNEL_OK")
</pallas_src>

<mosaic_0001>
module attributes {stable_mosaic.version = 11 : i64} {
  func.func @pgconvnet_kernel(%arg0: memref<80x120xbf16, #tpu.memory_space<vmem>>, %arg1: memref<5x36x80xbf16, #tpu.memory_space<vmem>>, %arg2: memref<5x120x288xbf16, #tpu.memory_space<vmem>>, %arg3: memref<288x16xf32, #tpu.memory_space<vmem>>, %arg4: memref<16x288xf32, #tpu.memory_space<vmem>>, %arg5: memref<1x16xf32, #tpu.memory_space<vmem>>, %arg6: memref<1x16xf32, #tpu.memory_space<vmem>>, %arg7: memref<5x14x36xbf16, #tpu.memory_space<vmem>>, %arg8: memref<5x288x224xbf16, #tpu.memory_space<vmem>>, %arg9: memref<224x32xf32, #tpu.memory_space<vmem>>, %arg10: memref<32x224xf32, #tpu.memory_space<vmem>>, %arg11: memref<1x32xf32, #tpu.memory_space<vmem>>, %arg12: memref<1x32xf32, #tpu.memory_space<vmem>>, %arg13: memref<5x4x14xbf16, #tpu.memory_space<vmem>>, %arg14: memref<5x224x64xbf16, #tpu.memory_space<vmem>>, %arg15: memref<64x32xf32, #tpu.memory_space<vmem>>, %arg16: memref<32x64xf32, #tpu.memory_space<vmem>>, %arg17: memref<1x32xf32, #tpu.memory_space<vmem>>, %arg18: memref<1x32xf32, #tpu.memory_space<vmem>>, %arg19: memref<2x2x4xbf16, #tpu.memory_space<vmem>>, %arg20: memref<2x64x2xbf16, #tpu.memory_space<vmem>>, %arg21: memref<1x2xf32, #tpu.memory_space<vmem>>, %arg22: memref<2x2xf32, #tpu.memory_space<vmem>>) attributes {dimension_semantics = [], scalar_prefetch = 0 : i64, scratch_operands = 0 : i64, tpu.core_type = #tpu.core_type<tc>} {
    %c0 = arith.constant 0 : index
    %c0_0 = arith.constant 0 : index
    %0 = vector.load %arg0[%c0, %c0_0] : memref<80x120xbf16, #tpu.memory_space<vmem>>, vector<80x120xbf16>
    %cst = arith.constant 0.000000e+00 : f32
    %1 = vector.broadcast %cst : f32 to vector<36x288xf32>
    %c0_1 = arith.constant 0 : index
    %c0_2 = arith.constant 0 : index
    %c0_3 = arith.constant 0 : index
    %2 = vector.load %arg1[%c0_1, %c0_2, %c0_3] : memref<5x36x80xbf16, #tpu.memory_space<vmem>>, vector<1x36x80xbf16>
    %3 = vector.shape_cast %2 : vector<1x36x80xbf16> to vector<36x80xbf16>
    %cst_4 = arith.constant dense<0.000000e+00> : vector<36x120xf32>
    %4 = tpu.matmul %3, %0, %cst_4 {dimension_numbers = #tpu.dot_dimension_numbers<[1], [0], [0], [1], [0, 0, 1, 1], [], []>} : vector<36x80xbf16>, vector<80x120xbf16>, vector<36x120xf32> -> vector<36x120xf32>
    %5 = arith.truncf %4 : vector<36x120xf32> to vector<36x120xbf16>
    %c0_5 = arith.constant 0 : index
    %c0_6 = arith.constant 0 : index
    %c0_7 = arith.constant 0 : index
    %6 = vector.load %arg2[%c0_5, %c0_6, %c0_7] : memref<5x120x288xbf16, #tpu.memory_space<vmem>>, vector<1x120x288xbf16>
    %7 = vector.shape_cast %6 : vector<1x120x288xbf16> to vector<120x288xbf16>
    %cst_8 = arith.constant dense<0.000000e+00> : vector<36x288xf32>
    %8 = tpu.matmul %5, %7, %cst_8 {dimension_numbers = #tpu.dot_dimension_numbers<[1], [0], [0], [1], [0, 0, 1, 1], [], []>} : vector<36x120xbf16>, vector<120x288xbf16>, vector<36x288xf32> -> vector<36x288xf32>
    %9 = arith.addf %1, %8 : vector<36x288xf32>
    %c1 = arith.constant 1 : index
    %c0_9 = arith.constant 0 : index
    %c0_10 = arith.constant 0 : index
    %10 = vector.load %arg1[%c1, %c0_9, %c0_10] : memref<5x36x80xbf16, #tpu.memory_space<vmem>>, vector<1x36x80xbf16>
    %11 = vector.shape_cast %10 : vector<1x36x80xbf16> to vector<36x80xbf16>
    %cst_11 = arith.constant dense<0.000000e+00> : vector<36x120xf32>
    %12 = tpu.matmul %11, %0, %cst_11 {dimension_numbers = #tpu.dot_dimension_numbers<[1], [0], [0], [1], [0, 0, 1, 1], [], []>} : vector<36x80xbf16>, vector<80x120xbf16>, vector<36x120xf32> -> vector<36x120xf32>
    %13 = arith.truncf %12 : vector<36x120xf32> to vector<36x120xbf16>
    %c1_12 = arith.constant 1 : index
    %c0_13 = arith.constant 0 : index
    %c0_14 = arith.constant 0 : index
    %14 = vector.load %arg2[%c1_12, %c0_13, %c0_14] : memref<5x120x288xbf16, #tpu.memory_space<vmem>>, vector<1x120x288xbf16>
    %15 = vector.shape_cast %14 : vector<1x120x288xbf16> to vector<120x288xbf16>
    %cst_15 = arith.constant dense<0.000000e+00> : vector<36x288xf32>
    %16 = tpu.matmul %13, %15, %cst_15 {dimension_numbers = #tpu.dot_dimension_numbers<[1], [0], [0], [1], [0, 0, 1, 1], [], []>} : vector<36x120xbf16>, vector<120x288xbf16>, vector<36x288xf32> -> vector<36x288xf32>
    %17 = arith.addf %9, %16 : vector<36x288xf32>
    %c2 = arith.constant 2 : index
    %c0_16 = arith.constant 0 : index
    %c0_17 = arith.constant 0 : index
    %18 = vector.load %arg1[%c2, %c0_16, %c0_17] : memref<5x36x80xbf16, #tpu.memory_space<vmem>>, vector<1x36x80xbf16>
    %19 = vector.shape_cast %18 : vector<1x36x80xbf16> to vector<36x80xbf16>
    %cst_18 = arith.constant dense<0.000000e+00> : vector<36x120xf32>
    %20 = tpu.matmul %19, %0, %cst_18 {dimension_numbers = #tpu.dot_dimension_numbers<[1], [0], [0], [1], [0, 0, 1, 1], [], []>} : vector<36x80xbf16>, vector<80x120xbf16>, vector<36x120xf32> -> vector<36x120xf32>
    %21 = arith.truncf %20 : vector<36x120xf32> to vector<36x120xbf16>
    %c2_19 = arith.constant 2 : index
    %c0_20 = arith.constant 0 : index
    %c0_21 = arith.constant 0 : index
    %22 = vector.load %arg2[%c2_19, %c0_20, %c0_21] : memref<5x120x288xbf16, #tpu.memory_space<vmem>>, vector<1x120x288xbf16>
    %23 = vector.shape_cast %22 : vector<1x120x288xbf16> to vector<120x288xbf16>
    %cst_22 = arith.constant dense<0.000000e+00> : vector<36x288xf32>
    %24 = tpu.matmul %21, %23, %cst_22 {dimension_numbers = #tpu.dot_dimension_numbers<[1], [0], [0], [1], [0, 0, 1, 1], [], []>} : vector<36x120xbf16>, vector<120x288xbf16>, vector<36x288xf32> -> vector<36x288xf32>
    %25 = arith.addf %17, %24 : vector<36x288xf32>
    %c3 = arith.constant 3 : index
    %c0_23 = arith.constant 0 : index
    %c0_24 = arith.constant 0 : index
    %26 = vector.load %arg1[%c3, %c0_23, %c0_24] : memref<5x36x80xbf16, #tpu.memory_space<vmem>>, vector<1x36x80xbf16>
    %27 = vector.shape_cast %26 : vector<1x36x80xbf16> to vector<36x80xbf16>
    %cst_25 = arith.constant dense<0.000000e+00> : vector<36x120xf32>
    %28 = tpu.matmul %27, %0, %cst_25 {dimension_numbers = #tpu.dot_dimension_numbers<[1], [0], [0], [1], [0, 0, 1, 1], [], []>} : vector<36x80xbf16>, vector<80x120xbf16>, vector<36x120xf32> -> vector<36x120xf32>
    %29 = arith.truncf %28 : vector<36x120xf32> to vector<36x120xbf16>
    %c3_26 = arith.constant 3 : index
    %c0_27 = arith.constant 0 : index
    %c0_28 = arith.constant 0 : index
    %30 = vector.load %arg2[%c3_26, %c0_27, %c0_28] : memref<5x120x288xbf16, #tpu.memory_space<vmem>>, vector<1x120x288xbf16>
    %31 = vector.shape_cast %30 : vector<1x120x288xbf16> to vector<120x288xbf16>
    %cst_29 = arith.constant dense<0.000000e+00> : vector<36x288xf32>
    %32 = tpu.matmul %29, %31, %cst_29 {dimension_numbers = #tpu.dot_dimension_numbers<[1], [0], [0], [1], [0, 0, 1, 1], [], []>} : vector<36x120xbf16>, vector<120x288xbf16>, vector<36x288xf32> -> vector<36x288xf32>
    %33 = arith.addf %25, %32 : vector<36x288xf32>
    %c4 = arith.constant 4 : index
    %c0_30 = arith.constant 0 : index
    %c0_31 = arith.constant 0 : index
    %34 = vector.load %arg1[%c4, %c0_30, %c0_31] : memref<5x36x80xbf16, #tpu.memory_space<vmem>>, vector<1x36x80xbf16>
    %35 = vector.shape_cast %34 : vector<1x36x80xbf16> to vector<36x80xbf16>
    %cst_32 = arith.constant dense<0.000000e+00> : vector<36x120xf32>
    %36 = tpu.matmul %35, %0, %cst_32 {dimension_numbers = #tpu.dot_dimension_numbers<[1], [0], [0], [1], [0, 0, 1, 1], [], []>} : vector<36x80xbf16>, vector<80x120xbf16>, vector<36x120xf32> -> vector<36x120xf32>
    %37 = arith.truncf %36 : vector<36x120xf32> to vector<36x120xbf16>
    %c4_33 = arith.constant 4 : index
    %c0_34 = arith.constant 0 : index
    %c0_35 = arith.constant 0 : index
    %38 = vector.load %arg2[%c4_33, %c0_34, %c0_35] : memref<5x120x288xbf16, #tpu.memory_space<vmem>>, vector<1x120x288xbf16>
    %39 = vector.shape_cast %38 : vector<1x120x288xbf16> to vector<120x288xbf16>
    %cst_36 = arith.constant dense<0.000000e+00> : vector<36x288xf32>
    %40 = tpu.matmul %37, %39, %cst_36 {dimension_numbers = #tpu.dot_dimension_numbers<[1], [0], [0], [1], [0, 0, 1, 1], [], []>} : vector<36x120xbf16>, vector<120x288xbf16>, vector<36x288xf32> -> vector<36x288xf32>
    %41 = arith.addf %33, %40 : vector<36x288xf32>
    %cst_37 = arith.constant dense<0.000000e+00> : vector<288xf32>
    %42 = vector.multi_reduction <add>, %41, %cst_37 [0] : vector<36x288xf32> to vector<288xf32>
    %43 = vector.shape_cast %42 : vector<288xf32> to vector<1x288xf32>
    %44 = arith.mulf %41, %41 : vector<36x288xf32>
    %cst_38 = arith.constant dense<0.000000e+00> : vector<288xf32>
    %45 = vector.multi_reduction <add>, %44, %cst_38 [0] : vector<36x288xf32> to vector<288xf32>
    %46 = vector.shape_cast %45 : vector<288xf32> to vector<1x288xf32>
    %c0_39 = arith.constant 0 : index
    %c0_40 = arith.constant 0 : index
    %47 = vector.load %arg3[%c0_39, %c0_40] : memref<288x16xf32, #tpu.memory_space<vmem>>, vector<288x16xf32>
    %cst_41 = arith.constant dense<0.000000e+00> : vector<1x16xf32>
    %48 = tpu.matmul %43, %47, %cst_41 {dimension_numbers = #tpu.dot_dimension_numbers<[1], [0], [0], [1], [0, 0, 1, 1], [], []>} : vector<1x288xf32>, vector<288x16xf32>, vector<1x16xf32> -> vector<1x16xf32>
    %cst_42 = arith.constant 6.480000e+02 : f32
    %49 = vector.broadcast %cst_42 : f32 to vector<1x16xf32>
    %50 = arith.divf %48, %49 : vector<1x16xf32>
    %c0_43 = arith.constant 0 : index
    %c0_44 = arith.constant 0 : index
    %51 = vector.load %arg3[%c0_43, %c0_44] : memref<288x16xf32, #tpu.memory_space<vmem>>, vector<288x16xf32>
    %cst_45 = arith.constant dense<0.000000e+00> : vector<1x16xf32>
    %52 = tpu.matmul %46, %51, %cst_45 {dimension_numbers = #tpu.dot_dimension_numbers<[1], [0], [0], [1], [0, 0, 1, 1], [], []>} : vector<1x288xf32>, vector<288x16xf32>, vector<1x16xf32> -> vector<1x16xf32>
    %cst_46 = arith.constant 6.480000e+02 : f32
    %53 = vector.broadcast %cst_46 : f32 to vector<1x16xf32>
    %54 = arith.divf %52, %53 : vector<1x16xf32>
    %55 = arith.mulf %50, %50 : vector<1x16xf32>
    %56 = arith.subf %54, %55 : vector<1x16xf32>
    %c0_47 = arith.constant 0 : index
    %c0_48 = arith.constant 0 : index
    %57 = vector.load %arg5[%c0_47, %c0_48] : memref<1x16xf32, #tpu.memory_space<vmem>>, vector<1x16xf32>
    %cst_49 = arith.constant 9.99999974E-6 : f32
    %58 = vector.broadcast %cst_49 : f32 to vector<1x16xf32>
    %59 = arith.addf %56, %58 : vector<1x16xf32>
    %60 = math.rsqrt %59 : vector<1x16xf32>
    %61 = arith.mulf %57, %60 : vector<1x16xf32>
    %c0_50 = arith.constant 0 : index
    %c0_51 = arith.constant 0 : index
    %62 = vector.load %arg6[%c0_50, %c0_51] : memref<1x16xf32, #tpu.memory_space<vmem>>, vector<1x16xf32>
    %63 = arith.mulf %50, %61 : vector<1x16xf32>
    %64 = arith.subf %62, %63 : vector<1x16xf32>
    %c0_52 = arith.constant 0 : index
    %c0_53 = arith.constant 0 : index
    %65 = vector.load %arg4[%c0_52, %c0_53] : memref<16x288xf32, #tpu.memory_space<vmem>>, vector<16x288xf32>
    %cst_54 = arith.constant dense<0.000000e+00> : vector<1x288xf32>
    %66 = tpu.matmul %61, %65, %cst_54 {dimension_numbers = #tpu.dot_dimension_numbers<[1], [0], [0], [1], [0, 0, 1, 1], [], []>} : vector<1x16xf32>, vector<16x288xf32>, vector<1x288xf32> -> vector<1x288xf32>
    %c0_55 = arith.constant 0 : index
    %c0_56 = arith.constant 0 : index
    %67 = vector.load %arg4[%c0_55, %c0_56] : memref<16x288xf32, #tpu.memory_space<vmem>>, vector<16x288xf32>
    %cst_57 = arith.constant dense<0.000000e+00> : vector<1x288xf32>
    %68 = tpu.matmul %64, %67, %cst_57 {dimension_numbers = #tpu.dot_dimension_numbers<[1], [0], [0], [1], [0, 0, 1, 1], [], []>} : vector<1x16xf32>, vector<16x288xf32>, vector<1x288xf32> -> vector<1x288xf32>
    %69 = vector.broadcast %66 : vector<1x288xf32> to vector<36x288xf32>
    %70 = arith.mulf %41, %69 : vector<36x288xf32>
    %71 = vector.broadcast %68 : vector<1x288xf32> to vector<36x288xf32>
    %72 = arith.addf %70, %71 : vector<36x288xf32>
    %cst_58 = arith.constant 0.000000e+00 : f32
    %73 = vector.broadcast %cst_58 : f32 to vector<36x288xf32>
    %74 = arith.maximumf %72, %73 : vector<36x288xf32>
    %75 = arith.truncf %74 : vector<36x288xf32> to vector<36x288xbf16>
    %cst_59 = arith.constant 0.000000e+00 : f32
    %76 = vector.broadcast %cst_59 : f32 to vector<14x224xf32>
    %c0_60 = arith.constant 0 : index
    %c0_61 = arith.constant 0 : index
    %c0_62 = arith.constant 0 : index
    %77 = vector.load %arg7[%c0_60, %c0_61, %c0_62] : memref<5x14x36xbf16, #tpu.memory_space<vmem>>, vector<1x14x36xbf16>
    %78 = vector.shape_cast %77 : vector<1x14x36xbf16> to vector<14x36xbf16>
    %cst_63 = arith.constant dense<0.000000e+00> : vector<14x288xf32>
    %79 = tpu.matmul %78, %75, %cst_63 {dimension_numbers = #tpu.dot_dimension_numbers<[1], [0], [0], [1], [0, 0, 1, 1], [], []>} : vector<14x36xbf16>, vector<36x288xbf16>, vector<14x288xf32> -> vector<14x288xf32>
    %80 = arith.truncf %79 : vector<14x288xf32> to vector<14x288xbf16>
    %c0_64 = arith.constant 0 : index
    %c0_65 = arith.constant 0 : index
    %c0_66 = arith.constant 0 : index
    %81 = vector.load %arg8[%c0_64, %c0_65, %c0_66] : memref<5x288x224xbf16, #tpu.memory_space<vmem>>, vector<1x288x224xbf16>
    %82 = vector.shape_cast %81 : vector<1x288x224xbf16> to vector<288x224xbf16>
    %cst_67 = arith.constant dense<0.000000e+00> : vector<14x224xf32>
    %83 = tpu.matmul %80, %82, %cst_67 {dimension_numbers = #tpu.dot_dimension_numbers<[1], [0], [0], [1], [0, 0, 1, 1], [], []>} : vector<14x288xbf16>, vector<288x224xbf16>, vector<14x224xf32> -> vector<14x224xf32>
    %84 = arith.addf %76, %83 : vector<14x224xf32>
    %c1_68 = arith.constant 1 : index
    %c0_69 = arith.constant 0 : index
    %c0_70 = arith.constant 0 : index
    %85 = vector.load %arg7[%c1_68, %c0_69, %c0_70] : memref<5x14x36xbf16, #tpu.memory_space<vmem>>, vector<1x14x36xbf16>
    %86 = vector.shape_cast %85 : vector<1x14x36xbf16> to vector<14x36xbf16>
    %cst_71 = arith.constant dense<0.000000e+00> : vector<14x288xf32>
    %87 = tpu.matmul %86, %75, %cst_71 {dimension_numbers = #tpu.dot_dimension_numbers<[1], [0], [0], [1], [0, 0, 1, 1], [], []>} : vector<14x36xbf16>, vector<36x288xbf16>, vector<14x288xf32> -> vector<14x288xf32>
    %88 = arith.truncf %87 : vector<14x288xf32> to vector<14x288xbf16>
    %c1_72 = arith.constant 1 : index
    %c0_73 = arith.constant 0 : index
    %c0_74 = arith.constant 0 : index
    %89 = vector.load %arg8[%c1_72, %c0_73, %c0_74] : memref<5x288x224xbf16, #tpu.memory_space<vmem>>, vector<1x288x224xbf16>
    %90 = vector.shape_cast %89 : vector<1x288x224xbf16> to vector<288x224xbf16>
    %cst_75 = arith.constant dense<0.000000e+00> : vector<14x224xf32>
    %91 = tpu.matmul %88, %90, %cst_75 {dimension_numbers = #tpu.dot_dimension_numbers<[1], [0], [0], [1], [0, 0, 1, 1], [], []>} : vector<14x288xbf16>, vector<288x224xbf16>, vector<14x224xf32> -> vector<14x224xf32>
    %92 = arith.addf %84, %91 : vector<14x224xf32>
    %c2_76 = arith.constant 2 : index
    %c0_77 = arith.constant 0 : index
    %c0_78 = arith.constant 0 : index
    %93 = vector.load %arg7[%c2_76, %c0_77, %c0_78] : memref<5x14x36xbf16, #tpu.memory_space<vmem>>, vector<1x14x36xbf16>
    %94 = vector.shape_cast %93 : vector<1x14x36xbf16> to vector<14x36xbf16>
    %cst_79 = arith.constant dense<0.000000e+00> : vector<14x288xf32>
    %95 = tpu.matmul %94, %75, %cst_79 {dimension_numbers = #tpu.dot_dimension_numbers<[1], [0], [0], [1], [0, 0, 1, 1], [], []>} : vector<14x36xbf16>, vector<36x288xbf16>, vector<14x288xf32> -> vector<14x288xf32>
    %96 = arith.truncf %95 : vector<14x288xf32> to vector<14x288xbf16>
    %c2_80 = arith.constant 2 : index
    %c0_81 = arith.constant 0 : index
    %c0_82 = arith.constant 0 : index
    %97 = vector.load %arg8[%c2_80, %c0_81, %c0_82] : memref<5x288x224xbf16, #tpu.memory_space<vmem>>, vector<1x288x224xbf16>
    %98 = vector.shape_cast %97 : vector<1x288x224xbf16> to vector<288x224xbf16>
    %cst_83 = arith.constant dense<0.000000e+00> : vector<14x224xf32>
    %99 = tpu.matmul %96, %98, %cst_83 {dimension_numbers = #tpu.dot_dimension_numbers<[1], [0], [0], [1], [0, 0, 1, 1], [], []>} : vector<14x288xbf16>, vector<288x224xbf16>, vector<14x224xf32> -> vector<14x224xf32>
    %100 = arith.addf %92, %99 : vector<14x224xf32>
    %c3_84 = arith.constant 3 : index
    %c0_85 = arith.constant 0 : index
    %c0_86 = arith.constant 0 : index
    %101 = vector.load %arg7[%c3_84, %c0_85, %c0_86] : memref<5x14x36xbf16, #tpu.memory_space<vmem>>, vector<1x14x36xbf16>
    %102 = vector.shape_cast %101 : vector<1x14x36xbf16> to vector<14x36xbf16>
    %cst_87 = arith.constant dense<0.000000e+00> : vector<14x288xf32>
    %103 = tpu.matmul %102, %75, %cst_87 {dimension_numbers = #tpu.dot_dimension_numbers<[1], [0], [0], [1], [0, 0, 1, 1], [], []>} : vector<14x36xbf16>, vector<36x288xbf16>, vector<14x288xf32> -> vector<14x288xf32>
    %104 = arith.truncf %103 : vector<14x288xf32> to vector<14x288xbf16>
    %c3_88 = arith.constant 3 : index
    %c0_89 = arith.constant 0 : index
    %c0_90 = arith.constant 0 : index
    %105 = vector.load %arg8[%c3_88, %c0_89, %c0_90] : memref<5x288x224xbf16, #tpu.memory_space<vmem>>, vector<1x288x224xbf16>
    %106 = vector.shape_cast %105 : vector<1x288x224xbf16> to vector<288x224xbf16>
    %cst_91 = arith.constant dense<0.000000e+00> : vector<14x224xf32>
    %107 = tpu.matmul %104, %106, %cst_91 {dimension_numbers = #tpu.dot_dimension_numbers<[1], [0], [0], [1], [0, 0, 1, 1], [], []>} : vector<14x288xbf16>, vector<288x224xbf16>, vector<14x224xf32> -> vector<14x224xf32>
    %108 = arith.addf %100, %107 : vector<14x224xf32>
    %c4_92 = arith.constant 4 : index
    %c0_93 = arith.constant 0 : index
    %c0_94 = arith.constant 0 : index
    %109 = vector.load %arg7[%c4_92, %c0_93, %c0_94] : memref<5x14x36xbf16, #tpu.memory_space<vmem>>, vector<1x14x36xbf16>
    %110 = vector.shape_cast %109 : vector<1x14x36xbf16> to vector<14x36xbf16>
    %cst_95 = arith.constant dense<0.000000e+00> : vector<14x288xf32>
    %111 = tpu.matmul %110, %75, %cst_95 {dimension_numbers = #tpu.dot_dimension_numbers<[1], [0], [0], [1], [0, 0, 1, 1], [], []>} : vector<14x36xbf16>, vector<36x288xbf16>, vector<14x288xf32> -> vector<14x288xf32>
    %112 = arith.truncf %111 : vector<14x288xf32> to vector<14x288xbf16>
    %c4_96 = arith.constant 4 : index
    %c0_97 = arith.constant 0 : index
    %c0_98 = arith.constant 0 : index
    %113 = vector.load %arg8[%c4_96, %c0_97, %c0_98] : memref<5x288x224xbf16, #tpu.memory_space<vmem>>, vector<1x288x224xbf16>
    %114 = vector.shape_cast %113 : vector<1x288x224xbf16> to vector<288x224xbf16>
    %cst_99 = arith.constant dense<0.000000e+00> : vector<14x224xf32>
    %115 = tpu.matmul %112, %114, %cst_99 {dimension_numbers = #tpu.dot_dimension_numbers<[1], [0], [0], [1], [0, 0, 1, 1], [], []>} : vector<14x288xbf16>, vector<288x224xbf16>, vector<14x224xf32> -> vector<14x224xf32>
    %116 = arith.addf %108, %115 : vector<14x224xf32>
    %cst_100 = arith.constant dense<0.000000e+00> : vector<224xf32>
    %117 = vector.multi_reduction <add>, %116, %cst_100 [0] : vector<14x224xf32> to vector<224xf32>
    %118 = vector.shape_cast %117 : vector<224xf32> to vector<1x224xf32>
    %119 = arith.mulf %116, %116 : vector<14x224xf32>
    %cst_101 = arith.constant dense<0.000000e+00> : vector<224xf32>
    %120 = vector.multi_reduction <add>, %119, %cst_101 [0] : vector<14x224xf32> to vector<224xf32>
    %121 = vector.shape_cast %120 : vector<224xf32> to vector<1x224xf32>
    %c0_102 = arith.constant 0 : index
    %c0_103 = arith.constant 0 : index
    %122 = vector.load %arg9[%c0_102, %c0_103] : memref<224x32xf32, #tpu.memory_space<vmem>>, vector<224x32xf32>
    %cst_104 = arith.constant dense<0.000000e+00> : vector<1x32xf32>
    %123 = tpu.matmul %118, %122, %cst_104 {dimension_numbers = #tpu.dot_dimension_numbers<[1], [0], [0], [1], [0, 0, 1, 1], [], []>} : vector<1x224xf32>, vector<224x32xf32>, vector<1x32xf32> -> vector<1x32xf32>
    %cst_105 = arith.constant 9.800000e+01 : f32
    %124 = vector.broadcast %cst_105 : f32 to vector<1x32xf32>
    %125 = arith.divf %123, %124 : vector<1x32xf32>
    %c0_106 = arith.constant 0 : index
    %c0_107 = arith.constant 0 : index
    %126 = vector.load %arg9[%c0_106, %c0_107] : memref<224x32xf32, #tpu.memory_space<vmem>>, vector<224x32xf32>
    %cst_108 = arith.constant dense<0.000000e+00> : vector<1x32xf32>
    %127 = tpu.matmul %121, %126, %cst_108 {dimension_numbers = #tpu.dot_dimension_numbers<[1], [0], [0], [1], [0, 0, 1, 1], [], []>} : vector<1x224xf32>, vector<224x32xf32>, vector<1x32xf32> -> vector<1x32xf32>
    %cst_109 = arith.constant 9.800000e+01 : f32
    %128 = vector.broadcast %cst_109 : f32 to vector<1x32xf32>
    %129 = arith.divf %127, %128 : vector<1x32xf32>
    %130 = arith.mulf %125, %125 : vector<1x32xf32>
    %131 = arith.subf %129, %130 : vector<1x32xf32>
    %c0_110 = arith.constant 0 : index
    %c0_111 = arith.constant 0 : index
    %132 = vector.load %arg11[%c0_110, %c0_111] : memref<1x32xf32, #tpu.memory_space<vmem>>, vector<1x32xf32>
    %cst_112 = arith.constant 9.99999974E-6 : f32
    %133 = vector.broadcast %cst_112 : f32 to vector<1x32xf32>
    %134 = arith.addf %131, %133 : vector<1x32xf32>
    %135 = math.rsqrt %134 : vector<1x32xf32>
    %136 = arith.mulf %132, %135 : vector<1x32xf32>
    %c0_113 = arith.constant 0 : index
    %c0_114 = arith.constant 0 : index
    %137 = vector.load %arg12[%c0_113, %c0_114] : memref<1x32xf32, #tpu.memory_space<vmem>>, vector<1x32xf32>
    %138 = arith.mulf %125, %136 : vector<1x32xf32>
    %139 = arith.subf %137, %138 : vector<1x32xf32>
    %c0_115 = arith.constant 0 : index
    %c0_116 = arith.constant 0 : index
    %140 = vector.load %arg10[%c0_115, %c0_116] : memref<32x224xf32, #tpu.memory_space<vmem>>, vector<32x224xf32>
    %cst_117 = arith.constant dense<0.000000e+00> : vector<1x224xf32>
    %141 = tpu.matmul %136, %140, %cst_117 {dimension_numbers = #tpu.dot_dimension_numbers<[1], [0], [0], [1], [0, 0, 1, 1], [], []>} : vector<1x32xf32>, vector<32x224xf32>, vector<1x224xf32> -> vector<1x224xf32>
    %c0_118 = arith.constant 0 : index
    %c0_119 = arith.constant 0 : index
    %142 = vector.load %arg10[%c0_118, %c0_119] : memref<32x224xf32, #tpu.memory_space<vmem>>, vector<32x224xf32>
    %cst_120 = arith.constant dense<0.000000e+00> : vector<1x224xf32>
    %143 = tpu.matmul %139, %142, %cst_120 {dimension_numbers = #tpu.dot_dimension_numbers<[1], [0], [0], [1], [0, 0, 1, 1], [], []>} : vector<1x32xf32>, vector<32x224xf32>, vector<1x224xf32> -> vector<1x224xf32>
    %144 = vector.broadcast %141 : vector<1x224xf32> to vector<14x224xf32>
    %145 = arith.mulf %116, %144 : vector<14x224xf32>
    %146 = vector.broadcast %143 : vector<1x224xf32> to vector<14x224xf32>
    %147 = arith.addf %145, %146 : vector<14x224xf32>
    %cst_121 = arith.constant 0.000000e+00 : f32
    %148 = vector.broadcast %cst_121 : f32 to vector<14x224xf32>
    %149 = arith.maximumf %147, %148 : vector<14x224xf32>
    %150 = arith.truncf %149 : vector<14x224xf32> to vector<14x224xbf16>
    %cst_122 = arith.constant 0.000000e+00 : f32
    %151 = vector.broadcast %cst_122 : f32 to vector<4x64xf32>
    %c0_123 = arith.constant 0 : index
    %c0_124 = arith.constant 0 : index
    %c0_125 = arith.constant 0 : index
    %152 = vector.load %arg13[%c0_123, %c0_124, %c0_125] : memref<5x4x14xbf16, #tpu.memory_space<vmem>>, vector<1x4x14xbf16>
    %153 = vector.shape_cast %152 : vector<1x4x14xbf16> to vector<4x14xbf16>
    %cst_126 = arith.constant dense<0.000000e+00> : vector<4x224xf32>
    %154 = tpu.matmul %153, %150, %cst_126 {dimension_numbers = #tpu.dot_dimension_numbers<[1], [0], [0], [1], [0, 0, 1, 1], [], []>} : vector<4x14xbf16>, vector<14x224xbf16>, vector<4x224xf32> -> vector<4x224xf32>
    %155 = arith.truncf %154 : vector<4x224xf32> to vector<4x224xbf16>
    %c0_127 = arith.constant 0 : index
    %c0_128 = arith.constant 0 : index
    %c0_129 = arith.constant 0 : index
    %156 = vector.load %arg14[%c0_127, %c0_128, %c0_129] : memref<5x224x64xbf16, #tpu.memory_space<vmem>>, vector<1x224x64xbf16>
    %157 = vector.shape_cast %156 : vector<1x224x64xbf16> to vector<224x64xbf16>
    %cst_130 = arith.constant dense<0.000000e+00> : vector<4x64xf32>
    %158 = tpu.matmul %155, %157, %cst_130 {dimension_numbers = #tpu.dot_dimension_numbers<[1], [0], [0], [1], [0, 0, 1, 1], [], []>} : vector<4x224xbf16>, vector<224x64xbf16>, vector<4x64xf32> -> vector<4x64xf32>
    %159 = arith.addf %151, %158 : vector<4x64xf32>
    %c1_131 = arith.constant 1 : index
    %c0_132 = arith.constant 0 : index
    %c0_133 = arith.constant 0 : index
    %160 = vector.load %arg13[%c1_131, %c0_132, %c0_133] : memref<5x4x14xbf16, #tpu.memory_space<vmem>>, vector<1x4x14xbf16>
    %161 = vector.shape_cast %160 : vector<1x4x14xbf16> to vector<4x14xbf16>
    %cst_134 = arith.constant dense<0.000000e+00> : vector<4x224xf32>
    %162 = tpu.matmul %161, %150, %cst_134 {dimension_numbers = #tpu.dot_dimension_numbers<[1], [0], [0], [1], [0, 0, 1, 1], [], []>} : vector<4x14xbf16>, vector<14x224xbf16>, vector<4x224xf32> -> vector<4x224xf32>
    %163 = arith.truncf %162 : vector<4x224xf32> to vector<4x224xbf16>
    %c1_135 = arith.constant 1 : index
    %c0_136 = arith.constant 0 : index
    %c0_137 = arith.constant 0 : index
    %164 = vector.load %arg14[%c1_135, %c0_136, %c0_137] : memref<5x224x64xbf16, #tpu.memory_space<vmem>>, vector<1x224x64xbf16>
    %165 = vector.shape_cast %164 : vector<1x224x64xbf16> to vector<224x64xbf16>
    %cst_138 = arith.constant dense<0.000000e+00> : vector<4x64xf32>
    %166 = tpu.matmul %163, %165, %cst_138 {dimension_numbers = #tpu.dot_dimension_numbers<[1], [0], [0], [1], [0, 0, 1, 1], [], []>} : vector<4x224xbf16>, vector<224x64xbf16>, vector<4x64xf32> -> vector<4x64xf32>
    %167 = arith.addf %159, %166 : vector<4x64xf32>
    %c2_139 = arith.constant 2 : index
    %c0_140 = arith.constant 0 : index
    %c0_141 = arith.constant 0 : index
    %168 = vector.load %arg13[%c2_139, %c0_140, %c0_141] : memref<5x4x14xbf16, #tpu.memory_space<vmem>>, vector<1x4x14xbf16>
    %169 = vector.shape_cast %168 : vector<1x4x14xbf16> to vector<4x14xbf16>
    %cst_142 = arith.constant dense<0.000000e+00> : vector<4x224xf32>
    %170 = tpu.matmul %169, %150, %cst_142 {dimension_numbers = #tpu.dot_dimension_numbers<[1], [0], [0], [1], [0, 0, 1, 1], [], []>} : vector<4x14xbf16>, vector<14x224xbf16>, vector<4x224xf32> -> vector<4x224xf32>
    %171 = arith.truncf %170 : vector<4x224xf32> to vector<4x224xbf16>
    %c2_143 = arith.constant 2 : index
    %c0_144 = arith.constant 0 : index
    %c0_145 = arith.constant 0 : index
    %172 = vector.load %arg14[%c2_143, %c0_144, %c0_145] : memref<5x224x64xbf16, #tpu.memory_space<vmem>>, vector<1x224x64xbf16>
    %173 = vector.shape_cast %172 : vector<1x224x64xbf16> to vector<224x64xbf16>
    %cst_146 = arith.constant dense<0.000000e+00> : vector<4x64xf32>
    %174 = tpu.matmul %171, %173, %cst_146 {dimension_numbers = #tpu.dot_dimension_numbers<[1], [0], [0], [1], [0, 0, 1, 1], [], []>} : vector<4x224xbf16>, vector<224x64xbf16>, vector<4x64xf32> -> vector<4x64xf32>
    %175 = arith.addf %167, %174 : vector<4x64xf32>
    %c3_147 = arith.constant 3 : index
    %c0_148 = arith.constant 0 : index
    %c0_149 = arith.constant 0 : index
    %176 = vector.load %arg13[%c3_147, %c0_148, %c0_149] : memref<5x4x14xbf16, #tpu.memory_space<vmem>>, vector<1x4x14xbf16>
    %177 = vector.shape_cast %176 : vector<1x4x14xbf16> to vector<4x14xbf16>
    %cst_150 = arith.constant dense<0.000000e+00> : vector<4x224xf32>
    %178 = tpu.matmul %177, %150, %cst_150 {dimension_numbers = #tpu.dot_dimension_numbers<[1], [0], [0], [1], [0, 0, 1, 1], [], []>} : vector<4x14xbf16>, vector<14x224xbf16>, vector<4x224xf32> -> vector<4x224xf32>
    %179 = arith.truncf %178 : vector<4x224xf32> to vector<4x224xbf16>
    %c3_151 = arith.constant 3 : index
    %c0_152 = arith.constant 0 : index
    %c0_153 = arith.constant 0 : index
    %180 = vector.load %arg14[%c3_151, %c0_152, %c0_153] : memref<5x224x64xbf16, #tpu.memory_space<vmem>>, vector<1x224x64xbf16>
    %181 = vector.shape_cast %180 : vector<1x224x64xbf16> to vector<224x64xbf16>
    %cst_154 = arith.constant dense<0.000000e+00> : vector<4x64xf32>
    %182 = tpu.matmul %179, %181, %cst_154 {dimension_numbers = #tpu.dot_dimension_numbers<[1], [0], [0], [1], [0, 0, 1, 1], [], []>} : vector<4x224xbf16>, vector<224x64xbf16>, vector<4x64xf32> -> vector<4x64xf32>
    %183 = arith.addf %175, %182 : vector<4x64xf32>
    %c4_155 = arith.constant 4 : index
    %c0_156 = arith.constant 0 : index
    %c0_157 = arith.constant 0 : index
    %184 = vector.load %arg13[%c4_155, %c0_156, %c0_157] : memref<5x4x14xbf16, #tpu.memory_space<vmem>>, vector<1x4x14xbf16>
    %185 = vector.shape_cast %184 : vector<1x4x14xbf16> to vector<4x14xbf16>
    %cst_158 = arith.constant dense<0.000000e+00> : vector<4x224xf32>
    %186 = tpu.matmul %185, %150, %cst_158 {dimension_numbers = #tpu.dot_dimension_numbers<[1], [0], [0], [1], [0, 0, 1, 1], [], []>} : vector<4x14xbf16>, vector<14x224xbf16>, vector<4x224xf32> -> vector<4x224xf32>
    %187 = arith.truncf %186 : vector<4x224xf32> to vector<4x224xbf16>
    %c4_159 = arith.constant 4 : index
    %c0_160 = arith.constant 0 : index
    %c0_161 = arith.constant 0 : index
    %188 = vector.load %arg14[%c4_159, %c0_160, %c0_161] : memref<5x224x64xbf16, #tpu.memory_space<vmem>>, vector<1x224x64xbf16>
    %189 = vector.shape_cast %188 : vector<1x224x64xbf16> to vector<224x64xbf16>
    %cst_162 = arith.constant dense<0.000000e+00> : vector<4x64xf32>
    %190 = tpu.matmul %187, %189, %cst_162 {dimension_numbers = #tpu.dot_dimension_numbers<[1], [0], [0], [1], [0, 0, 1, 1], [], []>} : vector<4x224xbf16>, vector<224x64xbf16>, vector<4x64xf32> -> vector<4x64xf32>
    %191 = arith.addf %183, %190 : vector<4x64xf32>
    %cst_163 = arith.constant dense<0.000000e+00> : vector<64xf32>
    %192 = vector.multi_reduction <add>, %191, %cst_163 [0] : vector<4x64xf32> to vector<64xf32>
    %193 = vector.shape_cast %192 : vector<64xf32> to vector<1x64xf32>
    %194 = arith.mulf %191, %191 : vector<4x64xf32>
    %cst_164 = arith.constant dense<0.000000e+00> : vector<64xf32>
    %195 = vector.multi_reduction <add>, %194, %cst_164 [0] : vector<4x64xf32> to vector<64xf32>
    %196 = vector.shape_cast %195 : vector<64xf32> to vector<1x64xf32>
    %c0_165 = arith.constant 0 : index
    %c0_166 = arith.constant 0 : index
    %197 = vector.load %arg15[%c0_165, %c0_166] : memref<64x32xf32, #tpu.memory_space<vmem>>, vector<64x32xf32>
    %cst_167 = arith.constant dense<0.000000e+00> : vector<1x32xf32>
    %198 = tpu.matmul %193, %197, %cst_167 {dimension_numbers = #tpu.dot_dimension_numbers<[1], [0], [0], [1], [0, 0, 1, 1], [], []>} : vector<1x64xf32>, vector<64x32xf32>, vector<1x32xf32> -> vector<1x32xf32>
    %cst_168 = arith.constant 8.000000e+00 : f32
    %199 = vector.broadcast %cst_168 : f32 to vector<1x32xf32>
    %200 = arith.divf %198, %199 : vector<1x32xf32>
    %c0_169 = arith.constant 0 : index
    %c0_170 = arith.constant 0 : index
    %201 = vector.load %arg15[%c0_169, %c0_170] : memref<64x32xf32, #tpu.memory_space<vmem>>, vector<64x32xf32>
    %cst_171 = arith.constant dense<0.000000e+00> : vector<1x32xf32>
    %202 = tpu.matmul %196, %201, %cst_171 {dimension_numbers = #tpu.dot_dimension_numbers<[1], [0], [0], [1], [0, 0, 1, 1], [], []>} : vector<1x64xf32>, vector<64x32xf32>, vector<1x32xf32> -> vector<1x32xf32>
    %cst_172 = arith.constant 8.000000e+00 : f32
    %203 = vector.broadcast %cst_172 : f32 to vector<1x32xf32>
    %204 = arith.divf %202, %203 : vector<1x32xf32>
    %205 = arith.mulf %200, %200 : vector<1x32xf32>
    %206 = arith.subf %204, %205 : vector<1x32xf32>
    %c0_173 = arith.constant 0 : index
    %c0_174 = arith.constant 0 : index
    %207 = vector.load %arg17[%c0_173, %c0_174] : memref<1x32xf32, #tpu.memory_space<vmem>>, vector<1x32xf32>
    %cst_175 = arith.constant 9.99999974E-6 : f32
    %208 = vector.broadcast %cst_175 : f32 to vector<1x32xf32>
    %209 = arith.addf %206, %208 : vector<1x32xf32>
    %210 = math.rsqrt %209 : vector<1x32xf32>
    %211 = arith.mulf %207, %210 : vector<1x32xf32>
    %c0_176 = arith.constant 0 : index
    %c0_177 = arith.constant 0 : index
    %212 = vector.load %arg18[%c0_176, %c0_177] : memref<1x32xf32, #tpu.memory_space<vmem>>, vector<1x32xf32>
    %213 = arith.mulf %200, %211 : vector<1x32xf32>
    %214 = arith.subf %212, %213 : vector<1x32xf32>
    %c0_178 = arith.constant 0 : index
    %c0_179 = arith.constant 0 : index
    %215 = vector.load %arg16[%c0_178, %c0_179] : memref<32x64xf32, #tpu.memory_space<vmem>>, vector<32x64xf32>
    %cst_180 = arith.constant dense<0.000000e+00> : vector<1x64xf32>
    %216 = tpu.matmul %211, %215, %cst_180 {dimension_numbers = #tpu.dot_dimension_numbers<[1], [0], [0], [1], [0, 0, 1, 1], [], []>} : vector<1x32xf32>, vector<32x64xf32>, vector<1x64xf32> -> vector<1x64xf32>
    %c0_181 = arith.constant 0 : index
    %c0_182 = arith.constant 0 : index
    %217 = vector.load %arg16[%c0_181, %c0_182] : memref<32x64xf32, #tpu.memory_space<vmem>>, vector<32x64xf32>
    %cst_183 = arith.constant dense<0.000000e+00> : vector<1x64xf32>
    %218 = tpu.matmul %214, %217, %cst_183 {dimension_numbers = #tpu.dot_dimension_numbers<[1], [0], [0], [1], [0, 0, 1, 1], [], []>} : vector<1x32xf32>, vector<32x64xf32>, vector<1x64xf32> -> vector<1x64xf32>
    %219 = vector.broadcast %216 : vector<1x64xf32> to vector<4x64xf32>
    %220 = arith.mulf %191, %219 : vector<4x64xf32>
    %221 = vector.broadcast %218 : vector<1x64xf32> to vector<4x64xf32>
    %222 = arith.addf %220, %221 : vector<4x64xf32>
    %cst_184 = arith.constant 0.000000e+00 : f32
    %223 = vector.broadcast %cst_184 : f32 to vector<4x64xf32>
    %224 = arith.maximumf %222, %223 : vector<4x64xf32>
    %225 = arith.truncf %224 : vector<4x64xf32> to vector<4x64xbf16>
    %cst_185 = arith.constant 0.000000e+00 : f32
    %226 = vector.broadcast %cst_185 : f32 to vector<2x2xf32>
    %c0_186 = arith.constant 0 : index
    %c0_187 = arith.constant 0 : index
    %227 = vector.load %arg21[%c0_186, %c0_187] : memref<1x2xf32, #tpu.memory_space<vmem>>, vector<1x2xf32>
    %228 = vector.broadcast %227 : vector<1x2xf32> to vector<2x2xf32>
    %229 = arith.addf %226, %228 : vector<2x2xf32>
    %c0_188 = arith.constant 0 : index
    %c0_189 = arith.constant 0 : index
    %c0_190 = arith.constant 0 : index
    %230 = vector.load %arg19[%c0_188, %c0_189, %c0_190] : memref<2x2x4xbf16, #tpu.memory_space<vmem>>, vector<1x2x4xbf16>
    %231 = vector.shape_cast %230 : vector<1x2x4xbf16> to vector<2x4xbf16>
    %cst_191 = arith.constant dense<0.000000e+00> : vector<2x64xf32>
    %232 = tpu.matmul %231, %225, %cst_191 {dimension_numbers = #tpu.dot_dimension_numbers<[1], [0], [0], [1], [0, 0, 1, 1], [], []>} : vector<2x4xbf16>, vector<4x64xbf16>, vector<2x64xf32> -> vector<2x64xf32>
    %233 = arith.truncf %232 : vector<2x64xf32> to vector<2x64xbf16>
    %c0_192 = arith.constant 0 : index
    %c0_193 = arith.constant 0 : index
    %c0_194 = arith.constant 0 : index
    %234 = vector.load %arg20[%c0_192, %c0_193, %c0_194] : memref<2x64x2xbf16, #tpu.memory_space<vmem>>, vector<1x64x2xbf16>
    %235 = vector.shape_cast %234 : vector<1x64x2xbf16> to vector<64x2xbf16>
    %cst_195 = arith.constant dense<0.000000e+00> : vector<2x2xf32>
    %236 = tpu.matmul %233, %235, %cst_195 {dimension_numbers = #tpu.dot_dimension_numbers<[1], [0], [0], [1], [0, 0, 1, 1], [], []>} : vector<2x64xbf16>, vector<64x2xbf16>, vector<2x2xf32> -> vector<2x2xf32>
    %237 = arith.addf %229, %236 : vector<2x2xf32>
    %c1_196 = arith.constant 1 : index
    %c0_197 = arith.constant 0 : index
    %c0_198 = arith.constant 0 : index
    %238 = vector.load %arg19[%c1_196, %c0_197, %c0_198] : memref<2x2x4xbf16, #tpu.memory_space<vmem>>, vector<1x2x4xbf16>
    %239 = vector.shape_cast %238 : vector<1x2x4xbf16> to vector<2x4xbf16>
    %cst_199 = arith.constant dense<0.000000e+00> : vector<2x64xf32>
    %240 = tpu.matmul %239, %225, %cst_199 {dimension_numbers = #tpu.dot_dimension_numbers<[1], [0], [0], [1], [0, 0, 1, 1], [], []>} : vector<2x4xbf16>, vector<4x64xbf16>, vector<2x64xf32> -> vector<2x64xf32>
    %241 = arith.truncf %240 : vector<2x64xf32> to vector<2x64xbf16>
    %c1_200 = arith.constant 1 : index
    %c0_201 = arith.constant 0 : index
    %c0_202 = arith.constant 0 : index
    %242 = vector.load %arg20[%c1_200, %c0_201, %c0_202] : memref<2x64x2xbf16, #tpu.memory_space<vmem>>, vector<1x64x2xbf16>
    %243 = vector.shape_cast %242 : vector<1x64x2xbf16> to vector<64x2xbf16>
    %cst_203 = arith.constant dense<0.000000e+00> : vector<2x2xf32>
    %244 = tpu.matmul %241, %243, %cst_203 {dimension_numbers = #tpu.dot_dimension_numbers<[1], [0], [0], [1], [0, 0, 1, 1], [], []>} : vector<2x64xbf16>, vector<64x2xbf16>, vector<2x2xf32> -> vector<2x2xf32>
    %245 = arith.addf %237, %244 : vector<2x2xf32>
    %cst_204 = arith.constant dense<0xFF800000> : vector<2xf32>
    %246 = vector.multi_reduction <maximumf>, %245, %cst_204 [0] : vector<2x2xf32> to vector<2xf32>
    %247 = vector.shape_cast %246 : vector<2xf32> to vector<1x2xf32>
    %248 = vector.broadcast %247 : vector<1x2xf32> to vector<2x2xf32>
    %249 = arith.subf %245, %248 : vector<2x2xf32>
    %250 = math.exp %249 : vector<2x2xf32>
    %cst_205 = arith.constant dense<0.000000e+00> : vector<2xf32>
    %251 = vector.multi_reduction <add>, %250, %cst_205 [0] : vector<2x2xf32> to vector<2xf32>
    %252 = vector.shape_cast %251 : vector<2xf32> to vector<1x2xf32>
    %253 = tpu.reciprocal %252 {approx = true} : vector<1x2xf32> -> vector<1x2xf32>
    %254 = vector.broadcast %253 : vector<1x2xf32> to vector<2x2xf32>
    %255 = arith.mulf %250, %254 : vector<2x2xf32>
    %c0_206 = arith.constant 0 : index
    %c0_207 = arith.constant 0 : index
    %256 = vector.load %arg22[%c0_206, %c0_207] : memref<2x2xf32, #tpu.memory_space<vmem>>, vector<2x2xf32>
    tpu.vector_store %arg22[%c0_206, %c0_207], %255 {strides = array<i32>} : memref<2x2xf32, #tpu.memory_space<vmem>>, vector<2x2xf32>,
    return
  }
}

</mosaic_0001>

<bundles_post_ra>
// kernel: pgconvnet_forward.1
= control target key start
LH: loop header
LB: loop body
LE: loop exit
PB: predicated region body
PF: predicated region fallthrough
CT: control target
= control target key end

     0   :  { %s12031_s0 = inlined_call_operand.vmem [shape: bf16[80,120], index: 0, kind: input, shape index: {}]   ;;  %s12032_s1 = inlined_call_operand.vmem [shape: bf16[5,36,80], index: 1, kind: input, shape index: {}]   ;;  %s12033_s2 = inlined_call_operand.vmem [shape: bf16[5,120,288], index: 2, kind: input, shape index: {}]   ;;  %s12034_s3 = inlined_call_operand.vmem [shape: f32[288,16], index: 3, kind: input, shape index: {}]   ;;  %s12035_s4 = inlined_call_operand.vmem [shape: f32[16,288], index: 4, kind: input, shape index: {}]   ;;  %s12036_s5 = inlined_call_operand.vmem [shape: f32[1,16], index: 5, kind: input, shape index: {}]   ;;  %s12037_s6 = inlined_call_operand.vmem [shape: f32[1,16], index: 6, kind: input, shape index: {}]   ;;  %s12038_s7 = inlined_call_operand.vmem [shape: bf16[5,14,36], index: 7, kind: input, shape index: {}]   ;;  %s12039_s8 = inlined_call_operand.vmem [shape: bf16[5,288,224], index: 8, kind: input, shape index: {}]   ;;  %s12040_s9 = inlined_call_operand.vmem [shape: f32[224,32], index: 9, kind: input, shape index: {}]   ;;  %s12041_s10 = inlined_call_operand.vmem [shape: f32[32,224], index: 10, kind: input, shape index: {}]   ;;  %s12042_s11 = inlined_call_operand.vmem [shape: f32[1,32], index: 11, kind: input, shape index: {}]   ;;  %s12043_s12 = inlined_call_operand.vmem [shape: f32[1,32], index: 12, kind: input, shape index: {}]   ;;  %s12044_s13 = inlined_call_operand.vmem [shape: bf16[5,4,14], index: 13, kind: input, shape index: {}]   ;;  %s12045_s14 = inlined_call_operand.vmem [shape: bf16[5,224,64], index: 14, kind: input, shape index: {}]   ;;  %s12046_s15 = inlined_call_operand.vmem [shape: f32[64,32], index: 15, kind: input, shape index: {}]   ;;  %s12047_s16 = inlined_call_operand.vmem [shape: f32[32,64], index: 16, kind: input, shape index: {}]   ;;  %s12048_s17 = inlined_call_operand.vmem [shape: f32[1,32], index: 17, kind: input, shape index: {}]   ;;  %s12049_s18 = inlined_call_operand.vmem [shape: f32[1,32], index: 18, kind: input, shape index: {}]   ;;  %s12050_s19 = inlined_call_operand.vmem [shape: bf16[2,2,4], index: 19, kind: input, shape index: {}]   ;;  %s12051_s20 = inlined_call_operand.vmem [shape: bf16[2,64,2], index: 20, kind: input, shape index: {}]   ;;  %s12052_s21 = inlined_call_operand.vmem [shape: f32[1,2], index: 21, kind: input, shape index: {}]   ;;  %s12053_s22 = inlined_call_operand.hbm [shape: f32[2,2], index: 22, kind: output, shape index: {}]  }
   0x1   :  { %12059 = sst [smem:[#allocation5_spill]] %s12031_s0 }
   0x2   :  { %12060 = sst [smem:[#allocation6_spill]] %s12032_s1 }
   0x3   :  { %12061 = sst [smem:[#allocation7_spill]] %s12033_s2 }
   0x4   :  { %12062 = sst [smem:[#allocation8_spill]] %s12034_s3 }
   0x5   :  { %12063 = sst [smem:[#allocation9_spill]] %s12035_s4 }
   0x6   :  { %12064 = sst [smem:[#allocation10_spill]] %s12036_s5 }
   0x7   :  { %12065 = sst [smem:[#allocation11_spill]] %s12037_s6 }
   0x8   :  { %s12066_s29 = sld [smem:[#allocation5_spill]]  ;;  %v9491_v1 = vmov 0.0   ;;  %vm9492_vm0 = vmmov 0   ;;  %s12067_s2 = sld [smem:[#allocation7_spill]]  ;;  %vm131_vm1 = vcmask 654336   ;;  %vm478_vm2 = vcmask 1043456  }
   0x9   :  { %8130 = vmatprep.subr.bf16.mxu1 %v9491_v1  ;;  %8108 = vmatprep.subr.bf16.mxu0 %v9491_v1  ;;  %s12068_s28 = sld [smem:[#allocation6_spill]]  ;;  %v9493_v40 = vmov 0  }
   0xa   :  { %8140 = vmatprep.mubr.msk.bf16.mxu1 %vm9492_vm0, %v9491_v1  ;;  %8118 = vmatprep.mubr.msk.bf16.mxu0 %vm9492_vm0, %v9491_v1 }
   0xe   :  { %v8924_v0 = vld [vmem:[%s12066_s29] sm:$0xff]   ;;  %v8925_v2 = vld [vmem:[%s12066_s29 + $0x8] sm:$0xff]   ;;  %v8926_v3 = vld [vmem:[%s12066_s29 + $0x10] sm:$0xff]  }
   0xf   :  { %8131 = vmatpush3.bf16.msra.mxu1 %v8924_v0  ;;  %8109 = vmatpush3.bf16.msra.mxu0 %v8924_v0  ;;  %v8927_v4 = vld [vmem:[%s12066_s29 + $0x18] sm:$0xff]   ;;  %v8928_v5 = vld [vmem:[%s12066_s29 + $0x20] sm:$0xff]   ;;  %v8945_v15 = vld [vmem:[%s12067_s2 + $0xe8] ss:$12 sps:$4 sm:$0xff]  }
  0x10   :  { %8132 = vmatprep.subr.bf16.mxu1 %v9491_v1  ;;  %8110 = vmatprep.subr.bf16.mxu0 %v9491_v1  ;;  %v8937_v6 = vld [vmem:[%s12067_s2 + $0xb8] ss:$12 sps:$4 sm:$0xff]   ;;  %v8935_v9 = vld [vmem:[%s12067_s2 + $0xb4] ss:$12 sps:$4 sm:$0xff]   ;;  %v8938_v10 = vld [vmem:[%s12067_s2 + $0xbc] ss:$12 sps:$4 sm:$0xff]  }
  0x11   :  { %v8929_v7 = vld [vmem:[%s12068_s28 + $0x14] sm:$0xff]   ;;  %v8932_v8 = vld [vmem:[%s12068_s28] sm:$0xff]   ;;  %v8941_v11 = vld [vmem:[%s12067_s2 + $0xd0] ss:$12 sps:$4 sm:$0xff]  }
  0x12   :  { %v8939_v12 = vld [vmem:[%s12067_s2 + $0xcc] ss:$12 sps:$4 sm:$0xff]   ;;  %v8930_v13 = vld [vmem:[%s12068_s28 + $0x1c] sm:$0xff]   ;;  %v8943_v17 = vld [vmem:[%s12067_s2 + $0xe4] ss:$12 sps:$4 sm:$0xff]  }
  0x13   :  { %8133 = vmatpush3.bf16.msra.mxu1 %v8925_v2  ;;  %8111 = vmatpush3.bf16.msra.mxu0 %v8925_v2  ;;  %v8942_v14 = vld [vmem:[%s12067_s2 + $0xd4] ss:$12 sps:$4 sm:$0xff]   ;;  %v8933_v16 = vld [vmem:[%s12068_s28 + $0x8] sm:$0xff]   ;;  %v8950_v21 = vld [vmem:[%s12067_s2 + $0x104] ss:$12 sps:$4 sm:$0xff]  }
  0x14   :  { %8134 = vmatprep.subr.bf16.mxu1 %v9491_v1  ;;  %8112 = vmatprep.subr.bf16.mxu0 %v9491_v1  ;;  %v8946_v18 = vld [vmem:[%s12067_s2 + $0xec] ss:$12 sps:$4 sm:$0xff]   ;;  %v8947_v20 = vld [vmem:[%s12067_s2 + $0xfc] ss:$12 sps:$4 sm:$0xff]   ;;  %v8951_v25 = vld [vmem:[%s12067_s2 + $0x114] ss:$12 sps:$4 sm:$0xff]  }
  0x15   :  { %v8949_v19 = vld [vmem:[%s12067_s2 + $0x100] ss:$12 sps:$4 sm:$0xff]   ;;  %v8953_v22 = vld [vmem:[%s12067_s2 + $0x118] ss:$12 sps:$4 sm:$0xff]   ;;  %v8954_v26 = vld [vmem:[%s12067_s2 + $0x11c] ss:$12 sps:$4 sm:$0xff]  }
  0x16   :  { %v8931_v23 = vld [vmem:[%s12068_s28 + $0x24] ss:$0 sps:$4 sm:$0x33]   ;;  %v8934_v24 = vld [vmem:[%s12068_s28 + $0x10] ss:$0 sps:$4 sm:$0x33]  }
  0x17   :  { %8135 = vmatpush3.bf16.msra.mxu1 %v8926_v3  ;;  %8113 = vmatpush3.bf16.msra.mxu0 %v8926_v3  ;;  %v8957_v27 = vld [vmem:[%s12067_s2 + $0x130] ss:$12 sps:$4 sm:$0xff]   ;;  %v8955_v28 = vld [vmem:[%s12067_s2 + $0x12c] ss:$12 sps:$4 sm:$0xff]   ;;  %v8958_v29 = vld [vmem:[%s12067_s2 + $0x134] ss:$12 sps:$4 sm:$0xff]  }
  0x18   :  { %8136 = vmatprep.subr.bf16.mxu1 %v9491_v1  ;;  %8114 = vmatprep.subr.bf16.mxu0 %v9491_v1  ;;  %v8961_v30 = vld [vmem:[%s12067_s2 + $0x148] ss:$12 sps:$4 sm:$0xff]   ;;  %v8959_v31 = vld [vmem:[%s12067_s2 + $0x144] ss:$12 sps:$4 sm:$0xff]   ;;  %v8962_v32 = vld [vmem:[%s12067_s2 + $0x14c] ss:$12 sps:$4 sm:$0xff]  }
  0x19   :  { %v6991_v33 = vld [vmem:[%s12067_s2 + $0x15c] sm:$0xff]  ;;  %v8965_v36 = vld [vmem:[%s12067_s2 + $0x164] ss:$0 sps:$4 sm:$0xff]  }
  0x1a   :  { %v7015_v34 = vcombine.high %v6991_v33, %v6991_v33  ;;  %v7014_v35 = vcombine.low %v6991_v33, %v6991_v33  ;;  %v486_v38 = vsel %vm478_vm2, %v8965_v36, 0  ;;  %v8968_v39 = vld [vmem:[%s12067_s2 + $0x4] ss:$12 sps:$4 sm:$0xff]  }
  0x1b   :  { %8137 = vmatpush3.bf16.msra.mxu1 %v8927_v4  ;;  %8115 = vmatpush3.bf16.msra.mxu0 %v8927_v4 }
  0x1c   :  { %8138 = vmatprep.subr.bf16.mxu1 %v9491_v1  ;;  %8116 = vmatprep.subr.bf16.mxu0 %v9491_v1  ;;  %v480_v37 = vsel %vm478_vm2, %v7014_v35, 0 }
  0x1f   :  { %8139 = vmatpush3.bf16.msra.mxu1 %v8928_v5  ;;  %8117 = vmatpush3.bf16.msra.mxu0 %v8928_v5 }
  0x20   :  { %8152 = vmatprep.subr.bf16.mxu1 %v9491_v1  ;;  %488 = vmatprep.subr.bf16.mxu0 %v8937_v6 }
  0x22   :  { %8141 = vmatmul.mubr.msk.bf16.vlgmr.msra.gmra.mrb[0].mxu1 %vm131_vm1, %v8929_v7  ;;  %8119 = vmatmul.mubr.msk.bf16.vlgmr.msra.gmra.mrb[0].mxu0 %vm131_vm1, %v8932_v8 }
  0x23   :  { %8144 = vmatprep.mubr.msk.bf16.mxu1 %vm9492_vm0, %v9491_v1  ;;  %8122 = vmatprep.mubr.msk.bf16.mxu0 %vm9492_vm0, %v9491_v1 }
  0x24   :  { %489 = vmatpush1.bf16.msra.mxu0 %v8935_v9  ;;  %8153 = vmatpush3.bf16.msra.mxu1 %v8938_v10 }
  0x25   :  { %490 = vmatprep.subr.bf16.mxu0 %v8941_v11  ;;  %8154 = vmatprep.subr.bf16.mxu1 %v9491_v1 }
  0x28   :  { %491 = vmatpush1.bf16.msra.mxu0 %v8939_v12  ;;  %8155 = vmatpush3.bf16.msra.mxu1 %v8942_v14 }
  0x29   :  { %492 = vmatprep.subr.bf16.mxu0 %v8945_v15  ;;  %8156 = vmatprep.subr.bf16.mxu1 %v9491_v1 }
  0x2a   :  { %8145 = vmatmul.mubr.msk.bf16.gmra.mrb[4].mxu1 %vm131_vm1, %v8930_v13  ;;  %8123 = vmatmul.mubr.msk.bf16.gmra.mrb[4].mxu0 %vm131_vm1, %v8933_v16 }
  0x2b   :  { %8148 = vmatprep.mubr.msk.bf16.mxu1 %vm9492_vm0, %v9491_v1  ;;  %8126 = vmatprep.mubr.msk.bf16.mxu0 %vm9492_vm0, %v9491_v1 }
  0x2c   :  { %493 = vmatpush1.bf16.msra.mxu0 %v8943_v17  ;;  %8157 = vmatpush3.bf16.msra.mxu1 %v8946_v18 }
  0x2d   :  { %494 = vmatprep.subr.bf16.mxu0 %v8949_v19  ;;  %8158 = vmatprep.subr.bf16.mxu1 %v9491_v1 }
  0x30   :  { %495 = vmatpush1.bf16.msra.mxu0 %v8947_v20  ;;  %8159 = vmatpush3.bf16.msra.mxu1 %v8950_v21 }
  0x31   :  { %496 = vmatprep.subr.bf16.mxu0 %v8953_v22  ;;  %8160 = vmatprep.subr.bf16.mxu1 %v9491_v1 }
  0x32   :  { %8149 = vmatmul.mubr.msk.bf16.gmra.mrb[8].mxu1 %vm131_vm1, %v8931_v23  ;;  %8127 = vmatmul.mubr.msk.bf16.gmra.mrb[8].mxu0 %vm131_vm1, %v8934_v24 }
  0x33   :  { %8168 = vmatprep.mubr.msk.bf16.mxu1 %vm9492_vm0, %v9491_v1  ;;  %520 = vmatprep.mubr.bf16.mxu0 %v9493_v40 }
  0x34   :  { %497 = vmatpush1.bf16.msra.mxu0 %v8951_v25  ;;  %8161 = vmatpush3.bf16.msra.mxu1 %v8954_v26 }
  0x35   :  { %498 = vmatprep.subr.bf16.mxu0 %v8957_v27  ;;  %8162 = vmatprep.subr.bf16.mxu1 %v9491_v1 }
  0x38   :  { %499 = vmatpush1.bf16.msra.mxu0 %v8955_v28  ;;  %8163 = vmatpush3.bf16.msra.mxu1 %v8958_v29 }
  0x39   :  { %500 = vmatprep.subr.bf16.mxu0 %v8961_v30  ;;  %8164 = vmatprep.subr.bf16.mxu1 %v9491_v1 }
  0x3c   :  { %501 = vmatpush1.bf16.msra.mxu0 %v8959_v31  ;;  %8165 = vmatpush3.bf16.msra.mxu1 %v8962_v32 }
  0x3d   :  { %8166 = vmatprep.subr.bf16.mxu1 %v9491_v1  ;;  %7017 = vmatprep.subr.msk.bf16.mxu0 %vm478_vm2, %v7015_v34 }
  0x40   :  { %503 = vmatpush1.bf16.msra.mxu0 %v480_v37  ;;  %8167 = vmatpush3.bf16.msra.mxu1 %v486_v38 }
  0x41   :  { %8180 = vmatprep.subr.bf16.mxu1 %v9491_v1  ;;  %743 = vmatprep.subr.bf16.mxu0 %v8968_v39 }
  0x42   :  { %27 = vsyncpa [#allocation3], 0  ;;  %v8966_v43 = vld [vmem:[%s12067_s2] ss:$12 sps:$4 sm:$0xff]   ;;  %vm468_vm3 = vcmask 982016   ;;  %v9896_v38 = vld [vmem:[%s12066_s29 + $0x10] sm:$0xff]  }
  0x43   :  { %v8969_v46 = vld [vmem:[%s12067_s2 + $0x8] ss:$12 sps:$4 sm:$0xff]   ;;  %v8970_v54 = vld [vmem:[%s12067_s2 + $0x18] ss:$12 sps:$4 sm:$0xff]   ;;  %v8973_v55 = vld [vmem:[%s12067_s2 + $0x20] ss:$12 sps:$4 sm:$0xff]  }
  0x44   :  { %v8972_v50 = vld [vmem:[%s12067_s2 + $0x1c] ss:$12 sps:$4 sm:$0xff]   ;;  %v8976_v56 = vld [vmem:[%s12067_s2 + $0x34] ss:$12 sps:$4 sm:$0xff]   ;;  %v8977_v61 = vld [vmem:[%s12067_s2 + $0x38] ss:$12 sps:$4 sm:$0xff]  }
  0x45   :  { %v8974_v60 = vld [vmem:[%s12067_s2 + $0x30] ss:$12 sps:$4 sm:$0xff]   ;;  %v8980_v3 = vld [vmem:[%s12067_s2 + $0x4c] ss:$12 sps:$4 sm:$0xff]   ;;  %v8978_v7 = vld [vmem:[%s12067_s2 + $0x48] ss:$12 sps:$4 sm:$0xff]  }
  0x46   :  { %v8981_v8 = vld [vmem:[%s12067_s2 + $0x50] ss:$12 sps:$4 sm:$0xff]   ;;  %v8982_v14 = vld [vmem:[%s12067_s2 + $0x60] ss:$12 sps:$4 sm:$0xff]   ;;  %v8985_v15 = vld [vmem:[%s12067_s2 + $0x68] ss:$12 sps:$4 sm:$0xff]  }
  0x47   :  { %v8984_v9 = vld [vmem:[%s12067_s2 + $0x64] ss:$12 sps:$4 sm:$0xff]   ;;  %v8988_v18 = vld [vmem:[%s12067_s2 + $0x7c] ss:$12 sps:$4 sm:$0xff]   ;;  %v8989_v23 = vld [vmem:[%s12067_s2 + $0x80] ss:$12 sps:$4 sm:$0xff]  }
  0x48   :  { %v8986_v22 = vld [vmem:[%s12067_s2 + $0x78] ss:$12 sps:$4 sm:$0xff]   ;;  %v8992_v24 = vld [vmem:[%s12067_s2 + $0x94] ss:$12 sps:$4 sm:$0xff]   ;;  %v228_v25 = vld [vmem:[%s12067_s2 + $0xa8] sm:$0xff]  ;;  %s12069_s23 = sld [smem:[#allocation8_spill]] }
  0x49   :  { %v8990_v26 = vld [vmem:[%s12067_s2 + $0x90] ss:$12 sps:$4 sm:$0xff]   ;;  %v8993_v27 = vld [vmem:[%s12067_s2 + $0x98] ss:$12 sps:$4 sm:$0xff]   ;;  %v7046_v28 = vcombine.high %v228_v25, %v228_v25  ;;  %v7045_v29 = vcombine.low %v228_v25, %v228_v25  ;;  %v9007_v35 = vld [vmem:[%s12067_s2 + $0x188] ss:$12 sps:$4 sm:$0xff]  }
  0x4a   :  { %v8996_v30 = vld [vmem:[%s12067_s2 + $0xb0] ss:$0 sps:$4 sm:$0xff]   ;;  %v9868_v34 = vld [vmem:[%s12066_s29] sm:$0xff]   ;;  %v9882_v36 = vld [vmem:[%s12066_s29 + $0x8] sm:$0xff]   ;;  %vm2046_vm4 = vcmask 261120   ;;  %vm2054_vm5 = vcmask 257024  }
  0x4b   :  { %v735_v31 = vsel %vm478_vm2, %v7045_v29, 0  ;;  %v741_v32 = vsel %vm478_vm2, %v8996_v30, 0  ;;  %v9003_v33 = vld [vmem:[%s12067_s2 + $0x170] ss:$12 sps:$4 sm:$0xff]   ;;  %v9011_v37 = vld [vmem:[%s12067_s2 + $0x1a0] ss:$12 sps:$4 sm:$0xff]  }
  0x4c   :  { %v9046_v29 = vld [vmem:[%s12067_s2 + $0x264] ss:$12 sps:$4 sm:$0xff]   ;;  %v9052_v30 = vld [vmem:[%s12067_s2 + $0x280] ss:$12 sps:$4 sm:$0xff]   ;;  %s12070_s1 = sld [smem:[#allocation9_spill]]  ;;  %vm2455_vm6 = vcmask 130048  }
  0x4d   :  { %s12072_s5 = sld [smem:[#allocation11_spill]]  ;;  %vm2833_vm7 = vcmask 1041408   ;;  %vm2829_vm8 = vcmask 293888   ;;  %vm4863_vm9 = vcmask 1045504   ;;  %vm4872_vm10 = vcmask 785408  }
  0x4e   :  { %vm4874_vm11 = vcmask 783360   ;;  %vm5281_vm12 = vcmask 1046528   ;;  %vm5277_vm13 = vcmask 113664   ;;  %vm6305_vm14 = vcmask 519168  }
  0x4f   :  { %vm6329_vm15 = vcmask 523264  }
  0xf5   :  { %v292_v41 = vpop.f32.mrb[0].mxu1  ;;  %v175_v44 = vpop.f32.mrb[0].mxu0 }
  0xf6   :  { %v8142_v42 = vpop.f32.mrb[1].mxu1  ;;  %v8120_v47 = vpop.f32.mrb[1].mxu0 }
  0xf7   :  { %v295_v45 = vpop.f32.mrb[2].mxu1  ;;  %v178_v51 = vpop.f32.mrb[2].mxu0  ;;  %v9002_v42 = vld [vmem:[%s12067_s2 + $0x16c] ss:$12 sps:$4 sm:$0xff]   ;;  %v9000_v47 = vld [vmem:[%s12067_s2 + $0x168] ss:$12 sps:$4 sm:$0xff]  }
  0xf8   :  { %v314_v48 = vpack.c.bf16 %v295_v45, %v292_v41  ;;  %v8143_v49 = vpop.f32.mrb[3].mxu1  ;;  %v9768_v52 = vpack.c.bf16 %v178_v51, %v175_v44  ;;  %v8121_v53 = vpop.f32.mrb[3].mxu0  ;;  %v9909_v41 = vld [vmem:[%s12066_s29 + $0x18] sm:$0xff]   ;;  %v9925_v44 = vld [vmem:[%s12066_s29 + $0x20] sm:$0xff]  }
  0xf9   :  { %v9019_v45 = vld [vmem:[%s12067_s2 + $0x1d0] ss:$12 sps:$4 sm:$0xff]   ;;  %v9023_v49 = vld [vmem:[%s12067_s2 + $0x1e8] ss:$12 sps:$4 sm:$0xff]  }
  0xfa   :  { %7018 = vmatmul.mubr.msk.bf16.vlgmr.msra.gmra.mrb[12].mxu0 %vm468_vm3, %v314_v48  ;;  %8169 = vmatmul.mubr.msk.bf16.vlgmr.msra.gmra.mrb[12].mxu1 %vm468_vm3, %v314_v48  ;;  %v9006_v48 = vld [vmem:[%s12067_s2 + $0x184] ss:$12 sps:$4 sm:$0xff]   ;;  %v9010_v51 = vld [vmem:[%s12067_s2 + $0x19c] ss:$12 sps:$4 sm:$0xff]  }
  0xfb   :  { %744 = vmatpush1.bf16.msra.mxu0 %v8966_v43  ;;  %8181 = vmatpush3.bf16.msra.mxu1 %v8969_v46  ;;  %v9015_v43 = vld [vmem:[%s12067_s2 + $0x1b8] ss:$12 sps:$4 sm:$0xff]   ;;  %v8997_v46 = vld [vmem:[%s12068_s28 + $0x28] sm:$0xff]   ;;  %v8998_v53 = vld [vmem:[%s12068_s28 + $0x30] sm:$0xff]  }
  0xfc   :  { %745 = vmatprep.subr.bf16.mxu0 %v8972_v50  ;;  %8182 = vmatprep.subr.bf16.mxu1 %v9491_v1  ;;  %v9004_v50 = vld [vmem:[%s12067_s2 + $0x180] ss:$12 sps:$4 sm:$0xff]  }
  0xfd   :  { %v300_v57 = vpop.f32.mrb[4].mxu1  ;;  %530 = vmatprep.mubr.bf16.mxu0 %v9493_v40  ;;  %8172 = vmatprep.mubr.msk.bf16.mxu1 %vm9492_vm0, %v9491_v1  ;;  %v183_v59 = vpop.f32.mrb[4].mxu0 }
  0xfe   :  { %v8146_v58 = vpop.f32.mrb[5].mxu1  ;;  %v8124_v63 = vpop.f32.mrb[5].mxu0 }
  0xff   :  { %746 = vmatpush1.bf16.msra.mxu0 %v8970_v54  ;;  %8183 = vmatpush3.bf16.msra.mxu1 %v8973_v55  ;;  %v303_v62 = vpop.f32.mrb[6].mxu1  ;;  %v186_v4 = vpop.f32.mrb[6].mxu0  ;;  %v9008_v54 = vld [vmem:[%s12067_s2 + $0x198] ss:$12 sps:$4 sm:$0xff]   ;;  %v9014_v55 = vld [vmem:[%s12067_s2 + $0x1b4] ss:$12 sps:$4 sm:$0xff]  }
 0x100   :  { %747 = vmatprep.subr.bf16.mxu0 %v8976_v56  ;;  %8184 = vmatprep.subr.bf16.mxu1 %v9491_v1  ;;  %v315_v0 = vpack.c.bf16 %v303_v62, %v300_v57  ;;  %v8147_v2 = vpop.f32.mrb[7].mxu1  ;;  %v9795_v5 = vpack.c.bf16 %v186_v4, %v183_v59  ;;  %v8125_v6 = vpop.f32.mrb[7].mxu0  ;;  %v9012_v56 = vld [vmem:[%s12067_s2 + $0x1b0] ss:$12 sps:$4 sm:$0xff]   ;;  %v9018_v57 = vld [vmem:[%s12067_s2 + $0x1cc] ss:$12 sps:$4 sm:$0xff]  }
 0x101   :  { %v8999_v58 = vld [vmem:[%s12068_s28 + $0x38] ss:$0 sps:$4 sm:$0x33]   ;;  %v9016_v59 = vld [vmem:[%s12067_s2 + $0x1c8] ss:$12 sps:$4 sm:$0xff]  }
 0x102   :  { %7019 = vmatmul.mubr.msk.bf16.gmra.mrb[16].mxu0 %vm468_vm3, %v315_v0  ;;  %8173 = vmatmul.mubr.msk.bf16.gmra.mrb[16].mxu1 %vm468_vm3, %v315_v0  ;;  %v9026_v62 = vld [vmem:[%s12067_s2 + $0x1fc] ss:$12 sps:$4 sm:$0xff]   ;;  %v9024_v63 = vld [vmem:[%s12067_s2 + $0x1f8] ss:$12 sps:$4 sm:$0xff]   ;;  %v7094_v0 = vld [vmem:[%s12067_s2 + $0x210] sm:$0xff] }
 0x103   :  { %748 = vmatpush1.bf16.msra.mxu0 %v8974_v60  ;;  %8185 = vmatpush3.bf16.msra.mxu1 %v8977_v61  ;;  %v9022_v60 = vld [vmem:[%s12067_s2 + $0x1e4] ss:$12 sps:$4 sm:$0xff]   ;;  %v9020_v61 = vld [vmem:[%s12067_s2 + $0x1e0] ss:$12 sps:$4 sm:$0xff]   ;;  %v7118_v2 = vcombine.high %v7094_v0, %v7094_v0  ;;  %v9030_v4 = vld [vmem:[%s12067_s2 + $0x218] ss:$0 sps:$4 sm:$0xff]  }
 0x104   :  { %749 = vmatprep.subr.bf16.mxu0 %v8980_v3  ;;  %8186 = vmatprep.subr.bf16.mxu1 %v9491_v1  ;;  %v7117_v3 = vcombine.low %v7094_v0, %v7094_v0  ;;  %v1114_v6 = vsel %vm478_vm2, %v9030_v4, 0 }
 0x105   :  { %v308_v10 = vpop.f32.mrb[8].mxu1  ;;  %540 = vmatprep.mubr.bf16.mxu0 %v9493_v40  ;;  %8176 = vmatprep.mubr.msk.bf16.mxu1 %vm9492_vm0, %v9491_v1  ;;  %v9812_v13 = vpop.f32.mrb[8].mxu0 }
 0x106   :  { %v316_v11 = vpack.c.bf16 %v308_v10, %v308_v10  ;;  %v8150_v12 = vpop.f32.mrb[9].mxu1  ;;  %v8128_v17 = vpop.f32.mrb[9].mxu0  ;;  %v199_v39 = vpack.c.bf16 %v9812_v13, %v9812_v13  ;;  %v9034_v13 = vld [vmem:[%s12067_s2 + $0x21c] ss:$12 sps:$4 sm:$0xff]  }
 0x107   :  { %750 = vmatpush1.bf16.msra.mxu0 %v8978_v7  ;;  %8187 = vmatpush3.bf16.msra.mxu1 %v8981_v8  ;;  %v311_v16 = vpop.f32.mrb[10].mxu1  ;;  %v194_v20 = vpop.f32.mrb[10].mxu0  ;;  %v9036_v7 = vld [vmem:[%s12067_s2 + $0x220] ss:$12 sps:$4 sm:$0xff]  }
 0x108   :  { %751 = vmatprep.subr.bf16.mxu0 %v8984_v9  ;;  %8188 = vmatprep.subr.bf16.mxu1 %v9491_v1  ;;  %v8151_v19 = vpop.f32.mrb[11].mxu1  ;;  %v8129_v21 = vpop.f32.mrb[11].mxu0  ;;  %v9038_v16 = vld [vmem:[%s12067_s2 + $0x234] ss:$12 sps:$4 sm:$0xff]  }
 0x109   :  { %v9044_v21 = vld [vmem:[%s12067_s2 + $0x250] ss:$12 sps:$4 sm:$0xff]  }
 0x10a   :  { %7020 = vmatmul.mubr.msk.bf16.gmra.mrb[20].mxu0 %vm468_vm3, %v316_v11  ;;  %8177 = vmatmul.mubr.msk.bf16.gmra.mrb[20].mxu1 %vm468_vm3, %v316_v11 }
 0x10b   :  { %752 = vmatpush1.bf16.msra.mxu0 %v8982_v14  ;;  %8189 = vmatpush3.bf16.msra.mxu1 %v8985_v15  ;;  %v9040_v14 = vld [vmem:[%s12067_s2 + $0x238] ss:$12 sps:$4 sm:$0xff]  }
 0x10c   :  { %753 = vmatprep.subr.bf16.mxu0 %v8988_v18  ;;  %8190 = vmatprep.subr.bf16.mxu1 %v9491_v1 }
 0x10d   :  { %775 = vmatprep.mubr.bf16.mxu0 %v9493_v40  ;;  %8196 = vmatprep.mubr.msk.bf16.mxu1 %vm9492_vm0, %v9491_v1 }
 0x10f   :  { %754 = vmatpush1.bf16.msra.mxu0 %v8986_v22  ;;  %8191 = vmatpush3.bf16.msra.mxu1 %v8989_v23  ;;  %v9042_v22 = vld [vmem:[%s12067_s2 + $0x24c] ss:$12 sps:$4 sm:$0xff]   ;;  %v9048_v23 = vld [vmem:[%s12067_s2 + $0x268] ss:$12 sps:$4 sm:$0xff]  }
 0x110   :  { %755 = vmatprep.subr.bf16.mxu0 %v8992_v24  ;;  %8192 = vmatprep.subr.bf16.mxu1 %v9491_v1 }
 0x113   :  { %756 = vmatpush1.bf16.msra.mxu0 %v8990_v26  ;;  %8193 = vmatpush3.bf16.msra.mxu1 %v8993_v27 }
 0x114   :  { %7048 = vmatprep.subr.msk.bf16.mxu0 %vm478_vm2, %v7046_v28  ;;  %8194 = vmatprep.subr.bf16.mxu1 %v9491_v1 }
 0x117   :  { %758 = vmatpush1.bf16.msra.mxu0 %v735_v31  ;;  %8195 = vmatpush3.bf16.msra.mxu1 %v741_v32  ;;  %v9050_v31 = vld [vmem:[%s12067_s2 + $0x27c] ss:$12 sps:$4 sm:$0xff]   ;;  %v9056_v32 = vld [vmem:[%s12067_s2 + $0x298] ss:$12 sps:$4 sm:$0xff]  }
 0x118   :  { %8208 = vmatprep.subr.bf16.mxu0 %v9491_v1  ;;  %8230 = vmatprep.subr.bf16.mxu1 %v9491_v1 }
 0x11a   :  { %7049 = vmatmul.mubr.msk.bf16.vlgmr.msra.gmra.mrb[12].mxu0 %vm468_vm3, %v9768_v52  ;;  %8197 = vmatmul.mubr.msk.bf16.vlgmr.msra.gmra.mrb[12].mxu1 %vm468_vm3, %v9768_v52  ;;  %v9027_v52 = vld [vmem:[%s12067_s2 + $0x200] ss:$12 sps:$4 sm:$0xff]  }
 0x11b   :  { %8209 = vmatpush3.bf16.msra.mxu0 %v9868_v34  ;;  %785 = vmatprep.mubr.bf16.mxu0 %v9493_v40 }
 0x11c   :  { %8210 = vmatprep.subr.bf16.mxu0 %v9491_v1  ;;  %8200 = vmatprep.mubr.msk.bf16.mxu1 %vm9492_vm0, %v9491_v1 }
 0x11d   :  { %8231 = vmatpush3.bf16.msra.mxu1 %v9003_v33  ;;  %v9031_v33 = vld [vmem:[%s12068_s28 + $0x3c] sm:$0xff]  }
 0x11e   :  { %8232 = vmatprep.subr.bf16.mxu1 %v9491_v1 }
 0x11f   :  { %8211 = vmatpush3.bf16.msra.mxu0 %v9882_v36 }
 0x120   :  { %8212 = vmatprep.subr.bf16.mxu0 %v9491_v1 }
 0x121   :  { %8233 = vmatpush3.bf16.msra.mxu1 %v9007_v35  ;;  %v9037_v35 = vld [vmem:[%s12067_s2 + $0x224] ss:$12 sps:$4 sm:$0xff]  }
 0x122   :  { %7050 = vmatmul.mubr.msk.bf16.gmra.mrb[16].mxu0 %vm468_vm3, %v9795_v5  ;;  %8201 = vmatmul.mubr.msk.bf16.gmra.mrb[16].mxu1 %vm468_vm3, %v9795_v5  ;;  %v1108_v5 = vsel %vm478_vm2, %v7117_v3, 0 }
 0x123   :  { %8213 = vmatpush3.bf16.msra.mxu0 %v9896_v38  ;;  %795 = vmatprep.mubr.bf16.mxu0 %v9493_v40 }
 0x124   :  { %8204 = vmatprep.mubr.msk.bf16.mxu1 %vm9492_vm0, %v9491_v1  ;;  %8214 = vmatprep.subr.bf16.mxu0 %v9491_v1 }
 0x125   :  { %8234 = vmatprep.subr.bf16.mxu1 %v9491_v1 }
 0x126   :  { %8235 = vmatpush3.bf16.msra.mxu1 %v9011_v37  ;;  %v9054_v37 = vld [vmem:[%s12067_s2 + $0x294] ss:$12 sps:$4 sm:$0xff]  }
 0x127   :  { %8215 = vmatpush3.bf16.msra.mxu0 %v9909_v41  ;;  %8236 = vmatprep.subr.bf16.mxu1 %v9491_v1 }
 0x128   :  { %8216 = vmatprep.subr.bf16.mxu0 %v9491_v1 }
 0x12a   :  { %7051 = vmatmul.mubr.msk.bf16.gmra.mrb[20].mxu0 %vm468_vm3, %v199_v39  ;;  %8205 = vmatmul.mubr.msk.bf16.gmra.mrb[20].mxu1 %vm468_vm3, %v199_v39  ;;  %v9060_v39 = vld [vmem:[%s12067_s2 + $0x2b0] ss:$12 sps:$4 sm:$0xff]  }
 0x12b   :  { %8217 = vmatpush3.bf16.msra.mxu0 %v9925_v44  ;;  %8218 = vmatprep.mubr.msk.bf16.mxu0 %vm9492_vm0, %v9491_v1 }
 0x12c   :  { %1116 = vmatprep.subr.bf16.mxu0 %v9002_v42  ;;  %8237 = vmatpush3.bf16.msra.mxu1 %v9015_v43  ;;  %v9041_v42 = vld [vmem:[%s12067_s2 + $0x23c] ss:$12 sps:$4 sm:$0xff]   ;;  %v9058_v43 = vld [vmem:[%s12067_s2 + $0x2ac] ss:$12 sps:$4 sm:$0xff]  }
 0x12d   :  { %8238 = vmatprep.subr.bf16.mxu1 %v9491_v1  ;;  %8246 = vmatprep.mubr.msk.bf16.mxu1 %vm9492_vm0, %v9491_v1 }
 0x130   :  { %8239 = vmatpush3.bf16.msra.mxu1 %v9019_v45  ;;  %v9032_v45 = vld [vmem:[%s12068_s28 + $0x44] sm:$0xff]  }
 0x131   :  { %8240 = vmatprep.subr.bf16.mxu1 %v9491_v1 }
 0x132   :  { %8219 = vmatmul.mubr.msk.bf16.vlgmr.msra.gmra.mrb[24].mxu0 %vm131_vm1, %v8997_v46  ;;  %v9045_v46 = vld [vmem:[%s12067_s2 + $0x254] ss:$12 sps:$4 sm:$0xff]  }
 0x133   :  { %8222 = vmatprep.mubr.msk.bf16.mxu0 %vm9492_vm0, %v9491_v1  ;;  %1117 = vmatpush1.bf16.msra.mxu0 %v9000_v47  ;;  %v9049_v47 = vld [vmem:[%s12067_s2 + $0x26c] ss:$12 sps:$4 sm:$0xff]  }
 0x134   :  { %1118 = vmatprep.subr.bf16.mxu0 %v9006_v48  ;;  %8241 = vmatpush3.bf16.msra.mxu1 %v9023_v49  ;;  %v9033_v48 = vld [vmem:[%s12068_s28 + $0x4c] ss:$0 sps:$4 sm:$0x33]   ;;  %v9053_v49 = vld [vmem:[%s12067_s2 + $0x284] ss:$12 sps:$4 sm:$0xff]  }
 0x135   :  { %8242 = vmatprep.subr.bf16.mxu1 %v9491_v1 }
 0x137   :  { %1119 = vmatpush1.bf16.msra.mxu0 %v9004_v50  ;;  %v9057_v50 = vld [vmem:[%s12067_s2 + $0x29c] ss:$12 sps:$4 sm:$0xff]  }
 0x138   :  { %1120 = vmatprep.subr.bf16.mxu0 %v9010_v51  ;;  %8243 = vmatpush3.bf16.msra.mxu1 %v9027_v52  ;;  %v9061_v51 = vld [vmem:[%s12067_s2 + $0x2b4] ss:$12 sps:$4 sm:$0xff]   ;;  %v7166_v52 = vld [vmem:[%s12067_s2 + $0x2c4] sm:$0xff] }
 0x139   :  { %8244 = vmatprep.subr.bf16.mxu1 %v9491_v1 }
 0x13a   :  { %8223 = vmatmul.mubr.msk.bf16.gmra.mrb[28].mxu0 %vm131_vm1, %v8998_v53  ;;  %v7190_v53 = vcombine.high %v7166_v52, %v7166_v52 }
 0x13b   :  { %8226 = vmatprep.mubr.msk.bf16.mxu0 %vm9492_vm0, %v9491_v1  ;;  %1121 = vmatpush1.bf16.msra.mxu0 %v9008_v54  ;;  %v7189_v54 = vcombine.low %v7166_v52, %v7166_v52 }
 0x13c   :  { %1122 = vmatprep.subr.bf16.mxu0 %v9014_v55  ;;  %8245 = vmatpush3.bf16.msra.mxu1 %v1114_v6  ;;  %v9064_v55 = vld [vmem:[%s12067_s2 + $0x2cc] ss:$0 sps:$4 sm:$0xff]   ;;  %v9079_v6 = vld [vmem:[%s12067_s2 + $0x308] ss:$12 sps:$4 sm:$0xff]  }
 0x13d   :  { %8258 = vmatprep.subr.bf16.mxu1 %v9491_v1 }
 0x13f   :  { %1123 = vmatpush1.bf16.msra.mxu0 %v9012_v56  ;;  %v1496_v56 = vsel %vm478_vm2, %v7189_v54, 0 }
 0x140   :  { %1124 = vmatprep.subr.bf16.mxu0 %v9018_v57  ;;  %v1502_v57 = vsel %vm478_vm2, %v9064_v55, 0 }
 0x142   :  { %8227 = vmatmul.mubr.msk.bf16.gmra.mrb[32].mxu0 %vm131_vm1, %v8999_v58 }
 0x143   :  { %1125 = vmatpush1.bf16.msra.mxu0 %v9016_v59  ;;  %1148 = vmatprep.mubr.bf16.mxu0 %v9493_v40 }
 0x144   :  { %1126 = vmatprep.subr.bf16.mxu0 %v9022_v60 }
 0x147   :  { %1127 = vmatpush1.bf16.msra.mxu0 %v9020_v61 }
 0x148   :  { %1128 = vmatprep.subr.bf16.mxu0 %v9026_v62 }
 0x14b   :  { %1129 = vmatpush1.bf16.msra.mxu0 %v9024_v63  ;;  %v9071_v63 = vld [vmem:[%s12067_s2 + $0x2d8] ss:$12 sps:$4 sm:$0xff]  }
 0x14c   :  { %7120 = vmatprep.subr.msk.bf16.mxu0 %vm478_vm2, %v7118_v2  ;;  %v9075_v2 = vld [vmem:[%s12067_s2 + $0x2f0] ss:$12 sps:$4 sm:$0xff]  }
 0x14f   :  { %1131 = vmatpush1.bf16.msra.mxu0 %v1108_v5 }
 0x150   :  { %1504 = vmatprep.subr.bf16.mxu0 %v9036_v7 }
 0x205   :  { %v922_v8 = vpop.f32.mrb[24].mxu0 }
 0x206   :  { %v8220_v9 = vpop.f32.mrb[25].mxu0 }
 0x207   :  { %v925_v10 = vpop.f32.mrb[26].mxu0 }
 0x208   :  { %v944_v11 = vpack.c.bf16 %v925_v10, %v922_v8  ;;  %v8221_v12 = vpop.f32.mrb[27].mxu0 }
 0x209   :  { %v9065_v12 = vld [vmem:[%s12068_s28 + $0x50] sm:$0xff]  }
 0x20a   :  { %7121 = vmatmul.mubr.msk.bf16.vlgmr.msra.gmra.mrb[12].mxu0 %vm468_vm3, %v944_v11  ;;  %8247 = vmatmul.mubr.msk.bf16.vlgmr.msra.gmra.mrb[12].mxu1 %vm468_vm3, %v944_v11  ;;  %v9083_v11 = vld [vmem:[%s12067_s2 + $0x320] ss:$12 sps:$4 sm:$0xff]  }
 0x20b   :  { %8259 = vmatpush3.bf16.msra.mxu1 %v9868_v34  ;;  %1158 = vmatprep.mubr.bf16.mxu0 %v9493_v40 }
 0x20c   :  { %8260 = vmatprep.subr.bf16.mxu1 %v9491_v1  ;;  %8250 = vmatprep.mubr.msk.bf16.mxu1 %vm9492_vm0, %v9491_v1 }
 0x20d   :  { %v930_v15 = vpop.f32.mrb[28].mxu0  ;;  %1505 = vmatpush1.bf16.msra.mxu0 %v9034_v13  ;;  %v9074_v13 = vld [vmem:[%s12067_s2 + $0x2ec] ss:$12 sps:$4 sm:$0xff]  }
 0x20e   :  { %v8224_v17 = vpop.f32.mrb[29].mxu0  ;;  %1506 = vmatprep.subr.bf16.mxu0 %v9040_v14  ;;  %v9091_v14 = vld [vmem:[%s12067_s2 + $0x350] ss:$12 sps:$4 sm:$0xff]  }
 0x20f   :  { %v933_v18 = vpop.f32.mrb[30].mxu0  ;;  %8261 = vmatpush3.bf16.msra.mxu1 %v9882_v36  ;;  %v9095_v17 = vld [vmem:[%s12067_s2 + $0x368] ss:$12 sps:$4 sm:$0xff]  }
 0x210   :  { %v945_v19 = vpack.c.bf16 %v933_v18, %v930_v15  ;;  %v8225_v20 = vpop.f32.mrb[31].mxu0  ;;  %8262 = vmatprep.subr.bf16.mxu1 %v9491_v1  ;;  %v9072_v15 = vld [vmem:[%s12067_s2 + $0x2e8] ss:$12 sps:$4 sm:$0xff]   ;;  %v9066_v18 = vld [vmem:[%s12068_s28 + $0x58] sm:$0xff]  }
 0x211   :  { %1507 = vmatpush1.bf16.msra.mxu0 %v9038_v16  ;;  %v9078_v16 = vld [vmem:[%s12067_s2 + $0x304] ss:$12 sps:$4 sm:$0xff]   ;;  %v9082_v20 = vld [vmem:[%s12067_s2 + $0x31c] ss:$12 sps:$4 sm:$0xff]  }
 0x212   :  { %7122 = vmatmul.mubr.msk.bf16.gmra.mrb[16].mxu0 %vm468_vm3, %v945_v19  ;;  %8251 = vmatmul.mubr.msk.bf16.gmra.mrb[16].mxu1 %vm468_vm3, %v945_v19  ;;  %v9076_v19 = vld [vmem:[%s12067_s2 + $0x300] ss:$12 sps:$4 sm:$0xff]  }
 0x213   :  { %8263 = vmatpush3.bf16.msra.mxu1 %v9896_v38  ;;  %1168 = vmatprep.mubr.bf16.mxu0 %v9493_v40 }
 0x214   :  { %8254 = vmatprep.mubr.msk.bf16.mxu1 %vm9492_vm0, %v9491_v1  ;;  %8264 = vmatprep.subr.bf16.mxu1 %v9491_v1 }
 0x215   :  { %v938_v24 = vpop.f32.mrb[32].mxu0  ;;  %1508 = vmatprep.subr.bf16.mxu0 %v9044_v21  ;;  %v9080_v21 = vld [vmem:[%s12067_s2 + $0x318] ss:$12 sps:$4 sm:$0xff]  }
 0x216   :  { %v946_v25 = vpack.c.bf16 %v938_v24, %v938_v24  ;;  %v8228_v26 = vpop.f32.mrb[33].mxu0  ;;  %1509 = vmatpush1.bf16.msra.mxu0 %v9042_v22  ;;  %v9086_v22 = vld [vmem:[%s12067_s2 + $0x334] ss:$12 sps:$4 sm:$0xff]   ;;  %v9084_v24 = vld [vmem:[%s12067_s2 + $0x330] ss:$12 sps:$4 sm:$0xff]  }
 0x217   :  { %v941_v27 = vpop.f32.mrb[34].mxu0  ;;  %8265 = vmatpush3.bf16.msra.mxu1 %v9909_v41  ;;  %1510 = vmatprep.subr.bf16.mxu0 %v9048_v23  ;;  %v9067_v23 = vld [vmem:[%s12068_s28 + $0x60] ss:$0 sps:$4 sm:$0x33]   ;;  %v9088_v26 = vld [vmem:[%s12067_s2 + $0x348] ss:$12 sps:$4 sm:$0xff]  }
 0x218   :  { %v8229_v28 = vpop.f32.mrb[35].mxu0  ;;  %8266 = vmatprep.subr.bf16.mxu1 %v9491_v1  ;;  %v9094_v27 = vld [vmem:[%s12067_s2 + $0x364] ss:$12 sps:$4 sm:$0xff]  }
 0x219   :  { %v9092_v28 = vld [vmem:[%s12067_s2 + $0x360] ss:$12 sps:$4 sm:$0xff]  }
 0x21a   :  { %7123 = vmatmul.mubr.msk.bf16.gmra.mrb[20].mxu0 %vm468_vm3, %v946_v25  ;;  %8255 = vmatmul.mubr.msk.bf16.gmra.mrb[20].mxu1 %vm468_vm3, %v946_v25  ;;  %v9090_v25 = vld [vmem:[%s12067_s2 + $0x34c] ss:$12 sps:$4 sm:$0xff]  }
 0x21b   :  { %8267 = vmatpush3.bf16.msra.mxu1 %v9925_v44  ;;  %8268 = vmatprep.mubr.msk.bf16.mxu1 %vm9492_vm0, %v9491_v1 }
 0x21c   :  { %8280 = vmatprep.subr.bf16.mxu1 %v9491_v1  ;;  %1511 = vmatpush1.bf16.msra.mxu0 %v9046_v29  ;;  %v7238_v29 = vld [vmem:[%s12067_s2 + $0x378] sm:$0xff] }
 0x21d   :  { %1512 = vmatprep.subr.bf16.mxu0 %v9052_v30  ;;  %1536 = vmatprep.mubr.bf16.mxu0 %v9493_v40  ;;  %v7262_v30 = vcombine.high %v7238_v29, %v7238_v29 }
 0x220   :  { %1513 = vmatpush1.bf16.msra.mxu0 %v9050_v31  ;;  %v7261_v31 = vcombine.low %v7238_v29, %v7238_v29 }
 0x221   :  { %1514 = vmatprep.subr.bf16.mxu0 %v9056_v32  ;;  %v9098_v32 = vld [vmem:[%s12067_s2 + $0x380] ss:$0 sps:$4 sm:$0xff]  }
 0x222   :  { %8269 = vmatmul.mubr.msk.bf16.vlgmr.msra.gmra.mrb[24].mxu1 %vm131_vm1, %v9031_v33  ;;  %v1884_v33 = vsel %vm478_vm2, %v7261_v31, 0  ;;  %v2146_v31 = vld [vmem:[%s12069_s23 + $0xf8] sm:$0xff] }
 0x223   :  { %8272 = vmatprep.mubr.msk.bf16.mxu1 %vm9492_vm0, %v9491_v1  ;;  %8281 = vmatpush3.bf16.msra.mxu1 %v9037_v35  ;;  %v1890_v35 = vsel %vm478_vm2, %v9098_v32, 0 }
 0x224   :  { %8282 = vmatprep.subr.bf16.mxu1 %v9491_v1  ;;  %1515 = vmatpush1.bf16.msra.mxu0 %v9054_v37 }
 0x225   :  { %1516 = vmatprep.subr.bf16.mxu0 %v9060_v39 }
 0x227   :  { %8283 = vmatpush3.bf16.msra.mxu1 %v9041_v42 }
 0x228   :  { %8284 = vmatprep.subr.bf16.mxu1 %v9491_v1  ;;  %1517 = vmatpush1.bf16.msra.mxu0 %v9058_v43 }
 0x229   :  { %7192 = vmatprep.subr.msk.bf16.mxu0 %vm478_vm2, %v7190_v53 }
 0x22a   :  { %8273 = vmatmul.mubr.msk.bf16.gmra.mrb[28].mxu1 %vm131_vm1, %v9032_v45 }
 0x22b   :  { %8276 = vmatprep.mubr.msk.bf16.mxu1 %vm9492_vm0, %v9491_v1  ;;  %8285 = vmatpush3.bf16.msra.mxu1 %v9045_v46 }
 0x22c   :  { %8286 = vmatprep.subr.bf16.mxu1 %v9491_v1  ;;  %1519 = vmatpush1.bf16.msra.mxu0 %v1496_v56  ;;  %v2131_v56 = vld [vmem:[%s12069_s23 + $0x80] sm:$0xff] }
 0x22d   :  { %8308 = vmatprep.subr.bf16.mxu0 %v9491_v1 }
 0x22f   :  { %8287 = vmatpush3.bf16.msra.mxu1 %v9049_v47 }
 0x230   :  { %8288 = vmatprep.subr.bf16.mxu1 %v9491_v1 }
 0x232   :  { %8277 = vmatmul.mubr.msk.bf16.gmra.mrb[32].mxu1 %vm131_vm1, %v9033_v48 }
 0x233   :  { %8289 = vmatpush3.bf16.msra.mxu1 %v9053_v49  ;;  %8296 = vmatprep.mubr.msk.bf16.mxu1 %vm9492_vm0, %v9491_v1 }
 0x234   :  { %8290 = vmatprep.subr.bf16.mxu1 %v9491_v1 }
 0x237   :  { %8291 = vmatpush3.bf16.msra.mxu1 %v9057_v50 }
 0x238   :  { %8292 = vmatprep.subr.bf16.mxu1 %v9491_v1 }
 0x23b   :  { %8293 = vmatpush3.bf16.msra.mxu1 %v9061_v51 }
 0x23c   :  { %8294 = vmatprep.subr.bf16.mxu1 %v9491_v1 }
 0x23f   :  { %8295 = vmatpush3.bf16.msra.mxu1 %v1502_v57  ;;  %v2132_v57 = vld [vmem:[%s12069_s23 + $0x88] sm:$0xff] }
 0x240   :  { %8330 = vmatprep.subr.bf16.mxu1 %v9491_v1 }
 0x2f5   :  { %v1310_v58 = vpop.f32.mrb[24].mxu1 }
 0x2f6   :  { %v8270_v59 = vpop.f32.mrb[25].mxu1 }
 0x2f7   :  { %v1313_v60 = vpop.f32.mrb[26].mxu1  ;;  %v2115_v59 = vld [vmem:[%s12069_s23] sm:$0xff] }
 0x2f8   :  { %v1332_v61 = vpack.c.bf16 %v1313_v60, %v1310_v58  ;;  %v8271_v62 = vpop.f32.mrb[27].mxu1  ;;  %v8540_v58 = vpack.c.bf16 %v2132_v57, %v2131_v56  ;;  %v2116_v60 = vld [vmem:[%s12069_s23 + $0x8] sm:$0xff] }
 0x2f9   :  { %v2133_v62 = vld [vmem:[%s12069_s23 + $0x90] sm:$0xff] }
 0x2fa   :  { %7193 = vmatmul.mubr.msk.bf16.vlgmr.msra.gmra.mrb[12].mxu0 %vm468_vm3, %v1332_v61  ;;  %8297 = vmatmul.mubr.msk.bf16.vlgmr.msra.gmra.mrb[12].mxu1 %vm468_vm3, %v1332_v61  ;;  %v8542_v61 = vpack.c.bf16 %v2116_v60, %v2115_v59 }
 0x2fb   :  { %8309 = vmatpush3.bf16.msra.mxu0 %v9868_v34  ;;  %1546 = vmatprep.mubr.bf16.mxu0 %v9493_v40 }
 0x2fc   :  { %8310 = vmatprep.subr.bf16.mxu0 %v9491_v1  ;;  %8300 = vmatprep.mubr.msk.bf16.mxu1 %vm9492_vm0, %v9491_v1 }
 0x2fd   :  { %v1318_v0 = vpop.f32.mrb[28].mxu1  ;;  %8331 = vmatpush3.bf16.msra.mxu1 %v9071_v63  ;;  %v2134_v63 = vld [vmem:[%s12069_s23 + $0x98] sm:$0xff] }
 0x2fe   :  { %v8274_v3 = vpop.f32.mrb[29].mxu1  ;;  %8332 = vmatprep.subr.bf16.mxu1 %v9491_v1 }
 0x2ff   :  { %v1321_v4 = vpop.f32.mrb[30].mxu1  ;;  %8311 = vmatpush3.bf16.msra.mxu0 %v9882_v36  ;;  %v2118_v3 = vld [vmem:[%s12069_s23 + $0x18] sm:$0xff] }
 0x300   :  { %v1333_v34 = vpack.c.bf16 %v1321_v4, %v1318_v0  ;;  %v8275_v5 = vpop.f32.mrb[31].mxu1  ;;  %8312 = vmatprep.subr.bf16.mxu0 %v9491_v1  ;;  %v8544_v0 = vpack.c.bf16 %v2134_v63, %v2133_v62 }
 0x301   :  { %8333 = vmatpush3.bf16.msra.mxu1 %v9075_v2  ;;  %v2117_v2 = vld [vmem:[%s12069_s23 + $0x10] sm:$0xff]  ;;  %v2136_v5 = vld [vmem:[%s12069_s23 + $0xa8] sm:$0xff] }
 0x302   :  { %7194 = vmatmul.mubr.msk.bf16.gmra.mrb[16].mxu0 %vm468_vm3, %v1333_v34  ;;  %8301 = vmatmul.mubr.msk.bf16.gmra.mrb[16].mxu1 %vm468_vm3, %v1333_v34  ;;  %v8546_v4 = vpack.c.bf16 %v2118_v3, %v2117_v2  ;;  %v2135_v34 = vld [vmem:[%s12069_s23 + $0xa0] sm:$0xff] }
 0x303   :  { %8313 = vmatpush3.bf16.msra.mxu0 %v9896_v38  ;;  %1556 = vmatprep.mubr.bf16.mxu0 %v9493_v40  ;;  %v9070_v38 = vld [vmem:[%s12067_s2 + $0x2d4] ss:$12 sps:$4 sm:$0xff]  }
 0x304   :  { %8304 = vmatprep.mubr.msk.bf16.mxu1 %vm9492_vm0, %v9491_v1  ;;  %8314 = vmatprep.subr.bf16.mxu0 %v9491_v1 }
 0x305   :  { %v1326_v36 = vpop.f32.mrb[32].mxu1  ;;  %8334 = vmatprep.subr.bf16.mxu1 %v9491_v1 }
 0x306   :  { %v1334_v7 = vpack.c.bf16 %v1326_v36, %v1326_v36  ;;  %v8278_v8 = vpop.f32.mrb[33].mxu1  ;;  %8335 = vmatpush3.bf16.msra.mxu1 %v9079_v6  ;;  %v8548_v6 = vpack.c.bf16 %v2136_v5, %v2135_v34  ;;  %v2119_v36 = vld [vmem:[%s12069_s23 + $0x20] sm:$0xff] }
 0x307   :  { %v1329_v9 = vpop.f32.mrb[34].mxu1  ;;  %8315 = vmatpush3.bf16.msra.mxu0 %v9909_v41  ;;  %8336 = vmatprep.subr.bf16.mxu1 %v9491_v1  ;;  %v9087_v41 = vld [vmem:[%s12067_s2 + $0x338] ss:$12 sps:$4 sm:$0xff]  }
 0x308   :  { %v8279_v10 = vpop.f32.mrb[35].mxu1  ;;  %8316 = vmatprep.subr.bf16.mxu0 %v9491_v1  ;;  %v2137_v9 = vld [vmem:[%s12069_s23 + $0xb0] sm:$0xff] }
 0x309   :  { %v2138_v10 = vld [vmem:[%s12069_s23 + $0xb8] sm:$0xff] }
 0x30a   :  { %7195 = vmatmul.mubr.msk.bf16.gmra.mrb[20].mxu0 %vm468_vm3, %v1334_v7  ;;  %8305 = vmatmul.mubr.msk.bf16.gmra.mrb[20].mxu1 %vm468_vm3, %v1334_v7  ;;  %v2120_v7 = vld [vmem:[%s12069_s23 + $0x28] sm:$0xff] }
 0x30b   :  { %8317 = vmatpush3.bf16.msra.mxu0 %v9925_v44  ;;  %8318 = vmatprep.mubr.msk.bf16.mxu0 %vm9492_vm0, %v9491_v1  ;;  %v9068_v44 = vld [vmem:[%s12067_s2 + $0x2d0] ss:$12 sps:$4 sm:$0xff]   ;;  %v8550_v8 = vpack.c.bf16 %v2120_v7, %v2119_v36 }
 0x30c   :  { %1892 = vmatprep.subr.bf16.mxu0 %v9070_v38  ;;  %8337 = vmatpush3.bf16.msra.mxu1 %v9083_v11  ;;  %v8552_v38 = vpack.c.bf16 %v2138_v10, %v2137_v9  ;;  %v2121_v11 = vld [vmem:[%s12069_s23 + $0x30] sm:$0xff] }
 0x30d   :  { %8338 = vmatprep.subr.bf16.mxu1 %v9491_v1  ;;  %8346 = vmatprep.mubr.msk.bf16.mxu1 %vm9492_vm0, %v9491_v1 }
 0x310   :  { %8339 = vmatpush3.bf16.msra.mxu1 %v9087_v41  ;;  %v2122_v41 = vld [vmem:[%s12069_s23 + $0x38] sm:$0xff] }
 0x311   :  { %8340 = vmatprep.subr.bf16.mxu1 %v9491_v1 }
 0x312   :  { %8319 = vmatmul.mubr.msk.bf16.vlgmr.msra.gmra.mrb[36].mxu0 %vm131_vm1, %v9065_v12  ;;  %v8554_v12 = vpack.c.bf16 %v2122_v41, %v2121_v11 }
 0x313   :  { %8322 = vmatprep.mubr.msk.bf16.mxu0 %vm9492_vm0, %v9491_v1  ;;  %1893 = vmatpush1.bf16.msra.mxu0 %v9068_v44  ;;  %v2139_v44 = vld [vmem:[%s12069_s23 + $0xc0] sm:$0xff] }
 0x314   :  { %1894 = vmatprep.subr.bf16.mxu0 %v9074_v13  ;;  %8341 = vmatpush3.bf16.msra.mxu1 %v9091_v14  ;;  %v2140_v13 = vld [vmem:[%s12069_s23 + $0xc8] sm:$0xff] }
 0x315   :  { %8342 = vmatprep.subr.bf16.mxu1 %v9491_v1  ;;  %v8556_v14 = vpack.c.bf16 %v2140_v13, %v2139_v44 }
 0x317   :  { %1895 = vmatpush1.bf16.msra.mxu0 %v9072_v15  ;;  %v2123_v15 = vld [vmem:[%s12069_s23 + $0x40] sm:$0xff] }
 0x318   :  { %1896 = vmatprep.subr.bf16.mxu0 %v9078_v16  ;;  %8343 = vmatpush3.bf16.msra.mxu1 %v9095_v17  ;;  %v2124_v16 = vld [vmem:[%s12069_s23 + $0x48] sm:$0xff] }
 0x319   :  { %8344 = vmatprep.subr.bf16.mxu1 %v9491_v1  ;;  %v8558_v17 = vpack.c.bf16 %v2124_v16, %v2123_v15 }
 0x31a   :  { %8323 = vmatmul.mubr.msk.bf16.gmra.mrb[40].mxu0 %vm131_vm1, %v9066_v18  ;;  %v2141_v18 = vld [vmem:[%s12069_s23 + $0xd0] sm:$0xff] }
 0x31b   :  { %8326 = vmatprep.mubr.msk.bf16.mxu0 %vm9492_vm0, %v9491_v1  ;;  %1897 = vmatpush1.bf16.msra.mxu0 %v9076_v19  ;;  %v2142_v19 = vld [vmem:[%s12069_s23 + $0xd8] sm:$0xff] }
 0x31c   :  { %1898 = vmatprep.subr.bf16.mxu0 %v9082_v20  ;;  %8345 = vmatpush3.bf16.msra.mxu1 %v1890_v35  ;;  %v8560_v20 = vpack.c.bf16 %v2142_v19, %v2141_v18  ;;  %v2130_v35 = vld [vmem:[%s12069_s23 + $0x78] sm:$0xff] }
 0x31d   :  { %8541 = vmatprep.subr.bf16.mxu1 %v8540_v58 }
 0x31f   :  { %1899 = vmatpush1.bf16.msra.mxu0 %v9080_v21  ;;  %v2125_v21 = vld [vmem:[%s12069_s23 + $0x50] sm:$0xff] }
 0x320   :  { %1900 = vmatprep.subr.bf16.mxu0 %v9086_v22  ;;  %v2126_v22 = vld [vmem:[%s12069_s23 + $0x58] sm:$0xff] }
 0x322   :  { %8327 = vmatmul.mubr.msk.bf16.gmra.mrb[44].mxu0 %vm131_vm1, %v9067_v23  ;;  %v8562_v23 = vpack.c.bf16 %v2126_v22, %v2125_v21  ;;  %vm6659_vm1 = vcmask 31744  }
 0x323   :  { %1901 = vmatpush1.bf16.msra.mxu0 %v9084_v24  ;;  %1924 = vmatprep.mubr.bf16.mxu0 %v9493_v40  ;;  %v2143_v24 = vld [vmem:[%s12069_s23 + $0xe0] sm:$0xff] }
 0x324   :  { %1902 = vmatprep.subr.bf16.mxu0 %v9090_v25  ;;  %v2144_v25 = vld [vmem:[%s12069_s23 + $0xe8] sm:$0xff] }
 0x327   :  { %1903 = vmatpush1.bf16.msra.mxu0 %v9088_v26  ;;  %v8564_v26 = vpack.c.bf16 %v2144_v25, %v2143_v24 }
 0x328   :  { %1904 = vmatprep.subr.bf16.mxu0 %v9094_v27  ;;  %v2127_v27 = vld [vmem:[%s12069_s23 + $0x60] sm:$0xff] }
 0x32b   :  { %1905 = vmatpush1.bf16.msra.mxu0 %v9092_v28  ;;  %v2128_v28 = vld [vmem:[%s12069_s23 + $0x68] sm:$0xff] }
 0x32c   :  { %7264 = vmatprep.subr.msk.bf16.mxu0 %vm478_vm2, %v7262_v30  ;;  %v8566_v29 = vpack.c.bf16 %v2128_v28, %v2127_v27  ;;  %v2145_v30 = vld [vmem:[%s12069_s23 + $0xf0] sm:$0xff] }
 0x32d   :  { %v8568_v32 = vpack.c.bf16 %v2146_v31, %v2145_v30 }
 0x32f   :  { %1907 = vmatpush1.bf16.msra.mxu0 %v1884_v33  ;;  %v2129_v33 = vld [vmem:[%s12069_s23 + $0x70] sm:$0xff] }
 0x330   :  { %8579 = vmatprep.subr.bf16.mxu0 %v8540_v58 }
 0x3e5   :  { %v1698_v37 = vpop.f32.mrb[36].mxu0 }
 0x3e6   :  { %v8320_v39 = vpop.f32.mrb[37].mxu0 }
 0x3e7   :  { %v1701_v42 = vpop.f32.mrb[38].mxu0  ;;  %v9494_v39 = vmov 0.0|0.0  }
 0x3e8   :  { %v1720_v43 = vpack.c.bf16 %v1701_v42, %v1698_v37  ;;  %v8321_v45 = vpop.f32.mrb[39].mxu0  ;;  %v8570_v37 = vpack.c.bf16 %v2130_v35, %v2129_v33 }
 0x3ea   :  { %7265 = vmatmul.mubr.msk.bf16.vlgmr.msra.gmra.mrb[12].mxu0 %vm468_vm3, %v1720_v43  ;;  %8347 = vmatmul.mubr.msk.bf16.vlgmr.msra.gmra.mrb[12].mxu1 %vm468_vm3, %v1720_v43 }
 0x3eb   :  { %1934 = vmatprep.mubr.bf16.mxu0 %v9493_v40  ;;  %8350 = vmatprep.mubr.msk.bf16.mxu1 %vm9492_vm0, %v9491_v1 }
 0x3ec   :  { %8543 = vmatpush3.bf16.msra.mxu1 %v8542_v61  ;;  %8581 = vmatpush3.bf16.msra.mxu0 %v8542_v61 }
 0x3ed   :  { %v1706_v46 = vpop.f32.mrb[40].mxu0  ;;  %8545 = vmatprep.subr.bf16.mxu1 %v8544_v0  ;;  %8583 = vmatprep.subr.bf16.mxu0 %v8544_v0 }
 0x3ee   :  { %v8324_v47 = vpop.f32.mrb[41].mxu0 }
 0x3ef   :  { %v1709_v48 = vpop.f32.mrb[42].mxu0 }
 0x3f0   :  { %v1721_v49 = vpack.c.bf16 %v1709_v48, %v1706_v46  ;;  %v8325_v50 = vpop.f32.mrb[43].mxu0  ;;  %8547 = vmatpush3.bf16.msra.mxu1 %v8546_v4  ;;  %8585 = vmatpush3.bf16.msra.mxu0 %v8546_v4 }
 0x3f1   :  { %8549 = vmatprep.subr.bf16.mxu1 %v8548_v6  ;;  %8587 = vmatprep.subr.bf16.mxu0 %v8548_v6 }
 0x3f2   :  { %7266 = vmatmul.mubr.msk.bf16.gmra.mrb[16].mxu0 %vm468_vm3, %v1721_v49  ;;  %8351 = vmatmul.mubr.msk.bf16.gmra.mrb[16].mxu1 %vm468_vm3, %v1721_v49 }
 0x3f3   :  { %1944 = vmatprep.mubr.bf16.mxu0 %v9493_v40  ;;  %8354 = vmatprep.mubr.msk.bf16.mxu1 %vm9492_vm0, %v9491_v1 }
 0x3f4   :  { %8551 = vmatpush3.bf16.msra.mxu1 %v8550_v8  ;;  %8589 = vmatpush3.bf16.msra.mxu0 %v8550_v8 }
 0x3f5   :  { %v1714_v51 = vpop.f32.mrb[44].mxu0  ;;  %8553 = vmatprep.subr.bf16.mxu1 %v8552_v38  ;;  %8591 = vmatprep.subr.bf16.mxu0 %v8552_v38 }
 0x3f6   :  { %v1722_v52 = vpack.c.bf16 %v1714_v51, %v1714_v51  ;;  %v8328_v53 = vpop.f32.mrb[45].mxu0 }
 0x3f7   :  { %v1717_v54 = vpop.f32.mrb[46].mxu0 }
 0x3f8   :  { %v8329_v55 = vpop.f32.mrb[47].mxu0  ;;  %8555 = vmatpush3.bf16.msra.mxu1 %v8554_v12  ;;  %8593 = vmatpush3.bf16.msra.mxu0 %v8554_v12 }
 0x3f9   :  { %8557 = vmatprep.subr.bf16.mxu1 %v8556_v14  ;;  %8595 = vmatprep.subr.bf16.mxu0 %v8556_v14 }
 0x3fa   :  { %7267 = vmatmul.mubr.msk.bf16.gmra.mrb[20].mxu0 %vm468_vm3, %v1722_v52  ;;  %8355 = vmatmul.mubr.msk.bf16.gmra.mrb[20].mxu1 %vm468_vm3, %v1722_v52 }
 0x3fc   :  { %8559 = vmatpush3.bf16.msra.mxu1 %v8558_v17  ;;  %8597 = vmatpush3.bf16.msra.mxu0 %v8558_v17 }
 0x3fd   :  { %8561 = vmatprep.subr.bf16.mxu1 %v8560_v20  ;;  %8599 = vmatprep.subr.bf16.mxu0 %v8560_v20 }
 0x400   :  { %8563 = vmatpush3.bf16.msra.mxu1 %v8562_v23  ;;  %8601 = vmatpush3.bf16.msra.mxu0 %v8562_v23 }
 0x401   :  { %8565 = vmatprep.subr.bf16.mxu1 %v8564_v26  ;;  %8603 = vmatprep.subr.bf16.mxu0 %v8564_v26 }
 0x404   :  { %8567 = vmatpush3.bf16.msra.mxu1 %v8566_v29  ;;  %8605 = vmatpush3.bf16.msra.mxu0 %v8566_v29 }
 0x405   :  { %8569 = vmatprep.subr.bf16.mxu1 %v8568_v32  ;;  %8607 = vmatprep.subr.bf16.mxu0 %v8568_v32 }
 0x408   :  { %8571 = vmatpush3.bf16.msra.mxu1 %v8570_v37  ;;  %8609 = vmatpush3.bf16.msra.mxu0 %v8570_v37 }
 0x409   :  { %8572 = vmatprep.subr.bf16.mxu1 %v9494_v39 }
 0x4bd   :  { %v10365_v42 = vpop.f32.mrb[12].mxu0  ;;  %v10367_v43 = vpop.f32.mrb[12].mxu1 }
 0x4be   :  { %v10369_v45 = vpop.f32.mrb[13].mxu0  ;;  %v8348_v46 = vpop.f32.mrb[13].mxu1  ;;  %v2063_v47 = vmul.f32 %v10365_v42, %v10365_v42  ;;  %v2047_v48 = vsel %vm2046_vm4, %v10367_v43, 0.0  ;;  %v2065_v49 = vmul.f32 %v10367_v43, %v10367_v43 }
 0x4bf   :  { %v10377_v50 = vpop.f32.mrb[14].mxu0  ;;  %v10379_v51 = vpop.f32.mrb[14].mxu1  ;;  %v2064_v52 = vmul.f32 %v10369_v45, %v10369_v45 }
 0x4c0   :  { %v2024_v53 = vadd.f32 %v10377_v50, %v10365_v42  ;;  %v2066_v54 = vmul.f32 %v10377_v50, %v10377_v50  ;;  %v2048_v55 = vsel %vm2046_vm4, %v10379_v51, 0.0  ;;  %v10389_v56 = vpop.f32.mrb[15].mxu0  ;;  %v8349_v57 = vpop.f32.mrb[15].mxu1  ;;  %v2068_v59 = vmul.f32 %v10379_v51, %v10379_v51 }
 0x4c1   :  { %v2049_v58 = vadd.f32 %v2048_v55, %v2047_v48  ;;  %v2035_v60 = vadd.f32 %v10389_v56, %v10369_v45  ;;  %v2067_v61 = vmul.f32 %v10389_v56, %v10389_v56  ;;  %v2100_v63 = vsel %vm2046_vm4, %v2065_v49, 0.0 }
 0x4c2   :  { %v2078_v62 = vadd.f32 %v2066_v54, %v2063_v47  ;;  %v2101_v0 = vsel %vm2046_vm4, %v2068_v59, 0.0 }
 0x4c3   :  { %v2089_v2 = vadd.f32 %v2067_v61, %v2064_v52  ;;  %v2102_v3 = vadd.f32 %v2101_v0, %v2100_v63 }
 0x4c5   :  { %v10399_v4 = vpop.f32.mrb[16].mxu0  ;;  %v10401_v34 = vpop.f32.mrb[16].mxu1 }
 0x4c6   :  { %v2025_v5 = vadd.f32 %v2024_v53, %v10399_v4  ;;  %v2069_v6 = vmul.f32 %v10399_v4, %v10399_v4  ;;  %v2050_v36 = vsel %vm2046_vm4, %v10401_v34, 0.0  ;;  %v2071_v7 = vmul.f32 %v10401_v34, %v10401_v34  ;;  %v10410_v8 = vpop.f32.mrb[17].mxu0  ;;  %v8352_v9 = vpop.f32.mrb[17].mxu1 }
 0x4c7   :  { %v2051_v10 = vadd.f32 %v2050_v36, %v2049_v58  ;;  %v2036_v38 = vadd.f32 %v2035_v60, %v10410_v8  ;;  %v2070_v11 = vmul.f32 %v10410_v8, %v10410_v8  ;;  %v10415_v41 = vpop.f32.mrb[18].mxu0  ;;  %v10417_v12 = vpop.f32.mrb[18].mxu1 }
 0x4c8   :  { %v2079_v44 = vadd.f32 %v2078_v62, %v2069_v6  ;;  %v2103_v13 = vsel %vm2046_vm4, %v2071_v7, 0.0  ;;  %v2026_v14 = vadd.f32 %v2025_v5, %v10415_v41  ;;  %v2072_v15 = vmul.f32 %v10415_v41, %v10415_v41  ;;  %v10423_v16 = vpop.f32.mrb[19].mxu0  ;;  %v8353_v17 = vpop.f32.mrb[19].mxu1 }
 0x4c9   :  { %v2104_v18 = vadd.f32 %v2103_v13, %v2102_v3  ;;  %v2090_v19 = vadd.f32 %v2089_v2, %v2070_v11  ;;  %v2052_v20 = vsel %vm2046_vm4, %v10417_v12, 0.0  ;;  %v2074_v21 = vmul.f32 %v10417_v12, %v10417_v12 }
 0x4ca   :  { %v2080_v22 = vadd.f32 %v2079_v44, %v2072_v15  ;;  %v2053_v23 = vadd.f32 %v2052_v20, %v2051_v10  ;;  %v2037_v24 = vadd.f32 %v2036_v38, %v10423_v16  ;;  %v2073_v25 = vmul.f32 %v10423_v16, %v10423_v16 }
 0x4cb   :  { %v2105_v26 = vsel %vm2046_vm4, %v2074_v21, 0.0 }
 0x4cc   :  { %v2106_v27 = vadd.f32 %v2105_v26, %v2104_v18  ;;  %v2091_v28 = vadd.f32 %v2090_v19, %v2073_v25 }
 0x4cd   :  { %v10433_v29 = vpop.f32.mrb[20].mxu0  ;;  %v10435_v30 = vpop.f32.mrb[20].mxu1 }
 0x4ce   :  { %v2027_v31 = vsel %vm478_vm2, %v10433_v29, 0.0  ;;  %v2075_v32 = vmul.f32 %v10433_v29, %v10433_v29  ;;  %v2055_v33 = vsel %vm2054_vm5, %v10435_v30, 0.0  ;;  %v2077_v35 = vmul.f32 %v10435_v30, %v10435_v30  ;;  %v10445_v37 = vpop.f32.mrb[21].mxu0  ;;  %v8356_v46 = vpop.f32.mrb[21].mxu1 }
 0x4cf   :  { %v2028_v47 = vadd.f32 %v2027_v31, %v2026_v14  ;;  %v2056_v48 = vadd.f32 %v2055_v33, %v2053_v23  ;;  %v2038_v49 = vsel %vm478_vm2, %v10445_v37, 0.0  ;;  %v2076_v52 = vmul.f32 %v10445_v37, %v10445_v37  ;;  %v1950_v53 = vpop.f32.mrb[22].mxu0  ;;  %v2006_v54 = vpop.f32.mrb[22].mxu1  ;;  %v2148_v23 = vld [vmem:[%s12069_s23 + $0x108] sm:$0xff]  ;;  %v2149_v46 = vld [vmem:[%s12069_s23 + $0x110] sm:$0xff] }
 0x4d0   :  { %v2081_v55 = vsel %vm478_vm2, %v2075_v32, 0.0  ;;  %v2107_v57 = vsel %vm2054_vm5, %v2077_v35, 0.0  ;;  %v2039_v58 = vadd.f32 %v2038_v49, %v2037_v24  ;;  %v1951_v59 = vpop.f32.mrb[23].mxu0  ;;  %v8357_v60 = vpop.f32.mrb[23].mxu1 }
 0x4d1   :  { %v2029_v61 = vrot.slane %v2028_v47, 4  ;;  %v2082_v62 = vadd.f32 %v2081_v55, %v2080_v22  ;;  %v2057_v63 = vrot.slane %v2056_v48, 4  ;;  %v2108_v0 = vadd.f32 %v2107_v57, %v2106_v27  ;;  %v2147_v22 = vld [vmem:[%s12069_s23 + $0x100] sm:$0xff] }
 0x4d2   :  { %v2040_v2 = vrot.slane %v2039_v58, 4  ;;  %v2092_v3 = vsel %vm478_vm2, %v2076_v52, 0.0  ;;  %v8573_v27 = vpack.c.bf16 %v2148_v23, %v2147_v22 }
 0x4d3   :  { %v2030_v5 = vadd.f32 %v2029_v61, %v2028_v47  ;;  %v2083_v6 = vrot.slane %v2082_v62, 4  ;;  %v2093_v7 = vadd.f32 %v2092_v3, %v2091_v28  ;;  %v2058_v38 = vadd.f32 %v2057_v63, %v2056_v48  ;;  %v2150_v47 = vld [vmem:[%s12069_s23 + $0x118] sm:$0xff]  ;;  %v2450_v61 = vld [vmem:[%s12070_s1 + $0x8] sm:$0xff]  ;;  %v2449_v63 = vld [vmem:[%s12070_s1] sm:$0xff]  ;;  %s12071_s23 = sld [smem:[#allocation10_spill]] }
 0x4d4   :  { %v2041_v36 = vadd.f32 %v2040_v2, %v2039_v58  ;;  %v2109_v21 = vrot.slane %v2108_v0, 4  ;;  %v8576_v52 = vpack.c.bf16 %v2150_v47, %v2149_v46  ;;  %v2452_v2 = vld [vmem:[%s12070_s1 + $0x18] sm:$0xff]  ;;  %v2451_v3 = vld [vmem:[%s12070_s1 + $0x10] sm:$0xff] }
 0x4d5   :  { %v2031_v9 = vrot.slane %v2030_v5, 2  ;;  %v2084_v10 = vadd.f32 %v2083_v6, %v2082_v62  ;;  %v2094_v11 = vrot.slane %v2093_v7, 4  ;;  %v2059_v20 = vrot.slane %v2058_v38, 2  ;;  %v2453_v62 = vld [vmem:[%s12070_s1 + $0x20] sm:$0xff] }
 0x4d6   :  { %v2042_v44 = vrot.slane %v2041_v36, 2  ;;  %v2110_v35 = vadd.f32 %v2109_v21, %v2108_v0  ;;  %v8616_v0 = vpack.c.bf16 %v2453_v62, %v2450_v61  ;;  %v8618_v6 = vpack.c.bf16 %v2452_v2, %v2449_v63 }
 0x4d7   :  { %v2032_v13 = vadd.f32 %v2031_v9, %v2030_v5  ;;  %v2085_v14 = vrot.slane %v2084_v10, 2  ;;  %v2095_v17 = vadd.f32 %v2094_v11, %v2093_v7  ;;  %v2060_v33 = vadd.f32 %v2059_v20, %v2058_v38  ;;  %v2454_v5 = vld [vmem:[%s12070_s1 + $0x28] sm:$0xff] }
 0x4d8   :  { %v2043_v15 = vadd.f32 %v2042_v44, %v2041_v36  ;;  %v2111_v54 = vrot.slane %v2110_v35, 2  ;;  %v8621_v36 = vpack.c.bf16 %v2454_v5, %v2451_v3  ;;  %8617 = vmatprep.subr.bf16.mxu0 %v8616_v0 }
 0x4d9   :  { %v2033_v18 = vrot.slane %v2032_v13, 1  ;;  %v2086_v19 = vadd.f32 %v2085_v14, %v2084_v10  ;;  %v2096_v25 = vrot.slane %v2095_v17, 2  ;;  %v2061_v53 = vrot.slane %v2060_v33, 1 }
 0x4da   :  { %v2044_v24 = vrot.slane %v2043_v15, 1  ;;  %v2112_v58 = vadd.f32 %v2111_v54, %v2110_v35 }
 0x4db   :  { %v2097_v28 = vadd.f32 %v2096_v25, %v2095_v17  ;;  %v2034_v31 = vadd.f32 %v2033_v18, %v2032_v13  ;;  %v2087_v32 = vrot.slane %v2086_v19, 1  ;;  %v2062_v57 = vadd.f32 %v2061_v53, %v2060_v33  ;;  %v2442_v25 = vld [vmem:[%s12071_s23] sm:$0x1] }
 0x4dc   :  { %v2045_v26 = vadd.f32 %v2044_v24, %v2043_v15  ;;  %v2113_v59 = vrot.slane %v2112_v58, 1  ;;  %v2744_v33 = vlaneseq }
 0x4dd   :  { %v2098_v48 = vrot.slane %v2097_v28, 1  ;;  %v2088_v55 = vadd.f32 %v2087_v32, %v2086_v19 }
 0x4de   :  { %2218 = vmatprep.mubr.f32.mxu1 %v2045_v26  ;;  %v2114_v60 = vadd.f32 %v2113_v59, %v2112_v58  ;;  %v2745_v35 = vshrl.u32 %v2744_v33, 7 }
 0x4df   :  { %2219 = vmatmul.mubr.f32.vlgmr.msra.gmra.mrb[36].mxu1 %v2034_v31  ;;  %v2099_v49 = vadd.f32 %v2098_v48, %v2097_v28  ;;  %v2446_v28 = vld [vmem:[%s12072_s5] sm:$0x1] }
 0x4e0   :  { %8574 = vmatpush3.bf16.msra.mxu1 %v8573_v27  ;;  %8366 = vmatprep.mubr.msk.f32.mxu1 %vm9492_vm0, %v9491_v1  ;;  %v10511_v46 = vsub.s32 0, %v2745_v35 }
 0x4e1   :  { %8575 = vmatprep.subr.bf16.mxu1 %v9494_v39  ;;  %2363 = vmatprep.mubr.f32.mxu0 %v2099_v49 }
 0x4e2   :  { %2364 = vmatmul.mubr.f32.vlgmr.msra.gmra.mrb[48].mxu0 %v2088_v55 }
 0x4e3   :  { %2523 = vmatprep.mubr.f32.mxu0 %v9491_v1  ;;  %8619 = vmatpush1.bf16.msra.mxu0 %v8618_v6 }
 0x4e4   :  { %8577 = vmatpush3.bf16.msra.mxu1 %v8576_v52  ;;  %8624 = vmatprep.subr.bf16.mxu0 %v8616_v0 }
 0x4e5   :  { %8610 = vmatprep.subr.bf16.mxu1 %v9494_v39 }
 0x4e7   :  { %8367 = vmatmul.mubr.msk.f32.vlgmr.msra.gmra.mrb[38].mxu1 %vm2046_vm4, %v2062_v57 }
 0x4e8   :  { %8612 = vmatpush3.bf16.msra.mxu1 %v8573_v27  ;;  %8377 = vmatprep.mubr.msk.f32.mxu1 %vm9492_vm0, %v9491_v1 }
 0x4e9   :  { %8613 = vmatprep.subr.bf16.mxu1 %v9494_v39 }
 0x4ec   :  { %8615 = vmatpush3.bf16.msra.mxu1 %v8576_v52 }
 0x4ed   :  { %8620 = vmatprep.subr.bf16.mxu1 %v9494_v39 }
 0x4ef   :  { %8378 = vmatmul.mubr.msk.f32.vlgmr.msra.gmra.mrb[40].mxu1 %vm2046_vm4, %v2114_v60 }
 0x4f0   :  { %8384 = vmatprep.mubr.msk.f32.mxu1 %vm9492_vm0, %v9491_v1  ;;  %8622 = vmatpush3.bf16.msra.mxu1 %v8621_v36 }
 0x4f1   :  { %8627 = vmatprep.subr.bf16.mxu1 %v9494_v39 }
 0x5b2   :  { %v7992_v7 = vpop.f32.mrb[36].mxu1 }
 0x5b3   :  { %v7993_v9 = vpop.f32.mrb[37].mxu1 }
 0x5b4   :  { %v7994_v10 = vadd.f32 %v7993_v9, %v7992_v7 }
 0x5b5   :  { %v8032_v38 = vpop.f32.mrb[48].mxu0 }
 0x5b6   :  { %v8033_v11 = vpop.f32.mrb[49].mxu0 }
 0x5b7   :  { %v8034_v44 = vadd.f32 %v8033_v11, %v8032_v38 }
 0x5ba   :  { %v2290_v13 = vpop.f32.mrb[38].mxu1 }
 0x5bb   :  { %v2291_v14 = vadd.f32 %v7994_v10, %v2290_v13  ;;  %v8368_v15 = vpop.f32.mrb[39].mxu1 }
 0x5bd   :  { %v2295_v17 = vmul.f32 0.0015432099, %v2291_v14 }
 0x5bf   :  { %v2440_v21 = vmul.f32 %v2295_v17, %v2295_v17 }
 0x5c2   :  { %v2435_v18 = vpop.f32.mrb[40].mxu1 }
 0x5c3   :  { %v2436_v19 = vadd.f32 %v8034_v44, %v2435_v18  ;;  %v8379_v20 = vpop.f32.mrb[41].mxu1 }
 0x5c5   :  { %v2439_v22 = vmul.f32 0.0015432099, %v2436_v19 }
 0x5c7   :  { %v2441_v23 = vsub.f32 %v2439_v22, %v2440_v21 }
 0x5c9   :  { %v2443_v24 = vadd.f32 1e-05, %v2441_v23 }
 0x5cb   :  { %9452 = vrsqrt.f32 %v2443_v24 }
 0x5d5   :  { %v9453_v26 = vpop.eup %9452 }
 0x5d6   :  { %v2445_v27 = vmul.f32 %v9453_v26, %v2442_v25 }
 0x5d8   :  { %7273 = vmatmul.mubr.msk.f32.vlgmr.msra.gmra.mrb[50].mxu0 %vm2455_vm6, %v2445_v27  ;;  %8385 = vmatmul.mubr.msk.f32.vlgmr.msra.gmra.mrb[42].mxu1 %vm2455_vm6, %v2445_v27  ;;  %v2447_v31 = vmul.f32 %v2445_v27, %v2295_v17 }
 0x5d9   :  { %8626 = vmatpush1.bf16.msra.mxu0 %v8618_v6  ;;  %8629 = vmatpush3.bf16.msra.mxu1 %v8621_v36 }
 0x5da   :  { %2667 = vmatprep.mubr.f32.mxu0 %v9491_v1  ;;  %8391 = vmatprep.mubr.msk.f32.mxu1 %vm9492_vm0, %v9491_v1  ;;  %v2448_v32 = vsub.f32 %v2446_v28, %v2447_v31 }
 0x5db   :  { %8404 = vmatprep.subr.bf16.mxu1 %v9491_v1 }
 0x5dc   :  { %7275 = vmatmul.mubr.msk.f32.vlgmr.msra.gmra.mrb[52].mxu0 %vm2455_vm6, %v2448_v32  ;;  %8392 = vmatmul.mubr.msk.f32.vlgmr.msra.gmra.mrb[44].mxu1 %vm2455_vm6, %v2448_v32 }
 0x5dd   :  { %8410 = vmatprep.mubr.msk.bf16.mxu1 %vm9492_vm0, %v9491_v1  ;;  %2875 = vmatprep.mubr.bf16.mxu0 %v9493_v40 }
 0x6ab   :  { %v2525_v47 = vpop.f32.mrb[50].mxu0  ;;  %v2596_v48 = vpop.f32.mrb[42].mxu1 }
 0x6ac   :  { %v2747_v49 = vrot.slane %v2525_v47, %v10511_v46  ;;  %v2755_v52 = vrot.slane %v2596_v48, %v10511_v46  ;;  %v2527_v53 = vpop.f32.mrb[51].mxu0  ;;  %v8386_v54 = vpop.f32.mrb[43].mxu1 }
 0x6ad   :  { %v2751_v55 = vrot.slane %v2527_v53, %v10511_v46 }
 0x6ae   :  { %v2756_v57 = vmul.f32 %v2747_v49, %v10365_v42  ;;  %v2759_v58 = vmul.f32 %v2747_v49, %v10377_v50  ;;  %v2762_v59 = vmul.f32 %v2747_v49, %v10399_v4  ;;  %v2765_v60 = vmul.f32 %v2747_v49, %v10415_v41 }
 0x6af   :  { %v2758_v61 = vmul.f32 %v2755_v52, %v10367_v43  ;;  %v2761_v62 = vmul.f32 %v2755_v52, %v10379_v51  ;;  %v2764_v63 = vmul.f32 %v2755_v52, %v10401_v34  ;;  %v2767_v0 = vmul.f32 %v2755_v52, %v10417_v12  ;;  %v2669_v2 = vpop.f32.mrb[52].mxu0  ;;  %v2740_v3 = vpop.f32.mrb[44].mxu1 }
 0x6b0   :  { %v2757_v5 = vmul.f32 %v2751_v55, %v10369_v45  ;;  %v2760_v42 = vmul.f32 %v2751_v55, %v10389_v56  ;;  %v2763_v50 = vmul.f32 %v2751_v55, %v10410_v8  ;;  %v2766_v4 = vmul.f32 %v2751_v55, %v10423_v16  ;;  %v2671_v6 = vpop.f32.mrb[53].mxu0  ;;  %v8393_v41 = vpop.f32.mrb[45].mxu1 }
 0x6b1   :  { %v2769_v43 = vmul.f32 %v2751_v55, %v10445_v37  ;;  %v2774_v51 = vrot.slane %v2669_v2, %v10511_v46  ;;  %v2782_v34 = vrot.slane %v2740_v3, %v10511_v46  ;;  %v2778_v12 = vrot.slane %v2671_v6, %v10511_v46  ;;  %v9109_v2 = vld [vmem:[%s12039_s8 + $0x134] ss:$8 sps:$4 sm:$0xff]   ;;  %v9107_v3 = vld [vmem:[%s12039_s8 + $0x130] ss:$8 sps:$4 sm:$0xff]   ;;  %v9118_v41 = vld [vmem:[%s12039_s8 + $0x164] ss:$8 sps:$4 sm:$0xff]  }
 0x6b2   :  { %v2770_v36 = vmul.f32 %v2755_v52, %v10435_v30  ;;  %v2768_v45 = vmul.f32 %v2747_v49, %v10433_v29  ;;  %v9113_v6 = vld [vmem:[%s12039_s8 + $0x150] ss:$8 sps:$4 sm:$0xff]  }
 0x6b3   :  { %v2783_v7 = vadd.f32 %v2774_v51, %v2756_v57  ;;  %v2786_v56 = vadd.f32 %v2774_v51, %v2759_v58  ;;  %v2789_v9 = vadd.f32 %v2774_v51, %v2762_v59  ;;  %v2792_v8 = vadd.f32 %v2774_v51, %v2765_v60  ;;  %v9099_v59 = vld [vmem:[%s12038_s7 + $0x8] sm:$0x7f]  }
 0x6b4   :  { %v2785_v10 = vadd.f32 %v2782_v34, %v2758_v61  ;;  %v2788_v16 = vadd.f32 %v2782_v34, %v2761_v62  ;;  %v2791_v38 = vadd.f32 %v2782_v34, %v2764_v63  ;;  %v2794_v11 = vadd.f32 %v2782_v34, %v2767_v0  ;;  %v9100_v61 = vld [vmem:[%s12038_s7] sm:$0x7f]   ;;  %v9101_v62 = vld [vmem:[%s12038_s7 + $0x10] sm:$0x7f]  }
 0x6b5   :  { %v2798_v44 = vmax.f32 %v2783_v7, 0.0  ;;  %v2801_v37 = vmax.f32 %v2786_v56, 0.0  ;;  %v2804_v13 = vmax.f32 %v2789_v9, 0.0  ;;  %v2807_v14 = vmax.f32 %v2792_v8, 0.0  ;;  %v9106_v63 = vld [vmem:[%s12039_s8 + $0x124] ss:$8 sps:$4 sm:$0xff]  }
 0x6b6   :  { %v2800_v15 = vmax.f32 %v2785_v10, 0.0  ;;  %v2803_v17 = vmax.f32 %v2788_v16, 0.0  ;;  %v2806_v18 = vmax.f32 %v2791_v38, 0.0  ;;  %v2809_v19 = vmax.f32 %v2794_v11, 0.0  ;;  %v9104_v0 = vld [vmem:[%s12039_s8 + $0x120] ss:$8 sps:$4 sm:$0xff]  }
 0x6b7   :  { %v2784_v20 = vadd.f32 %v2778_v12, %v2757_v5  ;;  %v2787_v30 = vadd.f32 %v2778_v12, %v2760_v42  ;;  %v2790_v21 = vadd.f32 %v2778_v12, %v2763_v50  ;;  %v2793_v29 = vadd.f32 %v2778_v12, %v2766_v4  ;;  %v9112_v5 = vld [vmem:[%s12039_s8 + $0x144] ss:$8 sps:$4 sm:$0xff]   ;;  %v9102_v42 = vld [vmem:[%s12038_s7 + $0x18] sm:$0x7f]   ;;  %v9110_v50 = vld [vmem:[%s12039_s8 + $0x140] ss:$8 sps:$4 sm:$0xff]  }
 0x6b8   :  { %v10534_v22 = vpack.c.bf16 %v2803_v17, %v2800_v15  ;;  %v10536_v23 = vpack.c.bf16 %v2801_v37, %v2798_v44  ;;  %v10538_v24 = vpack.c.bf16 %v2809_v19, %v2806_v18  ;;  %v10540_v25 = vpack.c.bf16 %v2807_v14, %v2804_v13  ;;  %v9115_v4 = vld [vmem:[%s12039_s8 + $0x154] ss:$8 sps:$4 sm:$0xff]   ;;  %v9125_v7 = vld [vmem:[%s12039_s8 + $0x190] ss:$8 sps:$4 sm:$0xff]   ;;  %v9130_v56 = vld [vmem:[%s12039_s8 + $0x1a4] ss:$8 sps:$4 sm:$0xff]  }
 0x6b9   :  { %v2799_v26 = vmax.f32 %v2784_v20, 0.0  ;;  %v2802_v27 = vmax.f32 %v2787_v30, 0.0  ;;  %v2805_v28 = vmax.f32 %v2790_v21, 0.0  ;;  %v2808_v31 = vmax.f32 %v2793_v29, 0.0  ;;  %v9103_v9 = vld [vmem:[%s12038_s7 + $0x20] sm:$0x7f]  }
 0x6ba   :  { %8405 = vmatpush3.bf16.msra.mxu1 %v10534_v22  ;;  %v2796_v32 = vadd.f32 %v2778_v12, %v2769_v43  ;;  %v2797_v33 = vadd.f32 %v2782_v34, %v2770_v36  ;;  %v2795_v35 = vadd.f32 %v2774_v51, %v2768_v45  ;;  %v9116_v43 = vld [vmem:[%s12039_s8 + $0x160] ss:$8 sps:$4 sm:$0xff]   ;;  %v9121_v51 = vld [vmem:[%s12039_s8 + $0x174] ss:$8 sps:$4 sm:$0xff]   ;;  %v9119_v34 = vld [vmem:[%s12039_s8 + $0x170] ss:$8 sps:$4 sm:$0xff]  }
 0x6bb   :  { %v10543_v47 = vpack.c.bf16 %v2802_v27, %v2799_v26  ;;  %v10545_v48 = vpack.c.bf16 %v2808_v31, %v2805_v28  ;;  %8406 = vmatprep.subr.bf16.mxu1 %v9491_v1  ;;  %v9124_v12 = vld [vmem:[%s12039_s8 + $0x184] ss:$8 sps:$4 sm:$0xff]   ;;  %v9122_v36 = vld [vmem:[%s12039_s8 + $0x180] ss:$8 sps:$4 sm:$0xff]   ;;  %v9127_v45 = vld [vmem:[%s12039_s8 + $0x194] ss:$8 sps:$4 sm:$0xff]  }
 0x6bc   :  { %v2812_v49 = vmax.f32 %v2797_v33, 0.0  ;;  %v2811_v52 = vmax.f32 %v2796_v32, 0.0  ;;  %v2810_v53 = vmax.f32 %v2795_v35, 0.0  ;;  %v9128_v8 = vld [vmem:[%s12039_s8 + $0x1a0] ss:$8 sps:$4 sm:$0xff]  }
 0x6bd   :  { %2843 = vmatprep.subr.bf16.mxu0 %v10543_v47  ;;  %v9131_v10 = vld [vmem:[%s12039_s8 + $0x1b0] ss:$8 sps:$4 sm:$0xff]   ;;  %v9133_v16 = vld [vmem:[%s12039_s8 + $0x1b4] ss:$8 sps:$4 sm:$0xff]   ;;  %v9136_v38 = vld [vmem:[%s12039_s8 + $0x1c4] ss:$8 sps:$4 sm:$0xff]  }
 0x6be   :  { %2844 = vmatpush1.bf16.msra.mxu0 %v10536_v23  ;;  %8407 = vmatpush3.bf16.msra.mxu1 %v10538_v24  ;;  %v2821_v54 = vpack.c.bf16 %v2812_v49, %v2812_v49  ;;  %v10553_v55 = vpack.c.bf16 %v2811_v52, %v2811_v52  ;;  %v2819_v58 = vpack.c.bf16 %v2810_v53, %v2810_v53  ;;  %v9134_v11 = vld [vmem:[%s12039_s8 + $0x1c0] ss:$8 sps:$4 sm:$0xff]   ;;  %v9139_v44 = vld [vmem:[%s12039_s8 + $0x1d4] ss:$8 sps:$4 sm:$0xff]   ;;  %v9137_v37 = vld [vmem:[%s12039_s8 + $0x1d0] ss:$8 sps:$4 sm:$0xff]  }
 0x6bf   :  { %2845 = vmatprep.subr.bf16.mxu0 %v10545_v48  ;;  %8408 = vmatprep.subr.bf16.mxu1 %v9491_v1  ;;  %v9140_v13 = vld [vmem:[%s12039_s8 + $0x1e0] ss:$8 sps:$4 sm:$0xff]   ;;  %v9142_v14 = vld [vmem:[%s12039_s8 + $0x1e4] ss:$8 sps:$4 sm:$0xff]   ;;  %v9145_v15 = vld [vmem:[%s12039_s8 + $0x1f4] ss:$8 sps:$4 sm:$0xff]  }
 0x6c0   :  { %v10556_v57 = vsel %vm2833_vm7, %v2821_v54, 0  ;;  %v10567_v60 = vsel %vm2833_vm7, %v2819_v58, 0  ;;  %v9143_v17 = vld [vmem:[%s12039_s8 + $0x1f0] ss:$8 sps:$4 sm:$0xff]   ;;  %v9148_v18 = vld [vmem:[%s12039_s8 + $0x204] ss:$8 sps:$4 sm:$0xff]  }
 0x6c1   :  { %v9146_v19 = vld [vmem:[%s12039_s8 + $0x200] ss:$8 sps:$4 sm:$0xff]   ;;  %v9149_v20 = vld [vmem:[%s12039_s8 + $0x210] ss:$8 sps:$4 sm:$0xff]   ;;  %v9151_v30 = vld [vmem:[%s12039_s8 + $0x214] ss:$8 sps:$4 sm:$0xff]  }
 0x6c2   :  { %2846 = vmatpush1.bf16.msra.mxu0 %v10540_v25  ;;  %8409 = vmatpush3.bf16.msra.mxu1 %v10556_v57  ;;  %v9154_v21 = vld [vmem:[%s12039_s8 + $0x224] ss:$8 sps:$4 sm:$0xff]  }
 0x6c3   :  { %7278 = vmatprep.subr.msk.bf16.mxu0 %vm2833_vm7, %v10553_v55  ;;  %3650 = vmatprep.subr.bf16.mxu1 %v10543_v47 }
 0x6c5   :  { %8411 = vmatmul.mubr.msk.bf16.vlgmr.msra.gmra.mrb[48].mxu1 %vm2829_vm8, %v9099_v59 }
 0x6c6   :  { %2848 = vmatpush1.bf16.msra.mxu0 %v10567_v60  ;;  %3651 = vmatpush1.bf16.msra.mxu1 %v10536_v23 }
 0x6c7   :  { %8394 = vmatprep.subr.bf16.mxu0 %v9491_v1  ;;  %3652 = vmatprep.subr.bf16.mxu1 %v10545_v48 }
 0x6c8   :  { %3682 = vmatprep.mubr.bf16.mxu1 %v9493_v40 }
 0x6c9   :  { %7279 = vmatmul.mubr.msk.bf16.vlgmr.msra.gmra.mrb[56].mxu0 %vm2829_vm8, %v9100_v61 }
 0x6ca   :  { %8395 = vmatpush3.bf16.msra.mxu0 %v10534_v22  ;;  %3653 = vmatpush1.bf16.msra.mxu1 %v10540_v25 }
 0x6cb   :  { %8396 = vmatprep.subr.bf16.mxu0 %v9491_v1  ;;  %7400 = vmatprep.subr.msk.bf16.mxu1 %vm2833_vm7, %v10553_v55 }
 0x6cc   :  { %8400 = vmatprep.mubr.msk.bf16.mxu0 %vm9492_vm0, %v9491_v1 }
 0x6ce   :  { %8397 = vmatpush3.bf16.msra.mxu0 %v10538_v24  ;;  %3655 = vmatpush1.bf16.msra.mxu1 %v10567_v60 }
 0x6cf   :  { %8398 = vmatprep.subr.bf16.mxu0 %v9491_v1  ;;  %8414 = vmatprep.subr.bf16.mxu1 %v9491_v1 }
 0x6d1   :  { %7401 = vmatmul.mubr.msk.bf16.vlgmr.msra.gmra.mrb[52].mxu1 %vm2829_vm8, %v9101_v62 }
 0x6d2   :  { %8399 = vmatpush3.bf16.msra.mxu0 %v10556_v57  ;;  %8415 = vmatpush3.bf16.msra.mxu1 %v10534_v22 }
 0x6d3   :  { %2977 = vmatprep.subr.bf16.mxu0 %v10543_v47  ;;  %8416 = vmatprep.subr.bf16.mxu1 %v9491_v1 }
 0x6d4   :  { %8420 = vmatprep.mubr.msk.bf16.mxu1 %vm9492_vm0, %v9491_v1 }
 0x6d5   :  { %8401 = vmatmul.mubr.msk.bf16.vlgmr.msra.gmra.mrb[60].mxu0 %vm2829_vm8, %v9100_v61  ;;  %v9157_v61 = vld [vmem:[%s12039_s8 + $0x234] ss:$8 sps:$4 sm:$0xff]  }
 0x6d6   :  { %2978 = vmatpush1.bf16.msra.mxu0 %v10536_v23  ;;  %8417 = vmatpush3.bf16.msra.mxu1 %v10538_v24 }
 0x6d7   :  { %2979 = vmatprep.subr.bf16.mxu0 %v10545_v48  ;;  %8418 = vmatprep.subr.bf16.mxu1 %v9491_v1 }
 0x6d8   :  { %3009 = vmatprep.mubr.bf16.mxu0 %v9493_v40 }
 0x6da   :  { %2980 = vmatpush1.bf16.msra.mxu0 %v10540_v25  ;;  %8419 = vmatpush3.bf16.msra.mxu1 %v10556_v57 }
 0x6db   :  { %7284 = vmatprep.subr.msk.bf16.mxu0 %vm2833_vm7, %v10553_v55  ;;  %4058 = vmatprep.subr.bf16.mxu1 %v10543_v47 }
 0x6dd   :  { %8421 = vmatmul.mubr.msk.bf16.vlgmr.msra.gmra.mrb[56].mxu1 %vm2829_vm8, %v9101_v62  ;;  %v9155_v62 = vld [vmem:[%s12039_s8 + $0x230] ss:$8 sps:$4 sm:$0xff]  }
 0x6de   :  { %2982 = vmatpush1.bf16.msra.mxu0 %v10567_v60  ;;  %4059 = vmatpush1.bf16.msra.mxu1 %v10536_v23 }
 0x6df   :  { %4060 = vmatprep.subr.bf16.mxu1 %v10545_v48  ;;  %4090 = vmatprep.mubr.bf16.mxu1 %v9493_v40 }
 0x6e0   :  { %3284 = vmatprep.subr.bf16.mxu0 %v9106_v63  ;;  %v9160_v63 = vld [vmem:[%s12039_s8 + $0x4] ss:$8 sps:$4 sm:$0xff]  }
 0x6e1   :  { %7285 = vmatmul.mubr.msk.bf16.vlgmr.msra.gmra.mrb[64].mxu0 %vm2829_vm8, %v9099_v59 }
 0x6e2   :  { %4061 = vmatpush1.bf16.msra.mxu1 %v10540_v25  ;;  %3285 = vmatpush1.bf16.msra.mxu0 %v9104_v0  ;;  %v9158_v0 = vld [vmem:[%s12039_s8] ss:$8 sps:$4 sm:$0xff]  }
 0x6e3   :  { %7479 = vmatprep.subr.msk.bf16.mxu1 %vm2833_vm7, %v10553_v55  ;;  %3286 = vmatprep.subr.bf16.mxu0 %v9109_v2  ;;  %v9163_v2 = vld [vmem:[%s12039_s8 + $0x14] ss:$8 sps:$4 sm:$0xff]  }
 0x6e6   :  { %4063 = vmatpush1.bf16.msra.mxu1 %v10567_v60  ;;  %3287 = vmatpush1.bf16.msra.mxu0 %v9107_v3  ;;  %v9161_v3 = vld [vmem:[%s12039_s8 + $0x10] ss:$8 sps:$4 sm:$0xff]  }
 0x6e7   :  { %8424 = vmatprep.subr.bf16.mxu1 %v9491_v1  ;;  %3288 = vmatprep.subr.bf16.mxu0 %v9112_v5 }
 0x6e9   :  { %7480 = vmatmul.mubr.msk.bf16.vlgmr.msra.gmra.mrb[60].mxu1 %vm2829_vm8, %v9102_v42 }
 0x6ea   :  { %8425 = vmatpush3.bf16.msra.mxu1 %v10534_v22  ;;  %8430 = vmatprep.mubr.msk.bf16.mxu1 %vm9492_vm0, %v9491_v1 }
 0x6eb   :  { %8426 = vmatprep.subr.bf16.mxu1 %v9491_v1  ;;  %3289 = vmatpush1.bf16.msra.mxu0 %v9110_v50 }
 0x6ec   :  { %3290 = vmatprep.subr.bf16.mxu0 %v9115_v4 }
 0x6ee   :  { %8427 = vmatpush3.bf16.msra.mxu1 %v10538_v24 }
 0x6ef   :  { %8428 = vmatprep.subr.bf16.mxu1 %v9491_v1  ;;  %3291 = vmatpush1.bf16.msra.mxu0 %v9113_v6 }
 0x6f0   :  { %3292 = vmatprep.subr.bf16.mxu0 %v9118_v41 }
 0x6f2   :  { %8429 = vmatpush3.bf16.msra.mxu1 %v10556_v57 }
 0x6f3   :  { %4466 = vmatprep.subr.bf16.mxu1 %v10543_v47  ;;  %3293 = vmatpush1.bf16.msra.mxu0 %v9116_v43  ;;  %v9164_v43 = vld [vmem:[%s12039_s8 + $0x20] ss:$8 sps:$4 sm:$0xff]  }
 0x6f4   :  { %3294 = vmatprep.subr.bf16.mxu0 %v9121_v51 }
 0x6f5   :  { %8431 = vmatmul.mubr.msk.bf16.vlgmr.msra.gmra.mrb[64].mxu1 %vm2829_vm8, %v9102_v42  ;;  %v9166_v42 = vld [vmem:[%s12039_s8 + $0x24] ss:$8 sps:$4 sm:$0xff]  }
 0x6f6   :  { %4467 = vmatpush1.bf16.msra.mxu1 %v10536_v23  ;;  %4498 = vmatprep.mubr.bf16.mxu1 %v9493_v40 }
 0x6f7   :  { %4468 = vmatprep.subr.bf16.mxu1 %v10545_v48  ;;  %3295 = vmatpush1.bf16.msra.mxu0 %v9119_v34  ;;  %v9169_v34 = vld [vmem:[%s12039_s8 + $0x34] ss:$8 sps:$4 sm:$0xff]  }
 0x6f8   :  { %3296 = vmatprep.subr.bf16.mxu0 %v9124_v12  ;;  %v9167_v12 = vld [vmem:[%s12039_s8 + $0x30] ss:$8 sps:$4 sm:$0xff]  }
 0x6fa   :  { %4469 = vmatpush1.bf16.msra.mxu1 %v10540_v25 }
 0x6fb   :  { %7558 = vmatprep.subr.msk.bf16.mxu1 %vm2833_vm7, %v10553_v55  ;;  %3297 = vmatpush1.bf16.msra.mxu0 %v9122_v36  ;;  %v9172_v36 = vld [vmem:[%s12039_s8 + $0x44] ss:$8 sps:$4 sm:$0xff]  }
 0x6fc   :  { %3298 = vmatprep.subr.bf16.mxu0 %v9127_v45  ;;  %v9170_v45 = vld [vmem:[%s12039_s8 + $0x40] ss:$8 sps:$4 sm:$0xff]  }
 0x6fe   :  { %4471 = vmatpush1.bf16.msra.mxu1 %v10567_v60  ;;  %v9152_v60 = vld [vmem:[%s12039_s8 + $0x220] ss:$8 sps:$4 sm:$0xff]  }
 0x6ff   :  { %8434 = vmatprep.subr.bf16.mxu1 %v9491_v1  ;;  %3299 = vmatpush1.bf16.msra.mxu0 %v9125_v7 }
 0x700   :  { %3300 = vmatprep.subr.bf16.mxu0 %v9130_v56  ;;  %v9175_v56 = vld [vmem:[%s12039_s8 + $0x54] ss:$8 sps:$4 sm:$0xff]  }
 0x701   :  { %7559 = vmatmul.mubr.msk.bf16.vlgmr.msra.gmra.mrb[68].mxu1 %vm2829_vm8, %v9103_v9 }
 0x702   :  { %8435 = vmatpush3.bf16.msra.mxu1 %v10534_v22  ;;  %8440 = vmatprep.mubr.msk.bf16.mxu1 %vm9492_vm0, %v9491_v1 }
 0x703   :  { %8436 = vmatprep.subr.bf16.mxu1 %v9491_v1  ;;  %3301 = vmatpush1.bf16.msra.mxu0 %v9128_v8 }
 0x704   :  { %3302 = vmatprep.subr.bf16.mxu0 %v9133_v16 }
 0x706   :  { %8437 = vmatpush3.bf16.msra.mxu1 %v10538_v24 }
 0x707   :  { %8438 = vmatprep.subr.bf16.mxu1 %v9491_v1  ;;  %3303 = vmatpush1.bf16.msra.mxu0 %v9131_v10 }
 0x708   :  { %3304 = vmatprep.subr.bf16.mxu0 %v9136_v38  ;;  %v9173_v38 = vld [vmem:[%s12039_s8 + $0x50] ss:$8 sps:$4 sm:$0xff]  }
 0x70a   :  { %8439 = vmatpush3.bf16.msra.mxu1 %v10556_v57 }
 0x70b   :  { %8630 = vmatprep.subr.bf16.mxu1 %v9494_v39  ;;  %3305 = vmatpush1.bf16.msra.mxu0 %v9134_v11  ;;  %v9178_v11 = vld [vmem:[%s12039_s8 + $0x64] ss:$8 sps:$4 sm:$0xff]  }
 0x70c   :  { %3306 = vmatprep.subr.bf16.mxu0 %v9139_v44  ;;  %v9176_v44 = vld [vmem:[%s12039_s8 + $0x60] ss:$8 sps:$4 sm:$0xff]  }
 0x70d   :  { %8441 = vmatmul.mubr.msk.bf16.vlgmr.msra.gmra.mrb[72].mxu1 %vm2829_vm8, %v9103_v9 }
 0x70f   :  { %3307 = vmatpush1.bf16.msra.mxu0 %v9137_v37  ;;  %v9181_v37 = vld [vmem:[%s12039_s8 + $0x74] ss:$8 sps:$4 sm:$0xff]  }
 0x710   :  { %3308 = vmatprep.subr.bf16.mxu0 %v9142_v14  ;;  %v9184_v14 = vld [vmem:[%s12039_s8 + $0x84] ss:$8 sps:$4 sm:$0xff]  }
 0x713   :  { %3309 = vmatpush1.bf16.msra.mxu0 %v9140_v13  ;;  %v9179_v13 = vld [vmem:[%s12039_s8 + $0x70] ss:$8 sps:$4 sm:$0xff]  }
 0x714   :  { %3310 = vmatprep.subr.bf16.mxu0 %v9145_v15  ;;  %v9182_v15 = vld [vmem:[%s12039_s8 + $0x80] ss:$8 sps:$4 sm:$0xff]  }
 0x717   :  { %3311 = vmatpush1.bf16.msra.mxu0 %v9143_v17  ;;  %v9187_v17 = vld [vmem:[%s12039_s8 + $0x94] ss:$8 sps:$4 sm:$0xff]  }
 0x718   :  { %3312 = vmatprep.subr.bf16.mxu0 %v9148_v18  ;;  %v9185_v18 = vld [vmem:[%s12039_s8 + $0x90] ss:$8 sps:$4 sm:$0xff]  }
 0x71b   :  { %3313 = vmatpush1.bf16.msra.mxu0 %v9146_v19  ;;  %v9190_v19 = vld [vmem:[%s12039_s8 + $0xa4] ss:$8 sps:$4 sm:$0xff]  }
 0x71c   :  { %3314 = vmatprep.subr.bf16.mxu0 %v9151_v30  ;;  %v9193_v30 = vld [vmem:[%s12039_s8 + $0xb4] ss:$8 sps:$4 sm:$0xff]  }
 0x71f   :  { %3315 = vmatpush1.bf16.msra.mxu0 %v9149_v20  ;;  %v9188_v20 = vld [vmem:[%s12039_s8 + $0xa0] ss:$8 sps:$4 sm:$0xff]  }
 0x720   :  { %3327 = vmatprep.subr.bf16.mxu0 %v9154_v21  ;;  %v9191_v21 = vld [vmem:[%s12039_s8 + $0xb0] ss:$8 sps:$4 sm:$0xff]  }
 0x798   :  { %v3054_v29 = vpop.f32.mrb[48].mxu1 }
 0x799   :  { %v8412_v22 = vpop.f32.mrb[49].mxu1 }
 0x79a   :  { %v3057_v23 = vpop.f32.mrb[50].mxu1  ;;  %v9194_v22 = vld [vmem:[%s12039_s8 + $0xc0] ss:$8 sps:$4 sm:$0xff]  }
 0x79b   :  { %v3063_v24 = vpack.c.bf16 %v3057_v23, %v3054_v29  ;;  %v8413_v25 = vpop.f32.mrb[51].mxu1  ;;  %v9196_v29 = vld [vmem:[%s12039_s8 + $0xc4] ss:$8 sps:$4 sm:$0xff]   ;;  %v9199_v23 = vld [vmem:[%s12039_s8 + $0xd4] ss:$8 sps:$4 sm:$0xff]  }
 0x79c   :  { %v10755_v26 = vpop.f32.mrb[56].mxu0  ;;  %v9202_v25 = vld [vmem:[%s12039_s8 + $0xe4] ss:$8 sps:$4 sm:$0xff]  }
 0x79d   :  { %v2879_v27 = vpop.f32.mrb[57].mxu0 }
 0x79e   :  { %v10757_v28 = vpop.f32.mrb[58].mxu0 }
 0x79f   :  { %v2927_v31 = vpack.c.bf16 %v10757_v28, %v10755_v26  ;;  %v2883_v32 = vpop.f32.mrb[59].mxu0  ;;  %v9217_v26 = vld [vmem:[%s12039_s8 + $0x254] ss:$8 sps:$4 sm:$0xff]   ;;  %v9215_v28 = vld [vmem:[%s12039_s8 + $0x250] ss:$8 sps:$4 sm:$0xff]  }
 0x7a0   :  { %v2928_v33 = vpack.c.bf16 %v2883_v32, %v2879_v27  ;;  %v9200_v27 = vld [vmem:[%s12039_s8 + $0xe0] ss:$8 sps:$4 sm:$0xff]   ;;  %v9205_v32 = vld [vmem:[%s12039_s8 + $0xf4] ss:$8 sps:$4 sm:$0xff]  }
 0x7a4   :  { %v10790_v5 = vpop.f32.mrb[52].mxu1 }
 0x7a5   :  { %v10795_v50 = vpop.f32.mrb[53].mxu1 }
 0x7a6   :  { %v10797_v4 = vpop.f32.mrb[54].mxu1 }
 0x7a7   :  { %v3734_v6 = vpack.c.bf16 %v10797_v4, %v10790_v5  ;;  %v10801_v41 = vpop.f32.mrb[55].mxu1  ;;  %v9271_v5 = vld [vmem:[%s12039_s8 + $0x374] ss:$8 sps:$4 sm:$0xff]   ;;  %v9269_v4 = vld [vmem:[%s12039_s8 + $0x370] ss:$8 sps:$4 sm:$0xff]  }
 0x7a8   :  { %v10761_v35 = vpop.f32.mrb[60].mxu0  ;;  %v3735_v51 = vpack.c.bf16 %v10801_v41, %v10795_v50 }
 0x7a9   :  { %v8402_v47 = vpop.f32.mrb[61].mxu0 }
 0x7aa   :  { %v10763_v48 = vpop.f32.mrb[62].mxu0  ;;  %v9208_v47 = vld [vmem:[%s12039_s8 + $0x104] ss:$8 sps:$4 sm:$0xff]  }
 0x7ab   :  { %v2929_v49 = vpack.c.bf16 %v10763_v48, %v10761_v35  ;;  %v8403_v52 = vpop.f32.mrb[63].mxu0 }
 0x7ac   :  { %v9206_v52 = vld [vmem:[%s12039_s8 + $0x100] ss:$8 sps:$4 sm:$0xff]  }
 0x7b0   :  { %v10820_v7 = vpop.f32.mrb[56].mxu1 }
 0x7b1   :  { %v8422_v9 = vpop.f32.mrb[57].mxu1 }
 0x7b2   :  { %v10825_v8 = vpop.f32.mrb[58].mxu1  ;;  %v9238_v9 = vld [vmem:[%s12039_s8 + $0x2c4] ss:$8 sps:$4 sm:$0xff]  }
 0x7b3   :  { %v3736_v10 = vpack.c.bf16 %v10825_v8, %v10820_v7  ;;  %v8423_v16 = vpop.f32.mrb[59].mxu1 }
 0x7b4   :  { %v3011_v53 = vpop.f32.mrb[64].mxu0  ;;  %v9236_v16 = vld [vmem:[%s12039_s8 + $0x2c0] ss:$8 sps:$4 sm:$0xff]  }
 0x7b5   :  { %v3013_v54 = vpop.f32.mrb[65].mxu0 }
 0x7b6   :  { %v3015_v55 = vpop.f32.mrb[66].mxu0 }
 0x7b7   :  { %v3061_v57 = vpack.c.bf16 %v3015_v55, %v3011_v53  ;;  %v3017_v58 = vpop.f32.mrb[67].mxu0  ;;  %v9211_v53 = vld [vmem:[%s12039_s8 + $0x114] ss:$8 sps:$4 sm:$0xff]   ;;  %v9214_v55 = vld [vmem:[%s12039_s8 + $0x244] ss:$8 sps:$4 sm:$0xff]  }
 0x7b8   :  { %v3062_v59 = vpack.c.bf16 %v3017_v58, %v3013_v54  ;;  %v9209_v54 = vld [vmem:[%s12039_s8 + $0x110] ss:$8 sps:$4 sm:$0xff]   ;;  %v9220_v58 = vld [vmem:[%s12039_s8 + $0x264] ss:$8 sps:$4 sm:$0xff]  }
 0x7ba   :  { %3316 = vmatprep.mubr.bf16.mxu0 %v3062_v59 }
 0x7bb   :  { %3317 = vmatmul.mubr.bf16.vlgmr.msra.gmra.mrb[68].mxu0 %v3061_v57  ;;  %v9212_v57 = vld [vmem:[%s12039_s8 + $0x240] ss:$8 sps:$4 sm:$0xff]  }
 0x7bc   :  { %3328 = vmatpush1.bf16.msra.mxu0 %v9152_v60  ;;  %3359 = vmatprep.mubr.bf16.mxu0 %v9493_v40  ;;  %v9218_v60 = vld [vmem:[%s12039_s8 + $0x260] ss:$8 sps:$4 sm:$0xff]  }
 0x7bd   :  { %3329 = vmatprep.subr.bf16.mxu0 %v9157_v61 }
 0x7c0   :  { %3330 = vmatpush1.bf16.msra.mxu0 %v9155_v62  ;;  %v9223_v62 = vld [vmem:[%s12039_s8 + $0x274] ss:$8 sps:$4 sm:$0xff]  }
 0x7c1   :  { %3553 = vmatprep.subr.bf16.mxu0 %v9160_v63  ;;  %v9221_v63 = vld [vmem:[%s12039_s8 + $0x270] ss:$8 sps:$4 sm:$0xff]  }
 0x7c7   :  { %7359 = vmatmul.mubr.msk.bf16.vlgmr.msra.gmra.mrb[68].mxu0 %vm2046_vm4, %v3063_v24  ;;  %v9197_v24 = vld [vmem:[%s12039_s8 + $0xd0] ss:$8 sps:$4 sm:$0xff]  }
 0x7c8   :  { %3554 = vmatpush1.bf16.msra.mxu0 %v9158_v0  ;;  %3585 = vmatprep.mubr.bf16.mxu0 %v2928_v33  ;;  %v9203_v33 = vld [vmem:[%s12039_s8 + $0xf0] ss:$8 sps:$4 sm:$0xff]   ;;  %v9226_v0 = vld [vmem:[%s12039_s8 + $0x284] ss:$8 sps:$4 sm:$0xff]  }
 0x7c9   :  { %3555 = vmatprep.subr.bf16.mxu0 %v9163_v2  ;;  %v9224_v2 = vld [vmem:[%s12039_s8 + $0x280] ss:$8 sps:$4 sm:$0xff]  }
 0x7cc   :  { %3556 = vmatpush1.bf16.msra.mxu0 %v9161_v3 }
 0x7cd   :  { %3557 = vmatprep.subr.bf16.mxu0 %v9166_v42  ;;  %v9229_v42 = vld [vmem:[%s12039_s8 + $0x294] ss:$8 sps:$4 sm:$0xff]  }
 0x7d0   :  { %3558 = vmatpush1.bf16.msra.mxu0 %v9164_v43 }
 0x7d1   :  { %3559 = vmatprep.subr.bf16.mxu0 %v9169_v34  ;;  %v9227_v34 = vld [vmem:[%s12039_s8 + $0x290] ss:$8 sps:$4 sm:$0xff]  }
 0x7d4   :  { %3560 = vmatpush1.bf16.msra.mxu0 %v9167_v12  ;;  %v9232_v12 = vld [vmem:[%s12039_s8 + $0x2a4] ss:$8 sps:$4 sm:$0xff]  }
 0x7d5   :  { %3561 = vmatprep.subr.bf16.mxu0 %v9172_v36  ;;  %v9230_v36 = vld [vmem:[%s12039_s8 + $0x2a0] ss:$8 sps:$4 sm:$0xff]  }
 0x7d8   :  { %3562 = vmatpush1.bf16.msra.mxu0 %v9170_v45  ;;  %v9235_v45 = vld [vmem:[%s12039_s8 + $0x2b4] ss:$8 sps:$4 sm:$0xff]  }
 0x7d9   :  { %3563 = vmatprep.subr.bf16.mxu0 %v9175_v56  ;;  %v9233_v56 = vld [vmem:[%s12039_s8 + $0x2b0] ss:$8 sps:$4 sm:$0xff]  }
 0x7dc   :  { %3564 = vmatpush1.bf16.msra.mxu0 %v9173_v38  ;;  %v9241_v38 = vld [vmem:[%s12039_s8 + $0x2d4] ss:$8 sps:$4 sm:$0xff]  }
 0x7dd   :  { %3565 = vmatprep.subr.bf16.mxu0 %v9178_v11  ;;  %v9239_v11 = vld [vmem:[%s12039_s8 + $0x2d0] ss:$8 sps:$4 sm:$0xff]  }
 0x7e0   :  { %3566 = vmatpush1.bf16.msra.mxu0 %v9176_v44  ;;  %v9244_v44 = vld [vmem:[%s12039_s8 + $0x2e4] ss:$8 sps:$4 sm:$0xff]  }
 0x7e1   :  { %3567 = vmatprep.subr.bf16.mxu0 %v9181_v37  ;;  %v9242_v37 = vld [vmem:[%s12039_s8 + $0x2e0] ss:$8 sps:$4 sm:$0xff]  }
 0x7e4   :  { %3568 = vmatpush1.bf16.msra.mxu0 %v9179_v13  ;;  %v9247_v13 = vld [vmem:[%s12039_s8 + $0x2f4] ss:$8 sps:$4 sm:$0xff]  }
 0x7e5   :  { %3569 = vmatprep.subr.bf16.mxu0 %v9184_v14  ;;  %v9245_v14 = vld [vmem:[%s12039_s8 + $0x2f0] ss:$8 sps:$4 sm:$0xff]  }
 0x7e8   :  { %3570 = vmatpush1.bf16.msra.mxu0 %v9182_v15  ;;  %v9250_v15 = vld [vmem:[%s12039_s8 + $0x304] ss:$8 sps:$4 sm:$0xff]  }
 0x7e9   :  { %3571 = vmatprep.subr.bf16.mxu0 %v9187_v17  ;;  %v9248_v17 = vld [vmem:[%s12039_s8 + $0x300] ss:$8 sps:$4 sm:$0xff]  }
 0x7ec   :  { %3572 = vmatpush1.bf16.msra.mxu0 %v9185_v18  ;;  %v9253_v18 = vld [vmem:[%s12039_s8 + $0x314] ss:$8 sps:$4 sm:$0xff]  }
 0x7ed   :  { %3573 = vmatprep.subr.bf16.mxu0 %v9190_v19  ;;  %v9251_v19 = vld [vmem:[%s12039_s8 + $0x310] ss:$8 sps:$4 sm:$0xff]  }
 0x7f0   :  { %3574 = vmatpush1.bf16.msra.mxu0 %v9188_v20  ;;  %v9256_v20 = vld [vmem:[%s12039_s8 + $0x324] ss:$8 sps:$4 sm:$0xff]  }
 0x7f1   :  { %3575 = vmatprep.subr.bf16.mxu0 %v9193_v30  ;;  %v9254_v30 = vld [vmem:[%s12039_s8 + $0x320] ss:$8 sps:$4 sm:$0xff]  }
 0x7f4   :  { %3576 = vmatpush1.bf16.msra.mxu0 %v9191_v21  ;;  %v9259_v21 = vld [vmem:[%s12039_s8 + $0x334] ss:$8 sps:$4 sm:$0xff]  }
 0x7f5   :  { %3577 = vmatprep.subr.bf16.mxu0 %v9196_v29  ;;  %v9257_v29 = vld [vmem:[%s12039_s8 + $0x330] ss:$8 sps:$4 sm:$0xff]  }
 0x7f8   :  { %3578 = vmatpush1.bf16.msra.mxu0 %v9194_v22  ;;  %v9262_v22 = vld [vmem:[%s12039_s8 + $0x344] ss:$8 sps:$4 sm:$0xff]  }
 0x7f9   :  { %3579 = vmatprep.subr.bf16.mxu0 %v9199_v23  ;;  %v9260_v23 = vld [vmem:[%s12039_s8 + $0x340] ss:$8 sps:$4 sm:$0xff]  }
 0x7fc   :  { %3580 = vmatpush1.bf16.msra.mxu0 %v9197_v24  ;;  %v9265_v24 = vld [vmem:[%s12039_s8 + $0x354] ss:$8 sps:$4 sm:$0xff]  }
 0x7fd   :  { %3581 = vmatprep.subr.bf16.mxu0 %v9202_v25  ;;  %v9263_v25 = vld [vmem:[%s12039_s8 + $0x350] ss:$8 sps:$4 sm:$0xff]  }
 0x800   :  { %3582 = vmatpush1.bf16.msra.mxu0 %v9200_v27  ;;  %v9268_v27 = vld [vmem:[%s12039_s8 + $0x364] ss:$8 sps:$4 sm:$0xff]  }
 0x801   :  { %3583 = vmatprep.subr.bf16.mxu0 %v9205_v32  ;;  %v9266_v32 = vld [vmem:[%s12039_s8 + $0x360] ss:$8 sps:$4 sm:$0xff]  }
 0x804   :  { %3584 = vmatpush1.bf16.msra.mxu0 %v9203_v33  ;;  %v9274_v33 = vld [vmem:[%s12039_s8 + $0x384] ss:$8 sps:$4 sm:$0xff]  }
 0x805   :  { %3596 = vmatprep.subr.bf16.mxu0 %v9208_v47 }
 0x807   :  { %3586 = vmatmul.mubr.bf16.vlgmr.msra.gmra.mrb[68].mxu0 %v2927_v31  ;;  %v10927_v31 = vpop.f32.mrb[60].mxu1 }
 0x808   :  { %3597 = vmatpush1.bf16.msra.mxu0 %v9206_v52  ;;  %3628 = vmatprep.mubr.bf16.mxu0 %v9493_v40  ;;  %v10932_v59 = vpop.f32.mrb[61].mxu1  ;;  %v9272_v52 = vld [vmem:[%s12039_s8 + $0x380] ss:$8 sps:$4 sm:$0xff]  }
 0x809   :  { %3598 = vmatprep.subr.bf16.mxu0 %v9211_v53  ;;  %v10934_v35 = vpop.f32.mrb[62].mxu1 }
 0x80a   :  { %v4142_v48 = vpack.c.bf16 %v10934_v35, %v10927_v31  ;;  %v9325_v31 = vld [vmem:[%s12039_s8 + $0x494] ss:$8 sps:$4 sm:$0xff]   ;;  %v9323_v35 = vld [vmem:[%s12039_s8 + $0x490] ss:$8 sps:$4 sm:$0xff]  }
 0x80c   :  { %3599 = vmatpush1.bf16.msra.mxu0 %v9209_v54  ;;  %v9277_v54 = vld [vmem:[%s12039_s8 + $0x394] ss:$8 sps:$4 sm:$0xff]  }
 0x80d   :  { %3957 = vmatprep.subr.bf16.mxu0 %v9214_v55  ;;  %v9275_v55 = vld [vmem:[%s12039_s8 + $0x390] ss:$8 sps:$4 sm:$0xff]  }
 0x813   :  { %7396 = vmatmul.mubr.msk.bf16.vlgmr.msra.gmra.mrb[68].mxu0 %vm2046_vm4, %v2929_v49  ;;  %v10938_v49 = vpop.f32.mrb[63].mxu1 }
 0x814   :  { %3958 = vmatpush1.bf16.msra.mxu0 %v9212_v57  ;;  %3989 = vmatprep.mubr.bf16.mxu0 %v3735_v51  ;;  %v4143_v61 = vpack.c.bf16 %v10938_v49, %v10932_v59  ;;  %v10957_v3 = vpop.f32.mrb[64].mxu1  ;;  %v9280_v57 = vld [vmem:[%s12039_s8 + $0x3a4] ss:$8 sps:$4 sm:$0xff]  }
 0x815   :  { %3959 = vmatprep.subr.bf16.mxu0 %v9217_v26  ;;  %v8432_v50 = vpop.f32.mrb[65].mxu1  ;;  %v9278_v26 = vld [vmem:[%s12039_s8 + $0x3a0] ss:$8 sps:$4 sm:$0xff]  }
 0x816   :  { %v10962_v41 = vpop.f32.mrb[66].mxu1  ;;  %v4905_v50 = vld [vmem:[%s12040_s9 + $0x8] sm:$0xff] }
 0x817   :  { %v4144_v43 = vpack.c.bf16 %v10962_v41, %v10957_v3  ;;  %v8433_v51 = vpop.f32.mrb[67].mxu1  ;;  %v9326_v3 = vld [vmem:[%s12039_s8 + $0x4a0] ss:$8 sps:$4 sm:$0xff]   ;;  %v9331_v41 = vld [vmem:[%s12039_s8 + $0x4b4] ss:$8 sps:$4 sm:$0xff]  }
 0x818   :  { %3960 = vmatpush1.bf16.msra.mxu0 %v9215_v28  ;;  %v4906_v51 = vld [vmem:[%s12040_s9 + $0x10] sm:$0xff] }
 0x819   :  { %3961 = vmatprep.subr.bf16.mxu0 %v9220_v58  ;;  %v9283_v58 = vld [vmem:[%s12039_s8 + $0x3b4] ss:$8 sps:$4 sm:$0xff]  }
 0x81c   :  { %3962 = vmatpush1.bf16.msra.mxu0 %v9218_v60 }
 0x81d   :  { %3963 = vmatprep.subr.bf16.mxu0 %v9223_v62  ;;  %v9281_v62 = vld [vmem:[%s12039_s8 + $0x3b0] ss:$8 sps:$4 sm:$0xff]  }
 0x820   :  { %3964 = vmatpush1.bf16.msra.mxu0 %v9221_v63  ;;  %v9286_v63 = vld [vmem:[%s12039_s8 + $0x3c4] ss:$8 sps:$4 sm:$0xff]  }
 0x821   :  { %3965 = vmatprep.subr.bf16.mxu0 %v9226_v0  ;;  %v9284_v0 = vld [vmem:[%s12039_s8 + $0x3c0] ss:$8 sps:$4 sm:$0xff]  }
 0x824   :  { %3966 = vmatpush1.bf16.msra.mxu0 %v9224_v2  ;;  %v9289_v2 = vld [vmem:[%s12039_s8 + $0x3d4] ss:$8 sps:$4 sm:$0xff]  }
 0x825   :  { %3967 = vmatprep.subr.bf16.mxu0 %v9229_v42  ;;  %v4904_v42 = vld [vmem:[%s12040_s9] sm:$0xff] }
 0x828   :  { %3968 = vmatpush1.bf16.msra.mxu0 %v9227_v34  ;;  %v9287_v34 = vld [vmem:[%s12039_s8 + $0x3d0] ss:$8 sps:$4 sm:$0xff]  }
 0x829   :  { %3969 = vmatprep.subr.bf16.mxu0 %v9232_v12  ;;  %v11127_v12 = vpack.c.bf16 %v4905_v50, %v4904_v42  ;;  %v9314_v42 = vld [vmem:[%s12039_s8 + $0x460] ss:$8 sps:$4 sm:$0xff]   ;;  %v9319_v50 = vld [vmem:[%s12039_s8 + $0x474] ss:$8 sps:$4 sm:$0xff]  }
 0x82b   :  { %8632 = vmatpush1.bf16.msra.mxu1 %v11127_v12 }
 0x82c   :  { %3970 = vmatpush1.bf16.msra.mxu0 %v9230_v36  ;;  %v4907_v36 = vld [vmem:[%s12040_s9 + $0x18] sm:$0xff]  ;;  %8633 = vmatprep.subr.bf16.mxu1 %v9494_v39 }
 0x82d   :  { %3971 = vmatprep.subr.bf16.mxu0 %v9235_v45  ;;  %v9292_v45 = vld [vmem:[%s12039_s8 + $0x3e4] ss:$8 sps:$4 sm:$0xff]  }
 0x830   :  { %3972 = vmatpush1.bf16.msra.mxu0 %v9233_v56  ;;  %v11136_v56 = vpack.c.bf16 %v4907_v36, %v4906_v51  ;;  %v9317_v51 = vld [vmem:[%s12039_s8 + $0x470] ss:$8 sps:$4 sm:$0xff]   ;;  %v9320_v36 = vld [vmem:[%s12039_s8 + $0x480] ss:$8 sps:$4 sm:$0xff]  }
 0x831   :  { %3973 = vmatprep.subr.bf16.mxu0 %v9238_v9  ;;  %v4908_v9 = vld [vmem:[%s12040_s9 + $0x20] sm:$0xff] }
 0x832   :  { %8635 = vmatpush1.bf16.msra.mxu1 %v11136_v56 }
 0x833   :  { %8636 = vmatprep.subr.bf16.mxu1 %v9494_v39 }
 0x834   :  { %3974 = vmatpush1.bf16.msra.mxu0 %v9236_v16  ;;  %v4909_v16 = vld [vmem:[%s12040_s9 + $0x28] sm:$0xff] }
 0x835   :  { %3975 = vmatprep.subr.bf16.mxu0 %v9241_v38  ;;  %v9290_v38 = vld [vmem:[%s12039_s8 + $0x3e0] ss:$8 sps:$4 sm:$0xff]  }
 0x838   :  { %3976 = vmatpush1.bf16.msra.mxu0 %v9239_v11  ;;  %v9295_v11 = vld [vmem:[%s12039_s8 + $0x3f4] ss:$8 sps:$4 sm:$0xff]  }
 0x839   :  { %3977 = vmatprep.subr.bf16.mxu0 %v9244_v44  ;;  %v11152_v44 = vpack.c.bf16 %v4909_v16, %v4908_v9  ;;  %v9340_v9 = vld [vmem:[%s12039_s8 + $0x4e4] ss:$8 sps:$4 sm:$0xff]   ;;  %v9338_v16 = vld [vmem:[%s12039_s8 + $0x4e0] ss:$8 sps:$4 sm:$0xff]  }
 0x83b   :  { %8638 = vmatpush1.bf16.msra.mxu1 %v11152_v44 }
 0x83c   :  { %3978 = vmatpush1.bf16.msra.mxu0 %v9242_v37  ;;  %v4910_v37 = vld [vmem:[%s12040_s9 + $0x30] sm:$0xff]  ;;  %8639 = vmatprep.subr.bf16.mxu1 %v9494_v39 }
 0x83d   :  { %3979 = vmatprep.subr.bf16.mxu0 %v9247_v13  ;;  %v4911_v13 = vld [vmem:[%s12040_s9 + $0x38] sm:$0xff] }
 0x840   :  { %3980 = vmatpush1.bf16.msra.mxu0 %v9245_v14  ;;  %v9293_v14 = vld [vmem:[%s12039_s8 + $0x3f0] ss:$8 sps:$4 sm:$0xff]  }
 0x841   :  { %3981 = vmatprep.subr.bf16.mxu0 %v9250_v15  ;;  %v9298_v15 = vld [vmem:[%s12039_s8 + $0x404] ss:$8 sps:$4 sm:$0xff]  }
 0x844   :  { %3982 = vmatpush1.bf16.msra.mxu0 %v9248_v17  ;;  %v11168_v17 = vpack.c.bf16 %v4911_v13, %v4910_v37  ;;  %v9346_v37 = vld [vmem:[%s12039_s8 + $0x504] ss:$8 sps:$4 sm:$0xff]   ;;  %v9344_v13 = vld [vmem:[%s12039_s8 + $0x500] ss:$8 sps:$4 sm:$0xff]  }
 0x845   :  { %3983 = vmatprep.subr.bf16.mxu0 %v9253_v18  ;;  %v4912_v18 = vld [vmem:[%s12040_s9 + $0x40] sm:$0xff] }
 0x846   :  { %8641 = vmatpush1.bf16.msra.mxu1 %v11168_v17 }
 0x847   :  { %8642 = vmatprep.subr.bf16.mxu1 %v9494_v39 }
 0x848   :  { %3984 = vmatpush1.bf16.msra.mxu0 %v9251_v19  ;;  %v4913_v19 = vld [vmem:[%s12040_s9 + $0x48] sm:$0xff] }
 0x849   :  { %3985 = vmatprep.subr.bf16.mxu0 %v9256_v20  ;;  %v9296_v20 = vld [vmem:[%s12039_s8 + $0x400] ss:$8 sps:$4 sm:$0xff]  }
 0x84c   :  { %3986 = vmatpush1.bf16.msra.mxu0 %v9254_v30  ;;  %v9301_v30 = vld [vmem:[%s12039_s8 + $0x414] ss:$8 sps:$4 sm:$0xff]  }
 0x84d   :  { %3987 = vmatprep.subr.bf16.mxu0 %v9259_v21  ;;  %v11184_v21 = vpack.c.bf16 %v4913_v19, %v4912_v18  ;;  %v9352_v18 = vld [vmem:[%s12039_s8 + $0x524] ss:$8 sps:$4 sm:$0xff]   ;;  %v9350_v19 = vld [vmem:[%s12039_s8 + $0x520] ss:$8 sps:$4 sm:$0xff]  }
 0x84f   :  { %8644 = vmatpush1.bf16.msra.mxu1 %v11184_v21 }
 0x850   :  { %3988 = vmatpush1.bf16.msra.mxu0 %v9257_v29  ;;  %v4914_v29 = vld [vmem:[%s12040_s9 + $0x50] sm:$0xff]  ;;  %8645 = vmatprep.subr.bf16.mxu1 %v9494_v39 }
 0x851   :  { %4000 = vmatprep.subr.bf16.mxu0 %v9262_v22  ;;  %v4915_v22 = vld [vmem:[%s12040_s9 + $0x58] sm:$0xff] }
 0x853   :  { %3990 = vmatmul.mubr.bf16.vlgmr.msra.gmra.mrb[68].mxu0 %v3734_v6  ;;  %v11064_v6 = vpop.f32.mrb[68].mxu1 }
 0x854   :  { %4001 = vmatpush1.bf16.msra.mxu0 %v9260_v23  ;;  %4032 = vmatprep.mubr.bf16.mxu0 %v9493_v40  ;;  %v11069_v47 = vpop.f32.mrb[69].mxu1  ;;  %v9299_v23 = vld [vmem:[%s12039_s8 + $0x410] ss:$8 sps:$4 sm:$0xff]  }
 0x855   :  { %4002 = vmatprep.subr.bf16.mxu0 %v9265_v24  ;;  %v11071_v7 = vpop.f32.mrb[70].mxu1  ;;  %v9304_v24 = vld [vmem:[%s12039_s8 + $0x424] ss:$8 sps:$4 sm:$0xff]  }
 0x856   :  { %v4550_v8 = vpack.c.bf16 %v11071_v7, %v11064_v6  ;;  %v4922_v6 = vld [vmem:[%s12040_s9 + $0x90] sm:$0xff]  ;;  %v4923_v7 = vld [vmem:[%s12040_s9 + $0x98] sm:$0xff] }
 0x858   :  { %4003 = vmatpush1.bf16.msra.mxu0 %v9263_v25  ;;  %v11200_v25 = vpack.c.bf16 %v4915_v22, %v4914_v29  ;;  %v9358_v29 = vld [vmem:[%s12039_s8 + $0x544] ss:$8 sps:$4 sm:$0xff]   ;;  %v9356_v22 = vld [vmem:[%s12039_s8 + $0x540] ss:$8 sps:$4 sm:$0xff]  }
 0x859   :  { %4365 = vmatprep.subr.bf16.mxu0 %v9268_v27  ;;  %v4916_v27 = vld [vmem:[%s12040_s9 + $0x60] sm:$0xff] }
 0x85a   :  { %8647 = vmatpush1.bf16.msra.mxu1 %v11200_v25 }
 0x85b   :  { %8648 = vmatprep.subr.bf16.mxu1 %v9494_v39 }
 0x85f   :  { %7475 = vmatmul.mubr.msk.bf16.vlgmr.msra.gmra.mrb[68].mxu0 %vm2046_vm4, %v3736_v10  ;;  %v11075_v10 = vpop.f32.mrb[71].mxu1 }
 0x860   :  { %4366 = vmatpush1.bf16.msra.mxu0 %v9266_v32  ;;  %4397 = vmatprep.mubr.bf16.mxu0 %v4143_v61  ;;  %v4551_v53 = vpack.c.bf16 %v11075_v10, %v11069_v47  ;;  %v11094_v28 = vpop.f32.mrb[72].mxu1  ;;  %v4917_v32 = vld [vmem:[%s12040_s9 + $0x68] sm:$0xff] }
 0x861   :  { %4367 = vmatprep.subr.bf16.mxu0 %v9271_v5  ;;  %v8442_v59 = vpop.f32.mrb[73].mxu1  ;;  %v9302_v5 = vld [vmem:[%s12039_s8 + $0x420] ss:$8 sps:$4 sm:$0xff]   ;;  %v9334_v47 = vld [vmem:[%s12039_s8 + $0x4c4] ss:$8 sps:$4 sm:$0xff]  }
 0x862   :  { %v11099_v49 = vpop.f32.mrb[74].mxu1  ;;  %v4921_v59 = vld [vmem:[%s12040_s9 + $0x88] sm:$0xff] }
 0x863   :  { %v4552_v60 = vpack.c.bf16 %v11099_v49, %v11094_v28  ;;  %v8443_v61 = vpop.f32.mrb[75].mxu1  ;;  %v9332_v10 = vld [vmem:[%s12039_s8 + $0x4c0] ss:$8 sps:$4 sm:$0xff]  }
 0x864   :  { %4368 = vmatpush1.bf16.msra.mxu0 %v9269_v4  ;;  %v9307_v4 = vld [vmem:[%s12039_s8 + $0x434] ss:$8 sps:$4 sm:$0xff]   ;;  %v9308_v61 = vld [vmem:[%s12039_s8 + $0x440] ss:$8 sps:$4 sm:$0xff]  }
 0x865   :  { %4369 = vmatprep.subr.bf16.mxu0 %v9274_v33  ;;  %v11216_v33 = vpack.c.bf16 %v4917_v32, %v4916_v27  ;;  %v9364_v27 = vld [vmem:[%s12039_s8 + $0x564] ss:$8 sps:$4 sm:$0xff]   ;;  %v9362_v32 = vld [vmem:[%s12039_s8 + $0x560] ss:$8 sps:$4 sm:$0xff]  }
 0x866   :  { %v4924_v28 = vld [vmem:[%s12040_s9 + $0xa0] sm:$0xff]  ;;  %v4925_v49 = vld [vmem:[%s12040_s9 + $0xa8] sm:$0xff] }
 0x867   :  { %8650 = vmatpush1.bf16.msra.mxu1 %v11216_v33 }
 0x868   :  { %4370 = vmatpush1.bf16.msra.mxu0 %v9272_v52  ;;  %v4918_v52 = vld [vmem:[%s12040_s9 + $0x70] sm:$0xff]  ;;  %8651 = vmatprep.subr.bf16.mxu1 %v9494_v39 }
 0x869   :  { %4371 = vmatprep.subr.bf16.mxu0 %v9277_v54  ;;  %v4919_v54 = vld [vmem:[%s12040_s9 + $0x78] sm:$0xff] }
 0x86c   :  { %4372 = vmatpush1.bf16.msra.mxu0 %v9275_v55  ;;  %v9305_v55 = vld [vmem:[%s12039_s8 + $0x430] ss:$8 sps:$4 sm:$0xff]  }
 0x86d   :  { %4373 = vmatprep.subr.bf16.mxu0 %v9280_v57  ;;  %v9310_v57 = vld [vmem:[%s12039_s8 + $0x444] ss:$8 sps:$4 sm:$0xff]  }
 0x870   :  { %4374 = vmatpush1.bf16.msra.mxu0 %v9278_v26  ;;  %v11232_v26 = vpack.c.bf16 %v4919_v54, %v4918_v52  ;;  %v9370_v52 = vld [vmem:[%s12039_s8 + $0x584] ss:$8 sps:$4 sm:$0xff]   ;;  %v9368_v54 = vld [vmem:[%s12039_s8 + $0x580] ss:$8 sps:$4 sm:$0xff]  }
 0x871   :  { %4375 = vmatprep.subr.bf16.mxu0 %v9283_v58  ;;  %v4920_v58 = vld [vmem:[%s12040_s9 + $0x80] sm:$0xff] }
 0x872   :  { %8653 = vmatpush1.bf16.msra.mxu1 %v11232_v26 }
 0x873   :  { %8654 = vmatprep.subr.bf16.mxu1 %v9494_v39 }
 0x874   :  { %4376 = vmatpush1.bf16.msra.mxu0 %v9281_v62  ;;  %v9313_v62 = vld [vmem:[%s12039_s8 + $0x454] ss:$8 sps:$4 sm:$0xff]  }
 0x875   :  { %4377 = vmatprep.subr.bf16.mxu0 %v9286_v63  ;;  %v11248_v63 = vpack.c.bf16 %v4921_v59, %v4920_v58  ;;  %v4926_v58 = vld [vmem:[%s12040_s9 + $0xb0] sm:$0xff]  ;;  %v4927_v59 = vld [vmem:[%s12040_s9 + $0xb8] sm:$0xff] }
 0x877   :  { %8656 = vmatpush1.bf16.msra.mxu1 %v11248_v63 }
 0x878   :  { %4378 = vmatpush1.bf16.msra.mxu0 %v9284_v0  ;;  %v9311_v0 = vld [vmem:[%s12039_s8 + $0x450] ss:$8 sps:$4 sm:$0xff]   ;;  %8657 = vmatprep.subr.bf16.mxu1 %v9494_v39 }
 0x879   :  { %4379 = vmatprep.subr.bf16.mxu0 %v9289_v2  ;;  %v9316_v2 = vld [vmem:[%s12039_s8 + $0x464] ss:$8 sps:$4 sm:$0xff]  }
 0x87c   :  { %4380 = vmatpush1.bf16.msra.mxu0 %v9287_v34  ;;  %v9322_v34 = vld [vmem:[%s12039_s8 + $0x484] ss:$8 sps:$4 sm:$0xff]  }
 0x87d   :  { %4381 = vmatprep.subr.bf16.mxu0 %v9292_v45  ;;  %v9335_v45 = vld [vmem:[%s12039_s8 + $0x4d0] ss:$8 sps:$4 sm:$0xff]  }
 0x880   :  { %4382 = vmatpush1.bf16.msra.mxu0 %v9290_v38  ;;  %v9343_v38 = vld [vmem:[%s12039_s8 + $0x4f4] ss:$8 sps:$4 sm:$0xff]  }
 0x881   :  { %4383 = vmatprep.subr.bf16.mxu0 %v9295_v11  ;;  %v9341_v11 = vld [vmem:[%s12039_s8 + $0x4f0] ss:$8 sps:$4 sm:$0xff]  }
 0x884   :  { %4384 = vmatpush1.bf16.msra.mxu0 %v9293_v14  ;;  %v9349_v14 = vld [vmem:[%s12039_s8 + $0x514] ss:$8 sps:$4 sm:$0xff]  }
 0x885   :  { %4385 = vmatprep.subr.bf16.mxu0 %v9298_v15  ;;  %v9347_v15 = vld [vmem:[%s12039_s8 + $0x510] ss:$8 sps:$4 sm:$0xff]  }
 0x888   :  { %4386 = vmatpush1.bf16.msra.mxu0 %v9296_v20  ;;  %v9355_v20 = vld [vmem:[%s12039_s8 + $0x534] ss:$8 sps:$4 sm:$0xff]  }
 0x889   :  { %4387 = vmatprep.subr.bf16.mxu0 %v9301_v30  ;;  %v9353_v30 = vld [vmem:[%s12039_s8 + $0x530] ss:$8 sps:$4 sm:$0xff]  }
 0x88c   :  { %4388 = vmatpush1.bf16.msra.mxu0 %v9299_v23  ;;  %v9361_v23 = vld [vmem:[%s12039_s8 + $0x554] ss:$8 sps:$4 sm:$0xff]  }
 0x88d   :  { %4389 = vmatprep.subr.bf16.mxu0 %v9304_v24  ;;  %v9359_v24 = vld [vmem:[%s12039_s8 + $0x550] ss:$8 sps:$4 sm:$0xff]  }
 0x890   :  { %4390 = vmatpush1.bf16.msra.mxu0 %v9302_v5  ;;  %v9367_v5 = vld [vmem:[%s12039_s8 + $0x574] ss:$8 sps:$4 sm:$0xff]  }
 0x891   :  { %4391 = vmatprep.subr.bf16.mxu0 %v9307_v4  ;;  %v9365_v4 = vld [vmem:[%s12039_s8 + $0x570] ss:$8 sps:$4 sm:$0xff]  }
 0x894   :  { %4392 = vmatpush1.bf16.msra.mxu0 %v9305_v55  ;;  %v9373_v55 = vld [vmem:[%s12039_s8 + $0x594] ss:$8 sps:$4 sm:$0xff]  }
 0x895   :  { %4393 = vmatprep.subr.bf16.mxu0 %v9310_v57  ;;  %v9371_v57 = vld [vmem:[%s12039_s8 + $0x590] ss:$8 sps:$4 sm:$0xff]  }
 0x898   :  { %4394 = vmatpush1.bf16.msra.mxu0 %v9308_v61  ;;  %v11422_v61 = vpack.c.bf16 %v4927_v59, %v4926_v58  ;;  %v5094_v58 = vld [vmem:[%s12041_s10 + $0x20] sm:$0xff]  ;;  %v5096_v59 = vld [vmem:[%s12041_s10 + $0x30] sm:$0xff] }
 0x899   :  { %4395 = vmatprep.subr.bf16.mxu0 %v9313_v62  ;;  %v4928_v62 = vld [vmem:[%s12040_s9 + $0xc0] sm:$0xff] }
 0x89c   :  { %4396 = vmatpush1.bf16.msra.mxu0 %v9311_v0  ;;  %v4929_v0 = vld [vmem:[%s12040_s9 + $0xc8] sm:$0xff] }
 0x89d   :  { %4408 = vmatprep.subr.bf16.mxu0 %v9316_v2  ;;  %v11432_v2 = vpack.c.bf16 %v4929_v0, %v4928_v62 }
 0x89f   :  { %4398 = vmatmul.mubr.bf16.vlgmr.msra.gmra.mrb[68].mxu0 %v4142_v48  ;;  %v9328_v48 = vld [vmem:[%s12039_s8 + $0x4a4] ss:$8 sps:$4 sm:$0xff]  }
 0x8a0   :  { %4409 = vmatpush1.bf16.msra.mxu0 %v9314_v42  ;;  %4440 = vmatprep.mubr.bf16.mxu0 %v9493_v40  ;;  %v4930_v42 = vld [vmem:[%s12040_s9 + $0xd0] sm:$0xff] }
 0x8a1   :  { %4410 = vmatprep.subr.bf16.mxu0 %v9319_v50  ;;  %v4931_v50 = vld [vmem:[%s12040_s9 + $0xd8] sm:$0xff] }
 0x8a4   :  { %4411 = vmatpush1.bf16.msra.mxu0 %v9317_v51  ;;  %v11442_v51 = vpack.c.bf16 %v4931_v50, %v4930_v42 }
 0x8a5   :  { %4773 = vmatprep.subr.bf16.mxu0 %v9322_v34 }
 0x8ab   :  { %7554 = vmatmul.mubr.msk.bf16.vlgmr.msra.gmra.mrb[68].mxu0 %vm2046_vm4, %v4144_v43  ;;  %v9329_v43 = vld [vmem:[%s12039_s8 + $0x4b0] ss:$8 sps:$4 sm:$0xff]  }
 0x8ac   :  { %4774 = vmatpush1.bf16.msra.mxu0 %v9320_v36  ;;  %4805 = vmatprep.mubr.bf16.mxu0 %v4551_v53  ;;  %v9337_v53 = vld [vmem:[%s12039_s8 + $0x4d4] ss:$8 sps:$4 sm:$0xff]  }
 0x8ad   :  { %4775 = vmatprep.subr.bf16.mxu0 %v9325_v31 }
 0x8b0   :  { %4776 = vmatpush1.bf16.msra.mxu0 %v9323_v35 }
 0x8b1   :  { %4777 = vmatprep.subr.bf16.mxu0 %v9328_v48 }
 0x8b4   :  { %4778 = vmatpush1.bf16.msra.mxu0 %v9326_v3 }
 0x8b5   :  { %4779 = vmatprep.subr.bf16.mxu0 %v9331_v41 }
 0x8b8   :  { %4780 = vmatpush1.bf16.msra.mxu0 %v9329_v43 }
 0x8b9   :  { %4781 = vmatprep.subr.bf16.mxu0 %v9334_v47 }
 0x8bc   :  { %4782 = vmatpush1.bf16.msra.mxu0 %v9332_v10 }
 0x8bd   :  { %4783 = vmatprep.subr.bf16.mxu0 %v9337_v53 }
 0x8c0   :  { %4784 = vmatpush1.bf16.msra.mxu0 %v9335_v45 }
 0x8c1   :  { %4785 = vmatprep.subr.bf16.mxu0 %v9340_v9 }
 0x8c4   :  { %4786 = vmatpush1.bf16.msra.mxu0 %v9338_v16 }
 0x8c5   :  { %4787 = vmatprep.subr.bf16.mxu0 %v9343_v38 }
 0x8c8   :  { %4788 = vmatpush1.bf16.msra.mxu0 %v9341_v11 }
 0x8c9   :  { %4789 = vmatprep.subr.bf16.mxu0 %v9346_v37 }
 0x8cc   :  { %4790 = vmatpush1.bf16.msra.mxu0 %v9344_v13 }
 0x8cd   :  { %4791 = vmatprep.subr.bf16.mxu0 %v9349_v14 }
 0x8d0   :  { %4792 = vmatpush1.bf16.msra.mxu0 %v9347_v15 }
 0x8d1   :  { %4793 = vmatprep.subr.bf16.mxu0 %v9352_v18 }
 0x8d4   :  { %4794 = vmatpush1.bf16.msra.mxu0 %v9350_v19 }
 0x8d5   :  { %4795 = vmatprep.subr.bf16.mxu0 %v9355_v20 }
 0x8d8   :  { %4796 = vmatpush1.bf16.msra.mxu0 %v9353_v30 }
 0x8d9   :  { %4797 = vmatprep.subr.bf16.mxu0 %v9358_v29 }
 0x8dc   :  { %4798 = vmatpush1.bf16.msra.mxu0 %v9356_v22 }
 0x8dd   :  { %4799 = vmatprep.subr.bf16.mxu0 %v9361_v23 }
 0x8e0   :  { %4800 = vmatpush1.bf16.msra.mxu0 %v9359_v24 }
 0x8e1   :  { %4801 = vmatprep.subr.bf16.mxu0 %v9364_v27 }
 0x8e4   :  { %4802 = vmatpush1.bf16.msra.mxu0 %v9362_v32 }
 0x8e5   :  { %4803 = vmatprep.subr.bf16.mxu0 %v9367_v5 }
 0x8e8   :  { %4804 = vmatpush1.bf16.msra.mxu0 %v9365_v4 }
 0x8e9   :  { %4816 = vmatprep.subr.bf16.mxu0 %v9370_v52 }
 0x8eb   :  { %4806 = vmatmul.mubr.bf16.vlgmr.msra.gmra.mrb[68].mxu0 %v4550_v8  ;;  %v11402_v8 = vpack.c.bf16 %v4923_v7, %v4922_v6  ;;  %v5092_v7 = vld [vmem:[%s12041_s10 + $0x10] sm:$0xff] }
 0x8ec   :  { %4817 = vmatpush1.bf16.msra.mxu0 %v9368_v54  ;;  %4848 = vmatprep.mubr.bf16.mxu0 %v9493_v40 }
 0x8ed   :  { %4818 = vmatprep.subr.bf16.mxu0 %v9373_v55  ;;  %8659 = vmatpush1.bf16.msra.mxu1 %v11402_v8 }
 0x8ee   :  { %8660 = vmatprep.subr.bf16.mxu1 %v9494_v39 }
 0x8f0   :  { %4819 = vmatpush1.bf16.msra.mxu0 %v9371_v57 }
 0x8f7   :  { %7633 = vmatmul.mubr.msk.bf16.vlgmr.msra.gmra.mrb[68].mxu0 %vm2046_vm4, %v4552_v60  ;;  %v11412_v60 = vpack.c.bf16 %v4925_v49, %v4924_v28  ;;  %v5097_v28 = vld [vmem:[%s12041_s10 + $0x38] sm:$0xff] }
 0x8f8   :  { %5932 = vmatprep.mubr.bf16.mxu0 %v9493_v40 }
 0x8f9   :  { %8662 = vmatpush1.bf16.msra.mxu1 %v11412_v60 }
 0x8fa   :  { %8663 = vmatprep.subr.bf16.mxu1 %v9494_v39 }
 0x8fd   :  { %8665 = vmatpush1.bf16.msra.mxu1 %v11422_v61 }
 0x8fe   :  { %8666 = vmatprep.subr.bf16.mxu1 %v9494_v39 }
 0x901   :  { %8668 = vmatpush1.bf16.msra.mxu1 %v11432_v2 }
 0x902   :  { %8669 = vmatprep.subr.bf16.mxu1 %v9494_v39 }
 0x905   :  { %8671 = vmatpush1.bf16.msra.mxu1 %v11442_v51 }
 0x906   :  { %8672 = vmatprep.subr.bf16.mxu1 %v9494_v39 }
 0x9ca   :  { %v11446_v34 = vpop.f32.mrb[68].mxu0 }
 0x9cb   :  { %v11448_v36 = vpop.f32.mrb[69].mxu0  ;;  %v4883_v48 = vmul.f32 %v11446_v34, %v11446_v34 }
 0x9cc   :  { %v4884_v31 = vmul.f32 %v11448_v36, %v11448_v36  ;;  %v11452_v35 = vpop.f32.mrb[70].mxu0  ;;  %v4873_v47 = vsel %vm4872_vm10, %v11448_v36, 0.0 }
 0x9cd   :  { %v4864_v3 = vsel %vm4863_vm9, %v11452_v35, 0.0  ;;  %v4885_v41 = vmul.f32 %v11452_v35, %v11452_v35  ;;  %v11459_v43 = vpop.f32.mrb[71].mxu0 }
 0x9ce   :  { %v4865_v10 = vadd.f32 %v4864_v3, %v11446_v34  ;;  %v4875_v53 = vsel %vm4874_vm11, %v11459_v43, 0.0  ;;  %v4886_v45 = vmul.f32 %v11459_v43, %v11459_v43  ;;  %v4895_v38 = vsel %vm4872_vm10, %v4884_v31, 0.0 }
 0x9cf   :  { %v4887_v9 = vsel %vm4863_vm9, %v4885_v41, 0.0  ;;  %v4876_v16 = vadd.f32 %v4875_v53, %v4873_v47  ;;  %v5083_v41 = vld [vmem:[%s12042_s11] sm:$0x1] }
 0x9d0   :  { %v4866_v11 = vrot.slane %v4865_v10, 4  ;;  %v4888_v37 = vadd.f32 %v4887_v9, %v4883_v48  ;;  %v4896_v13 = vsel %vm4874_vm11, %v4886_v45, 0.0  ;;  %v5087_v45 = vld [vmem:[%s12043_s12] sm:$0x1] }
 0x9d1   :  { %v4877_v14 = vrot.slane %v4876_v16, 4  ;;  %v4897_v15 = vadd.f32 %v4896_v13, %v4895_v38 }
 0x9d2   :  { %v4867_v18 = vadd.f32 %v4866_v11, %v4865_v10 }
 0x9d3   :  { %v4878_v19 = vadd.f32 %v4877_v14, %v4876_v16  ;;  %v4898_v20 = vrot.slane %v4897_v15, 4 }
 0x9d4   :  { %v4868_v30 = vrot.slane %v4867_v18, 2 }
 0x9d5   :  { %v4879_v29 = vrot.slane %v4878_v19, 2  ;;  %v4899_v22 = vadd.f32 %v4898_v20, %v4897_v15 }
 0x9d6   :  { %v4869_v23 = vadd.f32 %v4868_v30, %v4867_v18 }
 0x9d7   :  { %v4880_v24 = vadd.f32 %v4879_v29, %v4878_v19  ;;  %v4900_v27 = vrot.slane %v4899_v22, 2 }
 0x9d8   :  { %v4870_v32 = vrot.slane %v4869_v23, 1 }
 0x9d9   :  { %v4881_v5 = vrot.slane %v4880_v24, 1  ;;  %v4901_v4 = vadd.f32 %v4900_v27, %v4899_v22 }
 0x9da   :  { %v4871_v55 = vadd.f32 %v4870_v32, %v4869_v23 }
 0x9db   :  { %v4882_v52 = vadd.f32 %v4881_v5, %v4880_v24  ;;  %v4902_v54 = vrot.slane %v4901_v4, 1 }
 0x9dd   :  { %7634 = vmatprep.mubr.msk.f32.mxu1 %vm4872_vm10, %v4882_v52  ;;  %v4903_v57 = vadd.f32 %v4902_v54, %v4901_v4  ;;  %v7747_v54 = vld [vmem:[%s12044_s13 + $0x6] sm:$0x3] }
 0x9de   :  { %5000 = vmatmul.mubr.f32.vlgmr.msra.gmra.mrb[46].mxu1 %v4871_v55  ;;  %v7640_v55 = vld [vmem:[%s12044_s13 + $0x2] sm:$0x3] }
 0x9df   :  { %8674 = vmatpush1.bf16.msra.mxu1 %v11127_v12  ;;  %7635 = vmatprep.mubr.msk.f32.mxu1 %vm4872_vm10, %v4903_v57  ;;  %v4889_v12 = vrot.slane %v4888_v37, 4  ;;  %v9374_v57 = vld [vmem:[%s12045_s14 + $0x70] sm:$0xff]  }
 0x9e0   :  { %8675 = vmatprep.subr.bf16.mxu1 %v9494_v39 }
 0x9e3   :  { %8677 = vmatpush1.bf16.msra.mxu1 %v11136_v56  ;;  %v4890_v56 = vadd.f32 %v4889_v12, %v4888_v37  ;;  %v9375_v12 = vld [vmem:[%s12045_s14 + $0x78] sm:$0xff]  }
 0x9e4   :  { %8678 = vmatprep.subr.bf16.mxu1 %v9494_v39 }
 0x9e7   :  { %8680 = vmatpush1.bf16.msra.mxu1 %v11152_v44  ;;  %v4891_v44 = vrot.slane %v4890_v56, 2 }
 0x9e8   :  { %8681 = vmatprep.subr.bf16.mxu1 %v9494_v39 }
 0x9eb   :  { %8683 = vmatpush1.bf16.msra.mxu1 %v11168_v17  ;;  %v4892_v17 = vadd.f32 %v4891_v44, %v4890_v56  ;;  %v9376_v56 = vld [vmem:[%s12045_s14 + $0x80] sm:$0xff]   ;;  %v9377_v44 = vld [vmem:[%s12045_s14 + $0x88] sm:$0xff]  }
 0x9ec   :  { %8684 = vmatprep.subr.bf16.mxu1 %v9494_v39 }
 0x9ef   :  { %8686 = vmatpush1.bf16.msra.mxu1 %v11184_v21  ;;  %v4893_v21 = vrot.slane %v4892_v17, 1 }
 0x9f0   :  { %8687 = vmatprep.subr.bf16.mxu1 %v9494_v39 }
 0x9f3   :  { %8689 = vmatpush1.bf16.msra.mxu1 %v11200_v25  ;;  %v4894_v25 = vadd.f32 %v4893_v21, %v4892_v17  ;;  %v9378_v17 = vld [vmem:[%s12045_s14 + $0x90] sm:$0xff]   ;;  %v9379_v21 = vld [vmem:[%s12045_s14 + $0x98] sm:$0xff]  }
 0x9f4   :  { %8690 = vmatprep.subr.bf16.mxu1 %v9494_v39 }
 0x9f7   :  { %8692 = vmatpush1.bf16.msra.mxu1 %v11216_v33  ;;  %v5091_v33 = vld [vmem:[%s12041_s10 + $0x8] sm:$0xff] }
 0x9f8   :  { %8693 = vmatprep.subr.bf16.mxu1 %v9494_v39 }
 0x9fb   :  { %8695 = vmatpush1.bf16.msra.mxu1 %v11232_v26  ;;  %v5093_v26 = vld [vmem:[%s12041_s10 + $0x18] sm:$0xff] }
 0x9fc   :  { %8696 = vmatprep.subr.bf16.mxu1 %v9494_v39  ;;  %v8714_v6 = vpack.c.bf16 %v5093_v26, %v5091_v33  ;;  %v9381_v33 = vld [vmem:[%s12045_s14 + $0xa8] sm:$0xff]   ;;  %v9382_v26 = vld [vmem:[%s12045_s14 + $0xb0] sm:$0xff]  }
 0x9ff   :  { %8698 = vmatpush1.bf16.msra.mxu1 %v11248_v63  ;;  %v5090_v63 = vld [vmem:[%s12041_s10] sm:$0xff] }
 0xa00   :  { %8699 = vmatprep.subr.bf16.mxu1 %v9494_v39  ;;  %v8716_v49 = vpack.c.bf16 %v5092_v7, %v5090_v63  ;;  %v9383_v63 = vld [vmem:[%s12045_s14 + $0xb8] sm:$0xff]   ;;  %v9385_v7 = vld [vmem:[%s12045_s14 + $0xc8] sm:$0xff]  }
 0xa03   :  { %8701 = vmatpush1.bf16.msra.mxu1 %v11402_v8  ;;  %v5095_v8 = vld [vmem:[%s12041_s10 + $0x28] sm:$0xff] }
 0xa04   :  { %8702 = vmatprep.subr.bf16.mxu1 %v9494_v39 }
 0xa07   :  { %8704 = vmatpush1.bf16.msra.mxu1 %v11412_v60  ;;  %v8718_v60 = vpack.c.bf16 %v5097_v28, %v5095_v8  ;;  %v9386_v8 = vld [vmem:[%s12045_s14 + $0xd0] sm:$0xff]   ;;  %v9387_v28 = vld [vmem:[%s12045_s14 + $0xd8] sm:$0xff]  }
 0xa08   :  { %8705 = vmatprep.subr.bf16.mxu1 %v9494_v39 }
 0xa0b   :  { %8707 = vmatpush1.bf16.msra.mxu1 %v11422_v61  ;;  %v8720_v61 = vpack.c.bf16 %v5096_v59, %v5094_v58 }
 0xa0c   :  { %8708 = vmatprep.subr.bf16.mxu1 %v9494_v39 }
 0xa0f   :  { %8710 = vmatpush1.bf16.msra.mxu1 %v11432_v2 }
 0xa10   :  { %8711 = vmatprep.subr.bf16.mxu1 %v9494_v39 }
 0xa13   :  { %8713 = vmatpush1.bf16.msra.mxu1 %v11442_v51 }
 0xa14   :  { %8715 = vmatprep.subr.bf16.mxu1 %v8714_v6 }
 0xa16   :  { %5075 = vmatmul.mubr.f32.vlgmr.msra.gmra.mrb[76].mxu1 %v4894_v25  ;;  %v9380_v25 = vld [vmem:[%s12045_s14 + $0xa0] sm:$0xff]  }
 0xa17   :  { %5165 = vmatprep.mubr.f32.mxu1 %v9491_v1  ;;  %8717 = vmatpush1.bf16.msra.mxu1 %v8716_v49 }
 0xa18   :  { %8719 = vmatprep.subr.bf16.mxu1 %v8718_v60 }
 0xa1b   :  { %8721 = vmatpush1.bf16.msra.mxu1 %v8720_v61 }
 0xa1c   :  { %8723 = vmatprep.subr.bf16.mxu1 %v8714_v6  ;;  %v9384_v6 = vld [vmem:[%s12045_s14 + $0xc0] sm:$0xff]  }
 0xab1   :  { %v5001_v62 = vpop.f32.mrb[46].mxu1 }
 0xab2   :  { %v5003_v0 = vpop.f32.mrb[47].mxu1  ;;  %v5006_v2 = vmul.f32 0.010204081, %v5001_v62 }
 0xab4   :  { %v5081_v50 = vmul.f32 %v5006_v2, %v5006_v2 }
 0xae9   :  { %v5076_v42 = vpop.f32.mrb[76].mxu1 }
 0xaea   :  { %v5080_v51 = vmul.f32 0.010204081, %v5076_v42  ;;  %v5078_v31 = vpop.f32.mrb[77].mxu1 }
 0xaec   :  { %v5082_v48 = vsub.f32 %v5080_v51, %v5081_v50  ;;  %v9388_v50 = vld [vmem:[%s12045_s14] sm:$0xff]  }
 0xaee   :  { %v5084_v3 = vadd.f32 1e-05, %v5082_v48 }
 0xaf0   :  { %9454 = vrsqrt.f32 %v5084_v3  ;;  %v9389_v3 = vld [vmem:[%s12045_s14 + $0x8] sm:$0xff]  }
 0xafa   :  { %v9455_v47 = vpop.eup %9454 }
 0xafb   :  { %v5086_v10 = vmul.f32 %v9455_v47, %v5083_v41  ;;  %v9390_v41 = vld [vmem:[%s12045_s14 + $0x10] sm:$0xff]   ;;  %v9391_v47 = vld [vmem:[%s12045_s14 + $0x18] sm:$0xff]  }
 0xafd   :  { %7636 = vmatmul.mubr.msk.f32.vlgmr.msra.gmra.mrb[78].mxu1 %vm2046_vm4, %v5086_v10  ;;  %v5088_v53 = vmul.f32 %v5086_v10, %v5006_v2  ;;  %v9392_v10 = vld [vmem:[%s12045_s14 + $0x20] sm:$0xff]  }
 0xafe   :  { %8725 = vmatpush1.bf16.msra.mxu1 %v8716_v49  ;;  %5239 = vmatprep.mubr.f32.mxu1 %v9491_v1  ;;  %v7793_v49 = vld [vmem:[%s12044_s13 + $0x8] sm:$0x3] }
 0xaff   :  { %8727 = vmatprep.subr.bf16.mxu1 %v8718_v60  ;;  %v5089_v9 = vsub.f32 %v5087_v45, %v5088_v53  ;;  %v9393_v53 = vld [vmem:[%s12045_s14 + $0x28] sm:$0xff]   ;;  %v9394_v45 = vld [vmem:[%s12045_s14 + $0x30] sm:$0xff]  }
 0xb02   :  { %8729 = vmatpush1.bf16.msra.mxu1 %v8720_v61 }
 0xb05   :  { %7637 = vmatmul.mubr.msk.f32.vlgmr.msra.gmra.mrb[80].mxu1 %vm2046_vm4, %v5089_v9  ;;  %v9395_v9 = vld [vmem:[%s12045_s14 + $0x38] sm:$0xff]  }
 0xb06   :  { %5320 = vmatprep.mubr.bf16.mxu1 %v9493_v40 }
 0xbd0   :  { %v5167_v16 = vpop.f32.mrb[78].mxu1 }
 0xbd1   :  { %v5249_v38 = vrot.slane %v5167_v16, %v10511_v46  ;;  %v5169_v11 = vpop.f32.mrb[79].mxu1  ;;  %v9396_v16 = vld [vmem:[%s12045_s14 + $0x40] sm:$0xff]  }
 0xbd2   :  { %v5253_v37 = vrot.slane %v5169_v11, %v10511_v46  ;;  %v9398_v11 = vld [vmem:[%s12045_s14 + $0x50] sm:$0xff]  }
 0xbd3   :  { %v5254_v13 = vmul.f32 %v5249_v38, %v11446_v34  ;;  %v5256_v14 = vmul.f32 %v5249_v38, %v11452_v35  ;;  %v9397_v38 = vld [vmem:[%s12045_s14 + $0x48] sm:$0xff]  }
 0xbd4   :  { %v5255_v15 = vmul.f32 %v5253_v37, %v11448_v36  ;;  %v5257_v18 = vmul.f32 %v5253_v37, %v11459_v43  ;;  %v5276_v43 = vld [vmem:[%s12044_s13] sm:$0x3]  ;;  %v9399_v37 = vld [vmem:[%s12045_s14 + $0x58] sm:$0xff]  }
 0xbd8   :  { %v5241_v19 = vpop.f32.mrb[80].mxu1 }
 0xbd9   :  { %v5261_v20 = vrot.slane %v5241_v19, %v10511_v46  ;;  %v5243_v30 = vpop.f32.mrb[81].mxu1  ;;  %v9402_v19 = vld [vmem:[%s12045_s14 + $0xe0] sm:$0xff]  }
 0xbda   :  { %v5265_v29 = vrot.slane %v5243_v30, %v10511_v46  ;;  %v9404_v30 = vld [vmem:[%s12045_s14 + $0xf0] sm:$0xff]  }
 0xbdb   :  { %v5266_v22 = vadd.f32 %v5261_v20, %v5254_v13  ;;  %v5268_v23 = vadd.f32 %v5261_v20, %v5256_v14  ;;  %v9400_v13 = vld [vmem:[%s12045_s14 + $0x60] sm:$0xff]   ;;  %v9401_v14 = vld [vmem:[%s12045_s14 + $0x68] sm:$0xff]  }
 0xbdc   :  { %v5267_v24 = vadd.f32 %v5265_v29, %v5255_v15  ;;  %v5269_v27 = vadd.f32 %v5265_v29, %v5257_v18  ;;  %v7701_v18 = vld [vmem:[%s12044_s13 + $0x4] sm:$0x3]  ;;  %v9403_v20 = vld [vmem:[%s12045_s14 + $0xe8] sm:$0xff]   ;;  %v9405_v29 = vld [vmem:[%s12045_s14 + $0xf8] sm:$0xff]  }
 0xbdd   :  { %v5270_v32 = vmax.f32 %v5266_v22, 0.0  ;;  %v5272_v5 = vmax.f32 %v5268_v23, 0.0  ;;  %v9406_v22 = vld [vmem:[%s12045_s14 + $0x100] sm:$0xff]   ;;  %v9407_v23 = vld [vmem:[%s12045_s14 + $0x108] sm:$0xff]  }
 0xbde   :  { %v5271_v4 = vmax.f32 %v5267_v24, 0.0  ;;  %v5273_v34 = vmax.f32 %v5269_v27, 0.0  ;;  %v9408_v24 = vld [vmem:[%s12045_s14 + $0x110] sm:$0xff]   ;;  %v9409_v27 = vld [vmem:[%s12045_s14 + $0x118] sm:$0xff]  }
 0xbdf   :  { %v5274_v35 = vpack.c.bf16 %v5272_v5, %v5270_v32  ;;  %v9410_v32 = vld [vmem:[%s12045_s14 + $0x120] sm:$0xff]   ;;  %v9411_v5 = vld [vmem:[%s12045_s14 + $0x128] sm:$0xff]  }
 0xbe0   :  { %v11542_v52 = vpack.c.bf16 %v5273_v34, %v5271_v4  ;;  %v9412_v4 = vld [vmem:[%s12045_s14 + $0x130] sm:$0xff]   ;;  %v9413_v34 = vld [vmem:[%s12045_s14 + $0x138] sm:$0xff]  }
 0xbe1   :  { %v11545_v36 = vsel %vm5281_vm12, %v5274_v35, 0  ;;  %v9414_v35 = vld [vmem:[%s12045_s14 + $0x140] sm:$0xff]  }
 0xbe2   :  { %7638 = vmatprep.subr.msk.bf16.mxu1 %vm5281_vm12, %v11542_v52  ;;  %7748 = vmatprep.subr.msk.bf16.mxu0 %vm5281_vm12, %v11542_v52 }
 0xbe3   :  { %5289 = vmatpush1.bf16.msra.mxu1 %v11545_v36  ;;  %5901 = vmatpush1.bf16.msra.mxu0 %v11545_v36 }
 0xbe4   :  { %7641 = vmatprep.subr.msk.bf16.mxu1 %vm5281_vm12, %v11542_v52  ;;  %7794 = vmatprep.subr.msk.bf16.mxu0 %vm5281_vm12, %v11542_v52 }
 0xbe6   :  { %7639 = vmatmul.mubr.msk.bf16.vlgmr.msra.gmra.mrb[84].mxu1 %vm5277_vm13, %v5276_v43  ;;  %7749 = vmatmul.mubr.msk.bf16.vlgmr.msra.gmra.mrb[72].mxu0 %vm5277_vm13, %v7747_v54 }
 0xbe7   :  { %5365 = vmatpush1.bf16.msra.mxu1 %v11545_v36  ;;  %6106 = vmatpush1.bf16.msra.mxu0 %v11545_v36 }
 0xbe8   :  { %5396 = vmatprep.mubr.bf16.mxu1 %v9493_v40  ;;  %5523 = vmatprep.subr.bf16.mxu1 %v9493_v40 }
 0xbe9   :  { %6137 = vmatprep.mubr.bf16.mxu0 %v9493_v40  ;;  %8730 = vmatprep.subr.bf16.mxu0 %v9494_v39 }
 0xbee   :  { %7642 = vmatmul.mubr.msk.bf16.vlgmr.msra.gmra.mrb[88].mxu1 %vm5277_vm13, %v7640_v55  ;;  %7795 = vmatmul.mubr.msk.bf16.vlgmr.msra.gmra.mrb[76].mxu0 %vm5277_vm13, %v7793_v49 }
 0xbef   :  { %5524 = vmatpush1.bf16.msra.mxu1 %v9374_v57  ;;  %8460 = vmatprep.mubr.msk.f32.mxu0 %vm9492_vm0, %v9491_v1 }
 0xbf0   :  { %5525 = vmatprep.subr.bf16.mxu1 %v9493_v40 }
 0xbf3   :  { %5526 = vmatpush1.bf16.msra.mxu1 %v9375_v12 }
 0xbf4   :  { %5527 = vmatprep.subr.bf16.mxu1 %v9493_v40 }
 0xbf7   :  { %5528 = vmatpush1.bf16.msra.mxu1 %v9376_v56 }
 0xbf8   :  { %5529 = vmatprep.subr.bf16.mxu1 %v9493_v40 }
 0xbfb   :  { %5530 = vmatpush1.bf16.msra.mxu1 %v9377_v44 }
 0xbfc   :  { %5531 = vmatprep.subr.bf16.mxu1 %v9493_v40 }
 0xbff   :  { %5532 = vmatpush1.bf16.msra.mxu1 %v9378_v17  ;;  %v6321_v17 = vld [vmem:[%s12046_s15] sm:$0xff] }
 0xc00   :  { %5533 = vmatprep.subr.bf16.mxu1 %v9493_v40 }
 0xc03   :  { %5534 = vmatpush1.bf16.msra.mxu1 %v9379_v21  ;;  %v6322_v21 = vld [vmem:[%s12046_s15 + $0x8] sm:$0xff] }
 0xc04   :  { %5535 = vmatprep.subr.bf16.mxu1 %v9493_v40 }
 0xc07   :  { %5536 = vmatpush1.bf16.msra.mxu1 %v9380_v25  ;;  %v11771_v25 = vpack.c.bf16 %v6322_v21, %v6321_v17 }
 0xc08   :  { %5537 = vmatprep.subr.bf16.mxu1 %v9493_v40 }
 0xc09   :  { %8732 = vmatpush3.bf16.msra.mxu0 %v11771_v25 }
 0xc0a   :  { %8733 = vmatprep.subr.bf16.mxu0 %v9494_v39 }
 0xc0b   :  { %5538 = vmatpush1.bf16.msra.mxu1 %v9381_v33 }
 0xc0c   :  { %5539 = vmatprep.subr.bf16.mxu1 %v9493_v40 }
 0xc0f   :  { %5540 = vmatpush1.bf16.msra.mxu1 %v9382_v26 }
 0xc10   :  { %5541 = vmatprep.subr.bf16.mxu1 %v9493_v40 }
 0xc13   :  { %5542 = vmatpush1.bf16.msra.mxu1 %v9383_v63 }
 0xc14   :  { %5543 = vmatprep.subr.bf16.mxu1 %v9493_v40 }
 0xc17   :  { %5544 = vmatpush1.bf16.msra.mxu1 %v9384_v6 }
 0xc18   :  { %5545 = vmatprep.subr.bf16.mxu1 %v9493_v40 }
 0xc1b   :  { %5546 = vmatpush1.bf16.msra.mxu1 %v9385_v7  ;;  %v9416_v7 = vld [vmem:[%s12045_s14 + $0x150] sm:$0xff]  }
 0xc1c   :  { %5547 = vmatprep.subr.bf16.mxu1 %v9493_v40 }
 0xc1f   :  { %5548 = vmatpush1.bf16.msra.mxu1 %v9386_v8 }
 0xc20   :  { %5549 = vmatprep.subr.bf16.mxu1 %v9493_v40 }
 0xc23   :  { %5550 = vmatpush1.bf16.msra.mxu1 %v9387_v28 }
 0xc24   :  { %5650 = vmatprep.subr.bf16.mxu1 %v9493_v40 }
 0xcb9   :  { %v5322_v60 = vpop.f32.mrb[84].mxu1 }
 0xcba   :  { %v5324_v58 = vpop.f32.mrb[85].mxu1  ;;  %v5329_v15 = vpack.c.bf16 %v5322_v60, %v5322_v60  ;;  %v9417_v60 = vld [vmem:[%s12045_s14 + $0x158] sm:$0xff]  }
 0xcbb   :  { %v5326_v59 = vpop.f32.mrb[86].mxu1  ;;  %v5330_v48 = vpack.c.bf16 %v5324_v58, %v5324_v58  ;;  %v9418_v58 = vld [vmem:[%s12045_s14 + $0x160] sm:$0xff]  }
 0xcbc   :  { %v5327_v61 = vpop.f32.mrb[87].mxu1  ;;  %v9419_v59 = vld [vmem:[%s12045_s14 + $0x168] sm:$0xff]  }
 0xcbd   :  { %v9420_v61 = vld [vmem:[%s12045_s14 + $0x170] sm:$0xff]  }
 0xcc1   :  { %v5398_v62 = vpop.f32.mrb[88].mxu1 }
 0xcc2   :  { %v5400_v0 = vpop.f32.mrb[89].mxu1  ;;  %v5405_v51 = vpack.c.bf16 %v5398_v62, %v5398_v62  ;;  %v9421_v62 = vld [vmem:[%s12045_s14 + $0x178] sm:$0xff]  }
 0xcc3   :  { %v5406_v2 = vpack.c.bf16 %v5400_v0, %v5400_v0  ;;  %v5402_v42 = vpop.f32.mrb[90].mxu1  ;;  %v9422_v0 = vld [vmem:[%s12045_s14 + $0x180] sm:$0xff]  }
 0xcc4   :  { %v5403_v31 = vpop.f32.mrb[91].mxu1  ;;  %v9424_v42 = vld [vmem:[%s12045_s14 + $0x190] sm:$0xff]  }
 0xcc5   :  { %7685 = vmatprep.mubr.msk.bf16.mxu1 %vm4872_vm10, %v5406_v2  ;;  %v9423_v2 = vld [vmem:[%s12045_s14 + $0x188] sm:$0xff]  }
 0xcc6   :  { %5556 = vmatmul.mubr.bf16.vlgmr.msra.gmra.mrb[92].mxu1 %v5405_v51  ;;  %v9426_v51 = vld [vmem:[%s12045_s14 + $0x1a0] sm:$0xff]   ;;  %v9427_v31 = vld [vmem:[%s12045_s14 + $0x1a8] sm:$0xff]  }
 0xcc7   :  { %5651 = vmatpush1.bf16.msra.mxu1 %v9388_v50  ;;  %7700 = vmatprep.mubr.msk.bf16.mxu1 %vm4872_vm10, %v5330_v48  ;;  %v9425_v50 = vld [vmem:[%s12045_s14 + $0x198] sm:$0xff]   ;;  %v9428_v48 = vld [vmem:[%s12045_s14 + $0x1b0] sm:$0xff]  }
 0xcc8   :  { %5652 = vmatprep.subr.bf16.mxu1 %v9493_v40 }
 0xccb   :  { %5653 = vmatpush1.bf16.msra.mxu1 %v9389_v3  ;;  %v9429_v3 = vld [vmem:[%s12045_s14 + $0x1b8] sm:$0xff]  }
 0xccc   :  { %5654 = vmatprep.subr.bf16.mxu1 %v9493_v40 }
 0xccf   :  { %5655 = vmatpush1.bf16.msra.mxu1 %v9390_v41 }
 0xcd0   :  { %5656 = vmatprep.subr.bf16.mxu1 %v9493_v40 }
 0xcd3   :  { %5657 = vmatpush1.bf16.msra.mxu1 %v9391_v47  ;;  %v9430_v47 = vld [vmem:[%s12045_s14 + $0x1c0] sm:$0xff]  }
 0xcd4   :  { %5658 = vmatprep.subr.bf16.mxu1 %v9493_v40 }
 0xcd7   :  { %5659 = vmatpush1.bf16.msra.mxu1 %v9392_v10 }
 0xcd8   :  { %5660 = vmatprep.subr.bf16.mxu1 %v9493_v40 }
 0xcdb   :  { %5661 = vmatpush1.bf16.msra.mxu1 %v9393_v53  ;;  %v9431_v53 = vld [vmem:[%s12045_s14 + $0x1c8] sm:$0xff]  }
 0xcdc   :  { %5662 = vmatprep.subr.bf16.mxu1 %v9493_v40 }
 0xcdf   :  { %5663 = vmatpush1.bf16.msra.mxu1 %v9394_v45  ;;  %v9432_v45 = vld [vmem:[%s12045_s14 + $0x1d0] sm:$0xff]  }
 0xce0   :  { %5664 = vmatprep.subr.bf16.mxu1 %v9493_v40 }
 0xce3   :  { %5665 = vmatpush1.bf16.msra.mxu1 %v9395_v9  ;;  %v9433_v9 = vld [vmem:[%s12045_s14 + $0x1d8] sm:$0xff]  }
 0xce4   :  { %5666 = vmatprep.subr.bf16.mxu1 %v9493_v40 }
 0xce7   :  { %5667 = vmatpush1.bf16.msra.mxu1 %v9396_v16  ;;  %v9434_v16 = vld [vmem:[%s12045_s14 + $0x1e0] sm:$0xff]  }
 0xce8   :  { %5668 = vmatprep.subr.bf16.mxu1 %v9493_v40 }
 0xceb   :  { %5669 = vmatpush1.bf16.msra.mxu1 %v9397_v38  ;;  %v9435_v38 = vld [vmem:[%s12045_s14 + $0x1e8] sm:$0xff]  }
 0xcec   :  { %5670 = vmatprep.subr.bf16.mxu1 %v9493_v40 }
 0xcef   :  { %5671 = vmatpush1.bf16.msra.mxu1 %v9398_v11  ;;  %v9436_v11 = vld [vmem:[%s12045_s14 + $0x1f0] sm:$0xff]  }
 0xcf0   :  { %5672 = vmatprep.subr.bf16.mxu1 %v9493_v40 }
 0xcf3   :  { %5673 = vmatpush1.bf16.msra.mxu1 %v9399_v37  ;;  %v9437_v37 = vld [vmem:[%s12045_s14 + $0x1f8] sm:$0xff]  }
 0xcf4   :  { %5674 = vmatprep.subr.bf16.mxu1 %v9493_v40 }
 0xcf7   :  { %5675 = vmatpush1.bf16.msra.mxu1 %v9400_v13  ;;  %v9438_v13 = vld [vmem:[%s12045_s14 + $0x200] sm:$0xff]  }
 0xcf8   :  { %5676 = vmatprep.subr.bf16.mxu1 %v9493_v40 }
 0xcfb   :  { %5677 = vmatpush1.bf16.msra.mxu1 %v9401_v14  ;;  %v9439_v14 = vld [vmem:[%s12045_s14 + $0x208] sm:$0xff]  }
 0xcfc   :  { %7702 = vmatprep.subr.msk.bf16.mxu1 %vm5281_vm12, %v11542_v52  ;;  %v9415_v52 = vld [vmem:[%s12045_s14 + $0x148] sm:$0xff]  }
 0xcfe   :  { %5683 = vmatmul.mubr.bf16.vlgmr.msra.gmra.mrb[92].mxu1 %v5329_v15  ;;  %v9440_v15 = vld [vmem:[%s12045_s14 + $0x210] sm:$0xff]  }
 0xcff   :  { %5696 = vmatpush1.bf16.msra.mxu1 %v11545_v36  ;;  %5727 = vmatprep.mubr.bf16.mxu1 %v9493_v40  ;;  %v11759_v36 = vpop.f32.mrb[72].mxu0 }
 0xd00   :  { %5854 = vmatprep.subr.bf16.mxu1 %v9493_v40  ;;  %v5936_v43 = vpop.f32.mrb[73].mxu0  ;;  %v5941_v41 = vpack.c.bf16 %v11759_v36, %v11759_v36 }
 0xd01   :  { %v5938_v54 = vpop.f32.mrb[74].mxu0  ;;  %v5942_v8 = vpack.c.bf16 %v5936_v43, %v5936_v43 }
 0xd02   :  { %v5939_v55 = vpop.f32.mrb[75].mxu0 }
 0xd03   :  { %v11761_v57 = vpop.f32.mrb[76].mxu0 }
 0xd04   :  { %v11763_v12 = vpop.f32.mrb[77].mxu0 }
 0xd05   :  { %v6143_v56 = vpop.f32.mrb[78].mxu0  ;;  %v6147_v10 = vpack.c.bf16 %v11763_v12, %v11763_v12 }
 0xd06   :  { %7703 = vmatmul.mubr.msk.bf16.vlgmr.msra.gmra.mrb[96].mxu1 %vm5277_vm13, %v7701_v18  ;;  %v6144_v44 = vpop.f32.mrb[79].mxu0  ;;  %v9441_v18 = vld [vmem:[%s12045_s14 + $0x218] sm:$0xff]  }
 0xd07   :  { %5855 = vmatpush1.bf16.msra.mxu1 %v9402_v19  ;;  %v9442_v19 = vld [vmem:[%s12045_s14 + $0x220] sm:$0xff]  }
 0xd08   :  { %5856 = vmatprep.subr.bf16.mxu1 %v9493_v40 }
 0xd0b   :  { %5857 = vmatpush1.bf16.msra.mxu1 %v9403_v20  ;;  %v9443_v20 = vld [vmem:[%s12045_s14 + $0x228] sm:$0xff]  }
 0xd0c   :  { %5858 = vmatprep.subr.bf16.mxu1 %v9493_v40 }
 0xd0f   :  { %5859 = vmatpush1.bf16.msra.mxu1 %v9404_v30  ;;  %v6146_v30 = vpack.c.bf16 %v11761_v57, %v11761_v57 }
 0xd10   :  { %5860 = vmatprep.subr.bf16.mxu1 %v9493_v40 }
 0xd13   :  { %5861 = vmatpush1.bf16.msra.mxu1 %v9405_v29  ;;  %v6323_v29 = vld [vmem:[%s12046_s15 + $0x10] sm:$0xff] }
 0xd14   :  { %5862 = vmatprep.subr.bf16.mxu1 %v9493_v40 }
 0xd17   :  { %5863 = vmatpush1.bf16.msra.mxu1 %v9406_v22  ;;  %v6324_v22 = vld [vmem:[%s12046_s15 + $0x18] sm:$0xff] }
 0xd18   :  { %5864 = vmatprep.subr.bf16.mxu1 %v9493_v40 }
 0xd1b   :  { %5865 = vmatpush1.bf16.msra.mxu1 %v9407_v23  ;;  %v8734_v23 = vpack.c.bf16 %v6324_v22, %v6323_v29  ;;  %v9446_v29 = vld [vmem:[%s12051_s20 + $0x10] sm:$0xff]   ;;  %v9447_v22 = vld [vmem:[%s12051_s20 + $0x18] sm:$0xff]  }
 0xd1c   :  { %5866 = vmatprep.subr.bf16.mxu1 %v9493_v40 }
 0xd1d   :  { %8735 = vmatpush3.bf16.msra.mxu0 %v8734_v23 }
 0xd1e   :  { %8736 = vmatprep.subr.bf16.mxu0 %v9494_v39 }
 0xd1f   :  { %5867 = vmatpush1.bf16.msra.mxu1 %v9408_v24  ;;  %v6326_v24 = vld [vmem:[%s12046_s15 + $0x28] sm:$0xff] }
 0xd20   :  { %5868 = vmatprep.subr.bf16.mxu1 %v9493_v40 }
 0xd23   :  { %5869 = vmatpush1.bf16.msra.mxu1 %v9409_v27 }
 0xd24   :  { %5870 = vmatprep.subr.bf16.mxu1 %v9493_v40 }
 0xd27   :  { %5871 = vmatpush1.bf16.msra.mxu1 %v9410_v32  ;;  %v6327_v32 = vld [vmem:[%s12046_s15 + $0x30] sm:$0xff] }
 0xd28   :  { %5872 = vmatprep.subr.bf16.mxu1 %v9493_v40 }
 0xd2b   :  { %5873 = vmatpush1.bf16.msra.mxu1 %v9411_v5  ;;  %v6328_v5 = vld [vmem:[%s12046_s15 + $0x38] sm:$0xff] }
 0xd2c   :  { %5874 = vmatprep.subr.bf16.mxu1 %v9493_v40 }
 0xd2f   :  { %5875 = vmatpush1.bf16.msra.mxu1 %v9412_v4  ;;  %v8740_v4 = vpack.c.bf16 %v6328_v5, %v6327_v32  ;;  %v7850_v5 = vld [vmem:[%s12050_s19 + $0x1] sm:$0x1] }
 0xd30   :  { %5876 = vmatprep.subr.bf16.mxu1 %v9493_v40 }
 0xd33   :  { %5877 = vmatpush1.bf16.msra.mxu1 %v9413_v34 }
 0xd34   :  { %5878 = vmatprep.subr.bf16.mxu1 %v9493_v40 }
 0xd37   :  { %5879 = vmatpush1.bf16.msra.mxu1 %v9414_v35 }
 0xd38   :  { %5880 = vmatprep.subr.bf16.mxu1 %v9493_v40 }
 0xd3b   :  { %5881 = vmatpush1.bf16.msra.mxu1 %v9415_v52 }
 0xd3c   :  { %6059 = vmatprep.subr.bf16.mxu1 %v9493_v40 }
 0xdd9   :  { %v5729_v33 = vpop.f32.mrb[96].mxu1 }
 0xdda   :  { %v5731_v26 = vpop.f32.mrb[97].mxu1  ;;  %v5736_v28 = vpack.c.bf16 %v5729_v33, %v5729_v33 }
 0xddb   :  { %v5737_v63 = vpack.c.bf16 %v5731_v26, %v5731_v26  ;;  %v5733_v6 = vpop.f32.mrb[98].mxu1 }
 0xddc   :  { %v5734_v49 = vpop.f32.mrb[99].mxu1 }
 0xddd   :  { %7746 = vmatprep.mubr.msk.bf16.mxu1 %vm4872_vm10, %v5737_v63  ;;  %v6490_v49 = vld [vmem:[%s12047_s16 + $0x10] sm:$0xff] }
 0xdde   :  { %5887 = vmatmul.mubr.bf16.vlgmr.msra.gmra.mrb[92].mxu1 %v5736_v28  ;;  %v6489_v28 = vld [vmem:[%s12047_s16 + $0x8] sm:$0xff] }
 0xddf   :  { %6060 = vmatpush1.bf16.msra.mxu1 %v9416_v7  ;;  %7792 = vmatprep.mubr.msk.bf16.mxu1 %vm4872_vm10, %v5942_v8 }
 0xde0   :  { %6061 = vmatprep.subr.bf16.mxu1 %v9493_v40 }
 0xde3   :  { %6062 = vmatpush1.bf16.msra.mxu1 %v9417_v60 }
 0xde4   :  { %6063 = vmatprep.subr.bf16.mxu1 %v9493_v40 }
 0xde7   :  { %6064 = vmatpush1.bf16.msra.mxu1 %v9418_v58  ;;  %v6491_v58 = vld [vmem:[%s12047_s16 + $0x18] sm:$0xff] }
 0xde8   :  { %6065 = vmatprep.subr.bf16.mxu1 %v9493_v40 }
 0xdeb   :  { %6066 = vmatpush1.bf16.msra.mxu1 %v9419_v59  ;;  %v8758_v59 = vpack.c.bf16 %v6491_v58, %v6490_v49 }
 0xdec   :  { %6067 = vmatprep.subr.bf16.mxu1 %v9493_v40 }
 0xdef   :  { %6068 = vmatpush1.bf16.msra.mxu1 %v9420_v61 }
 0xdf0   :  { %6069 = vmatprep.subr.bf16.mxu1 %v9493_v40 }
 0xdf3   :  { %6070 = vmatpush1.bf16.msra.mxu1 %v9421_v62 }
 0xdf4   :  { %6071 = vmatprep.subr.bf16.mxu1 %v9493_v40 }
 0xdf7   :  { %6072 = vmatpush1.bf16.msra.mxu1 %v9422_v0 }
 0xdf8   :  { %6073 = vmatprep.subr.bf16.mxu1 %v9493_v40 }
 0xdfb   :  { %6074 = vmatpush1.bf16.msra.mxu1 %v9423_v2 }
 0xdfc   :  { %6075 = vmatprep.subr.bf16.mxu1 %v9493_v40 }
 0xdff   :  { %6076 = vmatpush1.bf16.msra.mxu1 %v9424_v42 }
 0xe00   :  { %6077 = vmatprep.subr.bf16.mxu1 %v9493_v40 }
 0xe03   :  { %6078 = vmatpush1.bf16.msra.mxu1 %v9425_v50 }
 0xe04   :  { %6079 = vmatprep.subr.bf16.mxu1 %v9493_v40 }
 0xe07   :  { %6080 = vmatpush1.bf16.msra.mxu1 %v9426_v51 }
 0xe08   :  { %6081 = vmatprep.subr.bf16.mxu1 %v9493_v40 }
 0xe0b   :  { %6082 = vmatpush1.bf16.msra.mxu1 %v9427_v31 }
 0xe0c   :  { %6083 = vmatprep.subr.bf16.mxu1 %v9493_v40 }
 0xe0f   :  { %6084 = vmatpush1.bf16.msra.mxu1 %v9428_v48 }
 0xe10   :  { %6085 = vmatprep.subr.bf16.mxu1 %v9493_v40 }
 0xe13   :  { %6086 = vmatpush1.bf16.msra.mxu1 %v9429_v3  ;;  %v6481_v3 = vld [vmem:[%s12048_s17] sm:$0x1] }
 0xe14   :  { %6264 = vmatprep.subr.bf16.mxu1 %v9493_v40 }
 0xe16   :  { %6092 = vmatmul.mubr.bf16.vlgmr.msra.gmra.mrb[92].mxu1 %v5941_v41 }
 0xe17   :  { %6265 = vmatpush1.bf16.msra.mxu1 %v9430_v47  ;;  %7838 = vmatprep.mubr.msk.bf16.mxu1 %vm4872_vm10, %v6147_v10 }
 0xe18   :  { %6266 = vmatprep.subr.bf16.mxu1 %v9493_v40 }
 0xe1b   :  { %6267 = vmatpush1.bf16.msra.mxu1 %v9431_v53  ;;  %v6485_v53 = vld [vmem:[%s12049_s18] sm:$0x1] }
 0xe1c   :  { %6268 = vmatprep.subr.bf16.mxu1 %v9493_v40 }
 0xe1f   :  { %6269 = vmatpush1.bf16.msra.mxu1 %v9432_v45 }
 0xe20   :  { %6270 = vmatprep.subr.bf16.mxu1 %v9493_v40 }
 0xe23   :  { %6271 = vmatpush1.bf16.msra.mxu1 %v9433_v9 }
 0xe24   :  { %6272 = vmatprep.subr.bf16.mxu1 %v9493_v40 }
 0xe27   :  { %6273 = vmatpush1.bf16.msra.mxu1 %v9434_v16 }
 0xe28   :  { %6274 = vmatprep.subr.bf16.mxu1 %v9493_v40 }
 0xe2b   :  { %6275 = vmatpush1.bf16.msra.mxu1 %v9435_v38 }
 0xe2c   :  { %6276 = vmatprep.subr.bf16.mxu1 %v9493_v40 }
 0xe2f   :  { %6277 = vmatpush1.bf16.msra.mxu1 %v9436_v11 }
 0xe30   :  { %6278 = vmatprep.subr.bf16.mxu1 %v9493_v40 }
 0xe33   :  { %6279 = vmatpush1.bf16.msra.mxu1 %v9437_v37 }
 0xe34   :  { %6280 = vmatprep.subr.bf16.mxu1 %v9493_v40 }
 0xe37   :  { %6281 = vmatpush1.bf16.msra.mxu1 %v9438_v13 }
 0xe38   :  { %6282 = vmatprep.subr.bf16.mxu1 %v9493_v40 }
 0xe3b   :  { %6283 = vmatpush1.bf16.msra.mxu1 %v9439_v14 }
 0xe3c   :  { %6284 = vmatprep.subr.bf16.mxu1 %v9493_v40 }
 0xe3f   :  { %6285 = vmatpush1.bf16.msra.mxu1 %v9440_v15 }
 0xe40   :  { %6286 = vmatprep.subr.bf16.mxu1 %v9493_v40 }
 0xe43   :  { %6287 = vmatpush1.bf16.msra.mxu1 %v9441_v18 }
 0xe44   :  { %6288 = vmatprep.subr.bf16.mxu1 %v9493_v40 }
 0xe47   :  { %6289 = vmatpush1.bf16.msra.mxu1 %v9442_v19 }
 0xe48   :  { %6290 = vmatprep.subr.bf16.mxu1 %v9493_v40  ;;  %v6325_v40 = vld [vmem:[%s12046_s15 + $0x20] sm:$0xff] }
 0xe49   :  { %v8737_v27 = vpack.c.bf16 %v6326_v24, %v6325_v40 }
 0xe4b   :  { %6291 = vmatpush1.bf16.msra.mxu1 %v9443_v20  ;;  %8738 = vmatpush3.bf16.msra.mxu0 %v8737_v27  ;;  %v6658_v20 = vld [vmem:[%s12050_s19] sm:$0x1] }
 0xe4c   :  { %8739 = vmatprep.subr.bf16.mxu0 %v9494_v39 }
 0xe4e   :  { %6297 = vmatmul.mubr.bf16.vlgmr.msra.gmra.mrb[92].mxu1 %v6146_v30  ;;  %v9444_v30 = vld [vmem:[%s12051_s20] sm:$0xff]  }
 0xe4f   :  { %8741 = vmatpush3.bf16.msra.mxu0 %v8740_v4 }
 0xe50   :  { %8742 = vmatprep.subr.bf16.mxu0 %v9494_v39 }
 0xf21   :  { %v11916_v34 = vpop.f32.mrb[92].mxu1 }
 0xf22   :  { %v6306_v35 = vsel %vm6305_vm14, %v11916_v34, 0.0  ;;  %v6313_v52 = vmul.f32 %v11916_v34, %v11916_v34  ;;  %v6300_v36 = vpop.f32.mrb[93].mxu1 }
 0xf23   :  { %v6307_v43 = vrot.slane %v6306_v35, 4  ;;  %v6301_v54 = vpop.f32.mrb[94].mxu1 }
 0xf24   :  { %v6302_v55 = vpop.f32.mrb[95].mxu1  ;;  %v6314_v12 = vsel %vm6305_vm14, %v6313_v52, 0.0  ;;  %v9451_v52 = vld [vmem:[%s12051_s20 + $0x38] sm:$0xff]  }
 0xf25   :  { %v6308_v57 = vadd.f32 %v6307_v43, %v6306_v35  ;;  %v6315_v17 = vrot.slane %v6314_v12, 4  ;;  %v9450_v35 = vld [vmem:[%s12051_s20 + $0x30] sm:$0xff]  }
 0xf27   :  { %v6309_v56 = vrot.slane %v6308_v57, 2  ;;  %v6316_v26 = vadd.f32 %v6315_v17, %v6314_v12  ;;  %v7843_v12 = vld [vmem:[%s12052_s21] ss:$0 sm:$0xff] }
 0xf29   :  { %v6310_v44 = vadd.f32 %v6309_v56, %v6308_v57  ;;  %v6317_v63 = vrot.slane %v6316_v26, 2 }
 0xf2b   :  { %v6311_v21 = vrot.slane %v6310_v44, 1  ;;  %v6318_v6 = vadd.f32 %v6317_v63, %v6316_v26 }
 0xf2d   :  { %v6312_v33 = vadd.f32 %v6311_v21, %v6310_v44  ;;  %v6319_v7 = vrot.slane %v6318_v6, 1 }
 0xf2f   :  { %8461 = vmatmul.mubr.msk.f32.vlgmr.msra.gmra.mrb[54].mxu0 %vm6329_vm15, %v6312_v33  ;;  %v6320_v8 = vadd.f32 %v6319_v7, %v6318_v6 }
 0xf30   :  { %8744 = vmatpush3.bf16.msra.mxu0 %v11771_v25  ;;  %8479 = vmatprep.mubr.msk.f32.mxu0 %vm9492_vm0, %v9491_v1  ;;  %v6488_v25 = vld [vmem:[%s12047_s16] sm:$0xff] }
 0xf31   :  { %8745 = vmatprep.subr.bf16.mxu0 %v9494_v39  ;;  %v8755_v60 = vpack.c.bf16 %v6489_v28, %v6488_v25 }
 0xf34   :  { %8747 = vmatpush3.bf16.msra.mxu0 %v8734_v23 }
 0xf35   :  { %8748 = vmatprep.subr.bf16.mxu0 %v9494_v39 }
 0xf38   :  { %8750 = vmatpush3.bf16.msra.mxu0 %v8737_v27 }
 0xf39   :  { %8751 = vmatprep.subr.bf16.mxu0 %v9494_v39 }
 0xf3c   :  { %8753 = vmatpush3.bf16.msra.mxu0 %v8740_v4  ;;  %v9448_v4 = vld [vmem:[%s12051_s20 + $0x20] sm:$0xff]  }
 0xf3d   :  { %8754 = vmatprep.subr.bf16.mxu0 %v9494_v39 }
 0xf3f   :  { %8480 = vmatmul.mubr.msk.f32.vlgmr.msra.gmra.mrb[80].mxu0 %vm6329_vm15, %v6320_v8 }
 0xf40   :  { %8490 = vmatprep.mubr.msk.f32.mxu0 %vm9492_vm0, %v9491_v1  ;;  %8756 = vmatpush3.bf16.msra.mxu0 %v8755_v60 }
 0xf41   :  { %8757 = vmatprep.subr.bf16.mxu0 %v9494_v39 }
 0xf44   :  { %8759 = vmatpush3.bf16.msra.mxu0 %v8758_v59 }
 0xf45   :  { %8760 = vmatprep.subr.bf16.mxu0 %v9494_v39 }
0x1002   :  { %v6399_v61 = vpop.f32.mrb[54].mxu0 }
0x1003   :  { %v8462_v62 = vpop.f32.mrb[55].mxu0  ;;  %v6404_v0 = vmul.f32 0.125, %v6399_v61 }
0x1005   :  { %v6479_v42 = vmul.f32 %v6404_v0, %v6404_v0 }
0x1012   :  { %v6474_v2 = vpop.f32.mrb[80].mxu0 }
0x1013   :  { %v6478_v50 = vmul.f32 0.125, %v6474_v2  ;;  %v8481_v51 = vpop.f32.mrb[81].mxu0 }
0x1015   :  { %v6480_v31 = vsub.f32 %v6478_v50, %v6479_v42 }
0x1017   :  { %v6482_v48 = vadd.f32 1e-05, %v6480_v31 }
0x1019   :  { %9456 = vrsqrt.f32 %v6482_v48 }
0x1023   :  { %v9457_v41 = vpop.eup %9456 }
0x1024   :  { %v6484_v47 = vmul.f32 %v9457_v41, %v6481_v3 }
0x1026   :  { %8491 = vmatmul.mubr.msk.f32.vlgmr.msra.gmra.mrb[82].mxu0 %vm2046_vm4, %v6484_v47  ;;  %v6486_v10 = vmul.f32 %v6484_v47, %v6404_v0 }
0x1027   :  { %8762 = vmatpush3.bf16.msra.mxu0 %v8755_v60  ;;  %8501 = vmatprep.mubr.msk.f32.mxu0 %vm9492_vm0, %v9491_v1 }
0x1028   :  { %8763 = vmatprep.subr.bf16.mxu0 %v9494_v39  ;;  %v6487_v45 = vsub.f32 %v6485_v53, %v6486_v10 }
0x102b   :  { %8765 = vmatpush3.bf16.msra.mxu0 %v8758_v59 }
0x102c   :  { %8504 = vmatprep.subr.bf16.mxu0 %v9491_v1 }
0x102e   :  { %8502 = vmatmul.mubr.msk.f32.vlgmr.msra.gmra.mrb[84].mxu0 %vm2046_vm4, %v6487_v45 }
0x102f   :  { %8506 = vmatprep.mubr.msk.bf16.mxu0 %vm9492_vm0, %v9491_v1 }
0x10f9   :  { %v6561_v9 = vpop.f32.mrb[82].mxu0 }
0x10fa   :  { %v6641_v16 = vrot.slane %v6561_v9, %v10511_v46  ;;  %v8492_v38 = vpop.f32.mrb[83].mxu0 }
0x10fc   :  { %v6642_v11 = vmul.f32 %v6641_v16, %v11916_v34  ;;  %v9449_v34 = vld [vmem:[%s12051_s20 + $0x28] sm:$0xff]  }
0x1101   :  { %v6634_v39 = vpop.f32.mrb[84].mxu0 }
0x1102   :  { %v6646_v37 = vrot.slane %v6634_v39, %v10511_v46  ;;  %v8503_v13 = vpop.f32.mrb[85].mxu0  ;;  %v9445_v46 = vld [vmem:[%s12051_s20 + $0x8] sm:$0xff]   ;;  %s9495_s20 = smov [#allocation2]  }
0x1103   :  { %s6933_s21 = sshll.u32 %s9495_s20, 4  ;;  %s6934_s21 = int_to_ptr.vmem [resolvable:$true] %s6933_s21 }
0x1104   :  { %v6647_v14 = vadd.f32 %v6646_v37, %v6642_v11  ;;  %s9467_s0 = scalar_lea.vmem %s6934_s21, 32  ;;  %p9472_p1 = scmp.lt.s32.totalorder %s6934_s21, %s6934_s21 }
0x1105   :  { %p9468_p0 = scmp.ne.s32.totalorder %s6934_s21, %s9467_s0  ;;  %p9473_p2 = scmp.lt.s32.totalorder %s9467_s0, %s9467_s0 }
0x1106   :  { %v6648_v15 = vmax.f32 %v6647_v14, 0.0 }
0x1107   :  { %p9474_p3 = por %p9473_p2, %p9472_p1 }
0x1108   :  { %v6649_v18 = vpack.c.bf16 %v6648_v15, %v6648_v15 }
0x1109   :  { %p9475_p4 = pnand %p9474_p3, %p9468_p0 }
0x110a   :  { %v6664_v19 = vsel %vm2833_vm7, %v6649_v18, 0 }
0x110b   :  { %8505 = vmatpush3.bf16.msra.mxu0 %v6664_v19 }
0x110c   :  { %8510 = vmatprep.subr.bf16.mxu0 %v9491_v1 }
0x110e   :  { %8507 = vmatmul.mubr.msk.bf16.vlgmr.msra.gmra.mrb[88].mxu0 %vm6659_vm1, %v6658_v20 }
0x110f   :  { %8511 = vmatpush3.bf16.msra.mxu0 %v9444_v30  ;;  %8518 = vmatprep.mubr.msk.bf16.mxu0 %vm9492_vm0, %v9491_v1 }
0x1110   :  { %8512 = vmatprep.subr.bf16.mxu0 %v9491_v1 }
0x1113   :  { %8513 = vmatpush3.bf16.msra.mxu0 %v9445_v46 }
0x1114   :  { %8514 = vmatprep.subr.bf16.mxu0 %v9491_v1 }
0x1117   :  { %8515 = vmatpush3.bf16.msra.mxu0 %v9446_v29 }
0x1118   :  { %8516 = vmatprep.subr.bf16.mxu0 %v9491_v1 }
0x111b   :  { %8517 = vmatpush3.bf16.msra.mxu0 %v9447_v22 }
0x111c   :  { %8522 = vmatprep.subr.bf16.mxu0 %v9491_v1 }
0x11e1   :  { %v6700_v23 = vpop.f32.mrb[88].mxu0 }
0x11e2   :  { %v6706_v40 = vpack.c.bf16 %v6700_v23, %v6700_v23  ;;  %v8508_v24 = vpop.f32.mrb[89].mxu0 }
0x11e3   :  { %v6703_v27 = vpop.f32.mrb[90].mxu0 }
0x11e4   :  { %v8509_v32 = vpop.f32.mrb[91].mxu0  ;;  %8519 = vmatmul.mubr.msk.bf16.vlgmr.msra.gmra.mrb[92].mxu0 %vm6329_vm15, %v6706_v40 }
0x11e5   :  { %8523 = vmatpush3.bf16.msra.mxu0 %v6664_v19  ;;  %8524 = vmatprep.mubr.msk.bf16.mxu0 %vm9492_vm0, %v9491_v1 }
0x11e6   :  { %8528 = vmatprep.subr.bf16.mxu0 %v9491_v1 }
0x11ec   :  { %8525 = vmatmul.mubr.msk.bf16.vlgmr.msra.gmra.mrb[96].mxu0 %vm6659_vm1, %v7850_v5 }
0x11ed   :  { %8529 = vmatpush3.bf16.msra.mxu0 %v9448_v4  ;;  %8536 = vmatprep.mubr.msk.bf16.mxu0 %vm9492_vm0, %v9491_v1  ;;  %vm6906_vm0 = vcmask 9216  }
0x11ee   :  { %8530 = vmatprep.subr.bf16.mxu0 %v9491_v1 }
0x11f1   :  { %8531 = vmatpush3.bf16.msra.mxu0 %v9449_v34 }
0x11f2   :  { %8532 = vmatprep.subr.bf16.mxu0 %v9491_v1 }
0x11f5   :  { %8533 = vmatpush3.bf16.msra.mxu0 %v9450_v35 }
0x11f6   :  { %8534 = vmatprep.subr.bf16.mxu0 %v9491_v1 }
0x11f9   :  { %8535 = vmatpush3.bf16.msra.mxu0 %v9451_v52 }
0x12bf   :  { %v6822_v36 = vpop.f32.mrb[96].mxu0 }
0x12c0   :  { %v6828_v43 = vpack.c.bf16 %v6822_v36, %v6822_v36  ;;  %v8526_v54 = vpop.f32.mrb[97].mxu0 }
0x12c1   :  { %v6825_v55 = vpop.f32.mrb[98].mxu0 }
0x12c2   :  { %v8527_v57 = vpop.f32.mrb[99].mxu0  ;;  %8537 = vmatmul.mubr.msk.bf16.vlgmr.msra.gmra.mrb[92].mxu0 %vm6329_vm15, %v6828_v43 }
0x1395   :  { %v6899_v56 = vpop.f32.mrb[92].mxu0 }
0x1396   :  { %v8766_v44 = vadd.f32 %v7843_v12, %v6899_v56  ;;  %v8538_v1 = vpop.f32.mrb[93].mxu0 }
0x1397   :  { %v6902_v17 = vpop.f32.mrb[94].mxu0 }
0x1398   :  { %v6907_v21 = vsel %vm6906_vm0, %v8766_v44, -inf  ;;  %v8539_v33 = vpop.f32.mrb[95].mxu0 }
0x1399   :  { %v6908_v26 = vrot.slane %v6907_v21, 4 }
0x139b   :  { %v6909_v63 = vmax.f32 %v6907_v21, %v6908_v26 }
0x139d   :  { %v6910_v6 = vrot.slane %v6909_v63, 2 }
0x139f   :  { %v6911_v7 = vmax.f32 %v6909_v63, %v6910_v6 }
0x13a1   :  { %v6912_v8 = vrot.slane %v6911_v7, 1 }
0x13a3   :  { %v6913_v25 = vmax.f32 %v6911_v7, %v6912_v8 }
0x13a5   :  { %v6914_v28 = vsub.f32 %v8766_v44, %v6913_v25 }
0x13a7   :  { %v6915_v49 = vmul.f32 1.442695, %v6914_v28 }
0x13a9   :  { %9458 = vpow2.f32 %v6915_v49 }
0x13b3   :  { %v9459_v60 = vpop.eup %9458 }
0x13b4   :  { %v6917_v58 = vsel %vm6906_vm0, %v9459_v60, 0.0 }
0x13b5   :  { %v6918_v59 = vrot.slane %v6917_v58, 4 }
0x13b7   :  { %v6919_v61 = vadd.f32 %v6918_v59, %v6917_v58 }
0x13b9   :  { %v6920_v62 = vrot.slane %v6919_v61, 2 }
0x13bb   :  { %v6921_v0 = vadd.f32 %v6920_v62, %v6919_v61 }
0x13bd   :  { %v6922_v2 = vrot.slane %v6921_v0, 1 }
0x13bf   :  { %v6923_v42 = vadd.f32 %v6922_v2, %v6921_v0 }
0x13c1   :  { %9460 = vrcp.f32 %v6923_v42 }
0x13cb   :  { %v9461_v50 = vpop.eup %9460 }
0x13cc   :  { %v6925_v51 = vmul.f32 %v9461_v50, %v9459_v60 }
0x13ce   :  { %6926 = vst.msk [vmem:[#allocation2] sm:$0x3] %vm6906_vm0, %v6925_v51 }
0x13cf   :  { %9478 = shalt.err (!%p9475_p4)
}
0x13d0   :  { %s9479_s11 = scalar_lea.hbm %s12053_s22, 32 }
0x13d1   :  { %p9480_p5 = scmp.ne.s32.totalorder %s12053_s22, %s9479_s11  ;;  %p9483_p6 = scmp.lt.u32.totalorder %s9479_s11, %s12053_s22 }
0x13d3   :  { %p9485_p7 = pnand %p9483_p6, %p9480_p5 }
0x13d5   :  { %9488 = shalt.err (!%p9485_p7)
}
0x13d6   :  { %6936 = dma.vmem_to_hbm [thread:$0]  %s6934_s21, 32, %s12053_s22, [#allocation3]  }
0x13d7   :  { %9489 = dma.done.wait [#allocation3], 32  }
0x13d8   :  { %9490 = vsyncadd [#allocation3], 4294967264 }
0x13d9   :  { %6940 = vsyncpa [#allocation3], 1 }

</bundles_post_ra>
